<compile_context>
chip_gen: v7x
topology: tpu7x:2x2x1
jax: 0.10.0
libtpu: 0.0.40
codegen_flags: <defaults>
</compile_context>

<pallas_src>
import functools

import jax
import jax.numpy as jnp
from jax.experimental import pallas as pl
from jax.experimental.pallas import tpu as pltpu


# ----------------------------- config (small) -------------------------------
N_LAYERS = 2
D_MODEL = 64
VOCAB_SIZE = 100
SEQ_LEN = 16
N_HEADS = 4
BATCH = 2
LN_EPS = 1e-5
NEG_INF = -1e30     # safe: masking / max-subtraction stay in f32


# ------------------------------ kernel helpers -------------------------------
def _layernorm(x, gamma, beta, eps=LN_EPS):
    mu = jnp.mean(x, axis=-1, keepdims=True)
    var = jnp.mean((x - mu) ** 2, axis=-1, keepdims=True)
    return (x - mu) * jax.lax.rsqrt(var + eps) * gamma + beta


def clip_fused_kernel(emb_ref,
                      ln1_g_ref, ln1_b_ref,
                      wqkv_ref, bqkv_ref,
                      wo_ref, bo_ref,
                      ln2_g_ref, ln2_b_ref,
                      w1_ref, b1_ref, w2_ref, b2_ref,
                      fin_g_ref, fin_b_ref,
                      o_ref,
                      *, n_layers, n_heads, batch, seq_len):
    R, D = emb_ref.shape                       # R = batch * seq_len
    dh = D // n_heads

    # Residual stream in f32.  Token + positional embeddings already summed in
    # the wrapper (fused into the XLA gather).
    x = emb_ref[...]                           # (R, D) f32

    # Per-sequence causal mask, hoisted out of the layer loop (loop-invariant;
    # JAX does not CSE broadcasts).  (1, S, S) so it broadcasts over H*B.
    row = jax.lax.broadcasted_iota(jnp.int32, (1, seq_len, seq_len), 1)
    col = jax.lax.broadcasted_iota(jnp.int32, (1, seq_len, seq_len), 2)
    causal = col <= row                        # (1, S, S) bool

    def split_heads(qkv, blk):
        # (R, 3D) f32 -> (H*B, S, dh): static lane-slice per head (16-lane
        # chunks) + sublane split of the row dim into (batch, seq).  Leading
        # index is head-major: n = hi * batch + b.
        parts = []
        for hi in range(n_heads):
            c0 = blk * D + hi * dh
            parts.append(qkv[:, c0:c0 + dh].reshape(batch, seq_len, dh))
        return jnp.concatenate(parts, axis=0)

    for l in range(n_layers):
        # ---------------- attention block (pre-LN, causal) ----------------
        h = _layernorm(x, ln1_g_ref[l], ln1_b_ref[l])                    # (R, D) f32

        # One fused, lane-dense QKV matmul (N = 3D = 192 lanes).  The 1/sqrt(dh)
        # scale is already folded into the Q columns / Q bias at init time.
        qkv = jnp.dot(h.astype(jnp.bfloat16), wqkv_ref[l],
                      preferred_element_type=jnp.float32) + bqkv_ref[l]  # (R, 3D) f32

        q = split_heads(qkv, 0).astype(jnp.bfloat16)                     # (H*B, S, dh)
        k = split_heads(qkv, 1).astype(jnp.bfloat16)
        v = split_heads(qkv, 2).astype(jnp.bfloat16)

        # Head- and batch-batched score / context matmuls: (H*B, S, S) scores,
        # no cross-batch waste, per-sequence causal mask.
        s = jnp.einsum('nqd,nkd->nqk', q, k,
                       preferred_element_type=jnp.float32)               # (H*B, S, S)
        s = jnp.where(causal, s, NEG_INF)
        s = s - jnp.max(s, axis=-1, keepdims=True)
        p = jnp.exp(s)
        p = p * pl.reciprocal(jnp.sum(p, axis=-1, keepdims=True),
                              approx=True)                               # EUP slot

        ctx = jnp.einsum('nqk,nkd->nqd', p.astype(jnp.bfloat16), v,
                         preferred_element_type=jnp.float32)             # (H*B, S, dh)

        # Merge heads back to (R, D) (sublane merge per head + lane concat),
        # then ONE K=D output-projection matmul.
        ctx2d = jnp.concatenate(
            [ctx[hi * batch:(hi + 1) * batch].reshape(R, dh)
             for hi in range(n_heads)],
            axis=-1)                                                     # (R, D)
        attn = jnp.dot(ctx2d.astype(jnp.bfloat16), wo_ref[l],
                       preferred_element_type=jnp.float32) + bo_ref[l]
        x = x + attn                                                     # residual 1

        # ---------------- MLP block (pre-LN, quick-GELU) ----------------
        h2 = _layernorm(x, ln2_g_ref[l], ln2_b_ref[l])
        a = jnp.dot(h2.astype(jnp.bfloat16), w1_ref[l],
                    preferred_element_type=jnp.float32) + b1_ref[l]      # (R, 4D) f32
        a = a * jax.nn.sigmoid(1.702 * a)                                # quick-GELU
        mlp = jnp.dot(a.astype(jnp.bfloat16), w2_ref[l],
                      preferred_element_type=jnp.float32) + b2_ref[l]
        x = x + mlp                                                      # residual 2

    # ---------------- final LayerNorm ----------------
    # TODO(synk): D=64 < 128 lanes -> masked 64-lane stores; a lane-dense
    # (R*D/128, 128) output repack is a small win at this size, skipped.
    o_ref[...] = _layernorm(x, fin_g_ref[...], fin_b_ref[...])


# ------------------------------ wrapper --------------------------------------
def clip_forward(tokens, params):
    B, S = tokens.shape
    D = params["embd"].shape[1]
    R = B * S

    # TODO(synk): the vocab-embedding gather stays in plain JAX; the positional
    # add is fused here (wrapper-side) so the kernel gets the finished (R, D)
    # activations and one fewer operand DMA.
    emb = (params["embd"][tokens] + params["pos_embd"][None]
           ).reshape(R, D).astype(jnp.float32)

    operands = (emb,
                params["ln1_g"], params["ln1_b"],
                params["wqkv"], params["bqkv"],
                params["wo"], params["bo"],
                params["ln2_g"], params["ln2_b"],
                params["w1"], params["b1"], params["w2"], params["b2"],
                params["final_g"], params["final_b"])

    out = pl.pallas_call(
        functools.partial(clip_fused_kernel,
                          n_layers=N_LAYERS, n_heads=N_HEADS,
                          batch=B, seq_len=S),
        out_shape=jax.ShapeDtypeStruct((R, D), jnp.float32),
        # No grid: single invocation, all operands whole-array resident in VMEM
        # (total << 1 MiB at these toy shapes).  See top comment for the
        # layer-streaming / row-parallel grid needed at production dims.
        compiler_params=pltpu.CompilerParams(vmem_limit_bytes=32 * 1024 * 1024),
    )(*operands)
    return out.reshape(B, S, D)


# ------------------------- pure-JAX reference (for checking) -----------------
def clip_forward_reference(tokens, params):
    """XLA reference mirroring the kernel's bf16-matmul / f32-accumulate math."""
    B, S = tokens.shape
    D = params["embd"].shape[1]
    H, dh = N_HEADS, D // N_HEADS
    R = B * S

    x = (params["embd"][tokens] + params["pos_embd"][None]
         ).reshape(R, D).astype(jnp.float32)

    causal = (jnp.arange(S)[None, :] <= jnp.arange(S)[:, None])          # (S, S)

    def ln(v, g, b):
        mu = jnp.mean(v, axis=-1, keepdims=True)
        var = jnp.mean((v - mu) ** 2, axis=-1, keepdims=True)
        return (v - mu) * jax.lax.rsqrt(var + LN_EPS) * g + b

    for l in range(N_LAYERS):
        h = ln(x, params["ln1_g"][l], params["ln1_b"][l]).astype(jnp.bfloat16)
        qkv = jnp.dot(h, params["wqkv"][l],
                      preferred_element_type=jnp.float32) + params["bqkv"][l]
        qkv = qkv.reshape(B, S, 3, H, dh)
        q = qkv[:, :, 0].transpose(0, 2, 1, 3).astype(jnp.bfloat16)       # (B,H,S,dh)
        k = qkv[:, :, 1].transpose(0, 2, 1, 3).astype(jnp.bfloat16)
        v = qkv[:, :, 2].transpose(0, 2, 1, 3).astype(jnp.bfloat16)
        # scale already folded into the Q projection at init time
        s = jnp.einsum('bhqd,bhkd->bhqk', q, k,
                       preferred_element_type=jnp.float32)
        s = jnp.where(causal[None, None], s, NEG_INF)
        p = jax.nn.softmax(s, axis=-1)
        ctx = jnp.einsum('bhqk,bhkd->bhqd', p.astype(jnp.bfloat16), v,
                         preferred_element_type=jnp.float32)
        ctx2d = ctx.transpose(0, 2, 1, 3).reshape(R, D)
        attn = jnp.dot(ctx2d.astype(jnp.bfloat16), params["wo"][l],
                       preferred_element_type=jnp.float32) + params["bo"][l]
        x = x + attn
        h2 = ln(x, params["ln2_g"][l], params["ln2_b"][l]).astype(jnp.bfloat16)
        a = jnp.dot(h2, params["w1"][l],
                    preferred_element_type=jnp.float32) + params["b1"][l]
        a = a * jax.nn.sigmoid(1.702 * a)
        mlp = jnp.dot(a.astype(jnp.bfloat16), params["w2"][l],
                      preferred_element_type=jnp.float32) + params["b2"][l]
        x = x + mlp
    return ln(x, params["final_g"], params["final_b"]).reshape(B, S, D)


# ------------------------------ param init -----------------------------------
def init_params(key):
    D, H, dh, H4 = D_MODEL, N_HEADS, D_MODEL // N_HEADS, 4 * D_MODEL
    scale = 1.0 / (dh ** 0.5)
    keys = iter(jax.random.split(key, 8 * N_LAYERS + 8))

    def nrm(shape, s=0.02):
        return (s * jax.random.normal(next(keys), shape)).astype(jnp.float32)

    names = ("ln1_g", "ln1_b", "wqkv", "bqkv", "wo", "bo",
             "ln2_g", "ln2_b", "w1", "b1", "w2", "b2")
    layers = {n: [] for n in names}

    for _ in range(N_LAYERS):
        wqkv = nrm((D, 3 * D))            # fused in_proj [Wq | Wk | Wv], head-major cols
        bqkv = nrm((3 * D,))
        # Fold the 1/sqrt(dh) attention scale into the Q projection (weights + bias).
        wqkv = wqkv.at[:, :D].multiply(scale)
        bqkv = bqkv.at[:D].multiply(scale)

        layers["ln1_g"].append(jnp.ones((1, D), jnp.float32))
        layers["ln1_b"].append(jnp.zeros((1, D), jnp.float32))
        layers["wqkv"].append(wqkv.astype(jnp.bfloat16))
        layers["bqkv"].append(bqkv.reshape(1, 3 * D))
        layers["wo"].append(nrm((D, D)).astype(jnp.bfloat16))    # rows = H*dh, head-major
        layers["bo"].append(nrm((1, D)))
        layers["ln2_g"].append(jnp.ones((1, D), jnp.float32))
        layers["ln2_b"].append(jnp.zeros((1, D), jnp.float32))
        layers["w1"].append(nrm((D, H4)).astype(jnp.bfloat16))
        layers["b1"].append(nrm((1, H4)))
        layers["w2"].append(nrm((H4, D)).astype(jnp.bfloat16))
        layers["b2"].append(nrm((1, D)))

    params = {n: jnp.stack(v, axis=0) for n, v in layers.items()}
    params["embd"] = nrm((VOCAB_SIZE, D))
    # nn.Parameter(torch.zeros(...)) in the reference; random here to exercise the add.
    params["pos_embd"] = nrm((SEQ_LEN, D))
    params["final_g"] = jnp.ones((1, D), jnp.float32)
    params["final_b"] = jnp.zeros((1, D), jnp.float32)
    return params


# --------------------------------- main ---------------------------------------
if __name__ == "__main__":
    key = jax.random.PRNGKey(0)
    pkey, tkey = jax.random.split(key)
    params = init_params(pkey)
    tokens = jax.random.randint(tkey, (BATCH, SEQ_LEN), 0, VOCAB_SIZE, dtype=jnp.int32)

    out = jax.block_until_ready(clip_forward(tokens, params))

    assert out.shape == (BATCH, SEQ_LEN, D_MODEL), out.shape
    assert out.dtype == jnp.float32
    assert bool(jnp.all(jnp.isfinite(out)))

    ref = clip_forward_reference(tokens, params)
    max_err = float(jnp.max(jnp.abs(out - ref)))
    assert bool(jnp.allclose(out, ref, atol=2e-2, rtol=2e-2)), max_err

    print("KERNEL_OK")
</pallas_src>

<mosaic_0001>
module attributes {stable_mosaic.version = 11 : i64} {
  func.func @clip_fused_kernel(%arg0: memref<32x64xf32, #tpu.memory_space<vmem>>, %arg1: memref<2x1x64xf32, #tpu.memory_space<vmem>>, %arg2: memref<2x1x64xf32, #tpu.memory_space<vmem>>, %arg3: memref<2x64x192xbf16, #tpu.memory_space<vmem>>, %arg4: memref<2x1x192xf32, #tpu.memory_space<vmem>>, %arg5: memref<2x64x64xbf16, #tpu.memory_space<vmem>>, %arg6: memref<2x1x64xf32, #tpu.memory_space<vmem>>, %arg7: memref<2x1x64xf32, #tpu.memory_space<vmem>>, %arg8: memref<2x1x64xf32, #tpu.memory_space<vmem>>, %arg9: memref<2x64x256xbf16, #tpu.memory_space<vmem>>, %arg10: memref<2x1x256xf32, #tpu.memory_space<vmem>>, %arg11: memref<2x256x64xbf16, #tpu.memory_space<vmem>>, %arg12: memref<2x1x64xf32, #tpu.memory_space<vmem>>, %arg13: memref<1x64xf32, #tpu.memory_space<vmem>>, %arg14: memref<1x64xf32, #tpu.memory_space<vmem>>, %arg15: memref<32x64xf32, #tpu.memory_space<vmem>>) attributes {dimension_semantics = [], scalar_prefetch = 0 : i64, scratch_operands = 0 : i64, tpu.core_type = #tpu.core_type<tc>} {
    %c0 = arith.constant 0 : index
    %c0_0 = arith.constant 0 : index
    %0 = vector.load %arg0[%c0, %c0_0] : memref<32x64xf32, #tpu.memory_space<vmem>>, vector<32x64xf32>
    %1 = tpu.iota {dimensions = array<i32: 1>} : vector<1x16x16xi32>
    %2 = tpu.iota {dimensions = array<i32: 2>} : vector<1x16x16xi32>
    %3 = arith.cmpi sle, %2, %1 : vector<1x16x16xi32>
    %c0_1 = arith.constant 0 : index
    %c0_2 = arith.constant 0 : index
    %c0_3 = arith.constant 0 : index
    %4 = vector.load %arg1[%c0_1, %c0_2, %c0_3] : memref<2x1x64xf32, #tpu.memory_space<vmem>>, vector<1x1x64xf32>
    %5 = vector.shape_cast %4 : vector<1x1x64xf32> to vector<1x64xf32>
    %c0_4 = arith.constant 0 : index
    %c0_5 = arith.constant 0 : index
    %c0_6 = arith.constant 0 : index
    %6 = vector.load %arg2[%c0_4, %c0_5, %c0_6] : memref<2x1x64xf32, #tpu.memory_space<vmem>>, vector<1x1x64xf32>
    %7 = vector.shape_cast %6 : vector<1x1x64xf32> to vector<1x64xf32>
    %cst = arith.constant dense<0.000000e+00> : vector<32xf32>
    %8 = vector.multi_reduction <add>, %0, %cst [1] : vector<32x64xf32> to vector<32xf32>
    %9 = vector.shape_cast %8 : vector<32xf32> to vector<32x1xf32>
    %cst_7 = arith.constant 6.400000e+01 : f32
    %10 = vector.broadcast %cst_7 : f32 to vector<32x1xf32>
    %11 = arith.divf %9, %10 : vector<32x1xf32>
    %12 = vector.broadcast %11 : vector<32x1xf32> to vector<32x64xf32>
    %13 = arith.subf %0, %12 : vector<32x64xf32>
    %14 = arith.mulf %13, %13 : vector<32x64xf32>
    %cst_8 = arith.constant dense<0.000000e+00> : vector<32xf32>
    %15 = vector.multi_reduction <add>, %14, %cst_8 [1] : vector<32x64xf32> to vector<32xf32>
    %16 = vector.shape_cast %15 : vector<32xf32> to vector<32x1xf32>
    %cst_9 = arith.constant 6.400000e+01 : f32
    %17 = vector.broadcast %cst_9 : f32 to vector<32x1xf32>
    %18 = arith.divf %16, %17 : vector<32x1xf32>
    %19 = vector.broadcast %11 : vector<32x1xf32> to vector<32x64xf32>
    %20 = arith.subf %0, %19 : vector<32x64xf32>
    %cst_10 = arith.constant 9.99999974E-6 : f32
    %21 = vector.broadcast %cst_10 : f32 to vector<32x1xf32>
    %22 = arith.addf %18, %21 : vector<32x1xf32>
    %23 = math.rsqrt %22 : vector<32x1xf32>
    %24 = vector.broadcast %23 : vector<32x1xf32> to vector<32x64xf32>
    %25 = arith.mulf %20, %24 : vector<32x64xf32>
    %26 = vector.broadcast %5 : vector<1x64xf32> to vector<32x64xf32>
    %27 = arith.mulf %25, %26 : vector<32x64xf32>
    %28 = vector.broadcast %7 : vector<1x64xf32> to vector<32x64xf32>
    %29 = arith.addf %27, %28 : vector<32x64xf32>
    %30 = arith.truncf %29 : vector<32x64xf32> to vector<32x64xbf16>
    %c0_11 = arith.constant 0 : index
    %c0_12 = arith.constant 0 : index
    %c0_13 = arith.constant 0 : index
    %31 = vector.load %arg3[%c0_11, %c0_12, %c0_13] : memref<2x64x192xbf16, #tpu.memory_space<vmem>>, vector<1x64x192xbf16>
    %32 = vector.shape_cast %31 : vector<1x64x192xbf16> to vector<64x192xbf16>
    %cst_14 = arith.constant dense<0.000000e+00> : vector<32x192xf32>
    %33 = tpu.matmul %30, %32, %cst_14 {dimension_numbers = #tpu.dot_dimension_numbers<[1], [0], [0], [1], [0, 0, 1, 1], [], []>} : vector<32x64xbf16>, vector<64x192xbf16>, vector<32x192xf32> -> vector<32x192xf32>
    %c0_15 = arith.constant 0 : index
    %c0_16 = arith.constant 0 : index
    %c0_17 = arith.constant 0 : index
    %34 = vector.load %arg4[%c0_15, %c0_16, %c0_17] : memref<2x1x192xf32, #tpu.memory_space<vmem>>, vector<1x1x192xf32>
    %35 = vector.shape_cast %34 : vector<1x1x192xf32> to vector<1x192xf32>
    %36 = vector.broadcast %35 : vector<1x192xf32> to vector<32x192xf32>
    %37 = arith.addf %33, %36 : vector<32x192xf32>
    %38 = vector.extract_strided_slice %37 {offsets = [0, 0], sizes = [32, 16], strides = [1, 1]} : vector<32x192xf32> to vector<32x16xf32>
    %39 = vector.shape_cast %38 : vector<32x16xf32> to vector<2x16x16xf32>
    %40 = vector.extract_strided_slice %37 {offsets = [0, 16], sizes = [32, 16], strides = [1, 1]} : vector<32x192xf32> to vector<32x16xf32>
    %41 = vector.shape_cast %40 : vector<32x16xf32> to vector<2x16x16xf32>
    %42 = vector.extract_strided_slice %37 {offsets = [0, 32], sizes = [32, 16], strides = [1, 1]} : vector<32x192xf32> to vector<32x16xf32>
    %43 = vector.shape_cast %42 : vector<32x16xf32> to vector<2x16x16xf32>
    %44 = vector.extract_strided_slice %37 {offsets = [0, 48], sizes = [32, 16], strides = [1, 1]} : vector<32x192xf32> to vector<32x16xf32>
    %45 = vector.shape_cast %44 : vector<32x16xf32> to vector<2x16x16xf32>
    %46 = tpu.concatenate %39, %41, %43, %45 in 0 : vector<2x16x16xf32>, vector<2x16x16xf32>, vector<2x16x16xf32>, vector<2x16x16xf32> -> vector<8x16x16xf32>
    %47 = arith.truncf %46 : vector<8x16x16xf32> to vector<8x16x16xbf16>
    %48 = vector.extract_strided_slice %37 {offsets = [0, 64], sizes = [32, 16], strides = [1, 1]} : vector<32x192xf32> to vector<32x16xf32>
    %49 = vector.shape_cast %48 : vector<32x16xf32> to vector<2x16x16xf32>
    %50 = vector.extract_strided_slice %37 {offsets = [0, 80], sizes = [32, 16], strides = [1, 1]} : vector<32x192xf32> to vector<32x16xf32>
    %51 = vector.shape_cast %50 : vector<32x16xf32> to vector<2x16x16xf32>
    %52 = vector.extract_strided_slice %37 {offsets = [0, 96], sizes = [32, 16], strides = [1, 1]} : vector<32x192xf32> to vector<32x16xf32>
    %53 = vector.shape_cast %52 : vector<32x16xf32> to vector<2x16x16xf32>
    %54 = vector.extract_strided_slice %37 {offsets = [0, 112], sizes = [32, 16], strides = [1, 1]} : vector<32x192xf32> to vector<32x16xf32>
    %55 = vector.shape_cast %54 : vector<32x16xf32> to vector<2x16x16xf32>
    %56 = tpu.concatenate %49, %51, %53, %55 in 0 : vector<2x16x16xf32>, vector<2x16x16xf32>, vector<2x16x16xf32>, vector<2x16x16xf32> -> vector<8x16x16xf32>
    %57 = arith.truncf %56 : vector<8x16x16xf32> to vector<8x16x16xbf16>
    %58 = vector.extract_strided_slice %37 {offsets = [0, 128], sizes = [32, 16], strides = [1, 1]} : vector<32x192xf32> to vector<32x16xf32>
    %59 = vector.shape_cast %58 : vector<32x16xf32> to vector<2x16x16xf32>
    %60 = vector.extract_strided_slice %37 {offsets = [0, 144], sizes = [32, 16], strides = [1, 1]} : vector<32x192xf32> to vector<32x16xf32>
    %61 = vector.shape_cast %60 : vector<32x16xf32> to vector<2x16x16xf32>
    %62 = vector.extract_strided_slice %37 {offsets = [0, 160], sizes = [32, 16], strides = [1, 1]} : vector<32x192xf32> to vector<32x16xf32>
    %63 = vector.shape_cast %62 : vector<32x16xf32> to vector<2x16x16xf32>
    %64 = vector.extract_strided_slice %37 {offsets = [0, 176], sizes = [32, 16], strides = [1, 1]} : vector<32x192xf32> to vector<32x16xf32>
    %65 = vector.shape_cast %64 : vector<32x16xf32> to vector<2x16x16xf32>
    %66 = tpu.concatenate %59, %61, %63, %65 in 0 : vector<2x16x16xf32>, vector<2x16x16xf32>, vector<2x16x16xf32>, vector<2x16x16xf32> -> vector<8x16x16xf32>
    %67 = arith.truncf %66 : vector<8x16x16xf32> to vector<8x16x16xbf16>
    "tpu.trace_start"() <{level = 10 : i32, message = "nqd,nkd->nqk"}> : () -> ()
    %cst_18 = arith.constant dense<0.000000e+00> : vector<8x16x16xf32>
    %68 = tpu.matmul %47, %57, %cst_18 {dimension_numbers = #tpu.dot_dimension_numbers<[2], [2], [1], [1], [0, 0, 0, 1, 1, 1], [0], [0]>} : vector<8x16x16xbf16>, vector<8x16x16xbf16>, vector<8x16x16xf32> -> vector<8x16x16xf32>
    %cst_19 = arith.constant -1.000000e+30 : f32
    "tpu.trace_stop"() : () -> ()
    %69 = vector.shape_cast %3 : vector<1x16x16xi1> to vector<1x16x16xi1>
    %70 = vector.broadcast %69 : vector<1x16x16xi1> to vector<8x16x16xi1>
    %71 = vector.broadcast %cst_19 : f32 to vector<8x16x16xf32>
    %72 = arith.select %70, %68, %71 : vector<8x16x16xi1>, vector<8x16x16xf32>
    %cst_20 = arith.constant dense<0xFF800000> : vector<8x16xf32>
    %73 = vector.multi_reduction <maximumf>, %72, %cst_20 [2] : vector<8x16x16xf32> to vector<8x16xf32>
    %74 = vector.shape_cast %73 : vector<8x16xf32> to vector<8x16x1xf32>
    %75 = vector.broadcast %74 : vector<8x16x1xf32> to vector<8x16x16xf32>
    %76 = arith.subf %72, %75 : vector<8x16x16xf32>
    %77 = math.exp %76 : vector<8x16x16xf32>
    %cst_21 = arith.constant dense<0.000000e+00> : vector<8x16xf32>
    %78 = vector.multi_reduction <add>, %77, %cst_21 [2] : vector<8x16x16xf32> to vector<8x16xf32>
    %79 = vector.shape_cast %78 : vector<8x16xf32> to vector<8x16x1xf32>
    %80 = tpu.reciprocal %79 {approx = true} : vector<8x16x1xf32> -> vector<8x16x1xf32>
    %81 = vector.broadcast %80 : vector<8x16x1xf32> to vector<8x16x16xf32>
    %82 = arith.mulf %77, %81 : vector<8x16x16xf32>
    %83 = arith.truncf %82 : vector<8x16x16xf32> to vector<8x16x16xbf16>
    "tpu.trace_start"() <{level = 10 : i32, message = "nqk,nkd->nqd"}> : () -> ()
    %cst_22 = arith.constant dense<0.000000e+00> : vector<8x16x16xf32>
    %84 = tpu.matmul %83, %67, %cst_22 {dimension_numbers = #tpu.dot_dimension_numbers<[2], [1], [1], [2], [0, 0, 0, 1, 1, 2], [0], [0]>} : vector<8x16x16xbf16>, vector<8x16x16xbf16>, vector<8x16x16xf32> -> vector<8x16x16xf32>
    "tpu.trace_stop"() : () -> ()
    %85 = vector.extract_strided_slice %84 {offsets = [0, 0, 0], sizes = [2, 16, 16], strides = [1, 1, 1]} : vector<8x16x16xf32> to vector<2x16x16xf32>
    %86 = vector.shape_cast %85 : vector<2x16x16xf32> to vector<32x16xf32>
    %87 = vector.extract_strided_slice %84 {offsets = [2, 0, 0], sizes = [2, 16, 16], strides = [1, 1, 1]} : vector<8x16x16xf32> to vector<2x16x16xf32>
    %88 = vector.shape_cast %87 : vector<2x16x16xf32> to vector<32x16xf32>
    %89 = vector.extract_strided_slice %84 {offsets = [4, 0, 0], sizes = [2, 16, 16], strides = [1, 1, 1]} : vector<8x16x16xf32> to vector<2x16x16xf32>
    %90 = vector.shape_cast %89 : vector<2x16x16xf32> to vector<32x16xf32>
    %91 = vector.extract_strided_slice %84 {offsets = [6, 0, 0], sizes = [2, 16, 16], strides = [1, 1, 1]} : vector<8x16x16xf32> to vector<2x16x16xf32>
    %92 = vector.shape_cast %91 : vector<2x16x16xf32> to vector<32x16xf32>
    %93 = tpu.concatenate %86, %88, %90, %92 in 1 : vector<32x16xf32>, vector<32x16xf32>, vector<32x16xf32>, vector<32x16xf32> -> vector<32x64xf32>
    %94 = arith.truncf %93 : vector<32x64xf32> to vector<32x64xbf16>
    %c0_23 = arith.constant 0 : index
    %c0_24 = arith.constant 0 : index
    %c0_25 = arith.constant 0 : index
    %95 = vector.load %arg5[%c0_23, %c0_24, %c0_25] : memref<2x64x64xbf16, #tpu.memory_space<vmem>>, vector<1x64x64xbf16>
    %96 = vector.shape_cast %95 : vector<1x64x64xbf16> to vector<64x64xbf16>
    %cst_26 = arith.constant dense<0.000000e+00> : vector<32x64xf32>
    %97 = tpu.matmul %94, %96, %cst_26 {dimension_numbers = #tpu.dot_dimension_numbers<[1], [0], [0], [1], [0, 0, 1, 1], [], []>} : vector<32x64xbf16>, vector<64x64xbf16>, vector<32x64xf32> -> vector<32x64xf32>
    %c0_27 = arith.constant 0 : index
    %c0_28 = arith.constant 0 : index
    %c0_29 = arith.constant 0 : index
    %98 = vector.load %arg6[%c0_27, %c0_28, %c0_29] : memref<2x1x64xf32, #tpu.memory_space<vmem>>, vector<1x1x64xf32>
    %99 = vector.shape_cast %98 : vector<1x1x64xf32> to vector<1x64xf32>
    %100 = vector.broadcast %99 : vector<1x64xf32> to vector<32x64xf32>
    %101 = arith.addf %97, %100 : vector<32x64xf32>
    %102 = arith.addf %0, %101 : vector<32x64xf32>
    %c0_30 = arith.constant 0 : index
    %c0_31 = arith.constant 0 : index
    %c0_32 = arith.constant 0 : index
    %103 = vector.load %arg7[%c0_30, %c0_31, %c0_32] : memref<2x1x64xf32, #tpu.memory_space<vmem>>, vector<1x1x64xf32>
    %104 = vector.shape_cast %103 : vector<1x1x64xf32> to vector<1x64xf32>
    %c0_33 = arith.constant 0 : index
    %c0_34 = arith.constant 0 : index
    %c0_35 = arith.constant 0 : index
    %105 = vector.load %arg8[%c0_33, %c0_34, %c0_35] : memref<2x1x64xf32, #tpu.memory_space<vmem>>, vector<1x1x64xf32>
    %106 = vector.shape_cast %105 : vector<1x1x64xf32> to vector<1x64xf32>
    %cst_36 = arith.constant dense<0.000000e+00> : vector<32xf32>
    %107 = vector.multi_reduction <add>, %102, %cst_36 [1] : vector<32x64xf32> to vector<32xf32>
    %108 = vector.shape_cast %107 : vector<32xf32> to vector<32x1xf32>
    %cst_37 = arith.constant 6.400000e+01 : f32
    %109 = vector.broadcast %cst_37 : f32 to vector<32x1xf32>
    %110 = arith.divf %108, %109 : vector<32x1xf32>
    %111 = vector.broadcast %110 : vector<32x1xf32> to vector<32x64xf32>
    %112 = arith.subf %102, %111 : vector<32x64xf32>
    %113 = arith.mulf %112, %112 : vector<32x64xf32>
    %cst_38 = arith.constant dense<0.000000e+00> : vector<32xf32>
    %114 = vector.multi_reduction <add>, %113, %cst_38 [1] : vector<32x64xf32> to vector<32xf32>
    %115 = vector.shape_cast %114 : vector<32xf32> to vector<32x1xf32>
    %cst_39 = arith.constant 6.400000e+01 : f32
    %116 = vector.broadcast %cst_39 : f32 to vector<32x1xf32>
    %117 = arith.divf %115, %116 : vector<32x1xf32>
    %118 = vector.broadcast %110 : vector<32x1xf32> to vector<32x64xf32>
    %119 = arith.subf %102, %118 : vector<32x64xf32>
    %cst_40 = arith.constant 9.99999974E-6 : f32
    %120 = vector.broadcast %cst_40 : f32 to vector<32x1xf32>
    %121 = arith.addf %117, %120 : vector<32x1xf32>
    %122 = math.rsqrt %121 : vector<32x1xf32>
    %123 = vector.broadcast %122 : vector<32x1xf32> to vector<32x64xf32>
    %124 = arith.mulf %119, %123 : vector<32x64xf32>
    %125 = vector.broadcast %104 : vector<1x64xf32> to vector<32x64xf32>
    %126 = arith.mulf %124, %125 : vector<32x64xf32>
    %127 = vector.broadcast %106 : vector<1x64xf32> to vector<32x64xf32>
    %128 = arith.addf %126, %127 : vector<32x64xf32>
    %129 = arith.truncf %128 : vector<32x64xf32> to vector<32x64xbf16>
    %c0_41 = arith.constant 0 : index
    %c0_42 = arith.constant 0 : index
    %c0_43 = arith.constant 0 : index
    %130 = vector.load %arg9[%c0_41, %c0_42, %c0_43] : memref<2x64x256xbf16, #tpu.memory_space<vmem>>, vector<1x64x256xbf16>
    %131 = vector.shape_cast %130 : vector<1x64x256xbf16> to vector<64x256xbf16>
    %cst_44 = arith.constant dense<0.000000e+00> : vector<32x256xf32>
    %132 = tpu.matmul %129, %131, %cst_44 {dimension_numbers = #tpu.dot_dimension_numbers<[1], [0], [0], [1], [0, 0, 1, 1], [], []>} : vector<32x64xbf16>, vector<64x256xbf16>, vector<32x256xf32> -> vector<32x256xf32>
    %c0_45 = arith.constant 0 : index
    %c0_46 = arith.constant 0 : index
    %c0_47 = arith.constant 0 : index
    %133 = vector.load %arg10[%c0_45, %c0_46, %c0_47] : memref<2x1x256xf32, #tpu.memory_space<vmem>>, vector<1x1x256xf32>
    %134 = vector.shape_cast %133 : vector<1x1x256xf32> to vector<1x256xf32>
    %135 = vector.broadcast %134 : vector<1x256xf32> to vector<32x256xf32>
    %136 = arith.addf %132, %135 : vector<32x256xf32>
    %cst_48 = arith.constant 1.702000e+00 : f32
    %137 = vector.broadcast %cst_48 : f32 to vector<32x256xf32>
    %138 = arith.mulf %137, %136 : vector<32x256xf32>
    %139 = arith.negf %138 : vector<32x256xf32>
    %140 = math.exp %139 : vector<32x256xf32>
    %cst_49 = arith.constant 1.000000e+00 : f32
    %141 = vector.broadcast %cst_49 : f32 to vector<32x256xf32>
    %142 = arith.addf %141, %140 : vector<32x256xf32>
    %143 = arith.divf %141, %142 : vector<32x256xf32>
    %144 = arith.mulf %136, %143 : vector<32x256xf32>
    %145 = arith.truncf %144 : vector<32x256xf32> to vector<32x256xbf16>
    %c0_50 = arith.constant 0 : index
    %c0_51 = arith.constant 0 : index
    %c0_52 = arith.constant 0 : index
    %146 = vector.load %arg11[%c0_50, %c0_51, %c0_52] : memref<2x256x64xbf16, #tpu.memory_space<vmem>>, vector<1x256x64xbf16>
    %147 = vector.shape_cast %146 : vector<1x256x64xbf16> to vector<256x64xbf16>
    %cst_53 = arith.constant dense<0.000000e+00> : vector<32x64xf32>
    %148 = tpu.matmul %145, %147, %cst_53 {dimension_numbers = #tpu.dot_dimension_numbers<[1], [0], [0], [1], [0, 0, 1, 1], [], []>} : vector<32x256xbf16>, vector<256x64xbf16>, vector<32x64xf32> -> vector<32x64xf32>
    %c0_54 = arith.constant 0 : index
    %c0_55 = arith.constant 0 : index
    %c0_56 = arith.constant 0 : index
    %149 = vector.load %arg12[%c0_54, %c0_55, %c0_56] : memref<2x1x64xf32, #tpu.memory_space<vmem>>, vector<1x1x64xf32>
    %150 = vector.shape_cast %149 : vector<1x1x64xf32> to vector<1x64xf32>
    %151 = vector.broadcast %150 : vector<1x64xf32> to vector<32x64xf32>
    %152 = arith.addf %148, %151 : vector<32x64xf32>
    %153 = arith.addf %102, %152 : vector<32x64xf32>
    %c1 = arith.constant 1 : index
    %c0_57 = arith.constant 0 : index
    %c0_58 = arith.constant 0 : index
    %154 = vector.load %arg1[%c1, %c0_57, %c0_58] : memref<2x1x64xf32, #tpu.memory_space<vmem>>, vector<1x1x64xf32>
    %155 = vector.shape_cast %154 : vector<1x1x64xf32> to vector<1x64xf32>
    %c1_59 = arith.constant 1 : index
    %c0_60 = arith.constant 0 : index
    %c0_61 = arith.constant 0 : index
    %156 = vector.load %arg2[%c1_59, %c0_60, %c0_61] : memref<2x1x64xf32, #tpu.memory_space<vmem>>, vector<1x1x64xf32>
    %157 = vector.shape_cast %156 : vector<1x1x64xf32> to vector<1x64xf32>
    %cst_62 = arith.constant dense<0.000000e+00> : vector<32xf32>
    %158 = vector.multi_reduction <add>, %153, %cst_62 [1] : vector<32x64xf32> to vector<32xf32>
    %159 = vector.shape_cast %158 : vector<32xf32> to vector<32x1xf32>
    %cst_63 = arith.constant 6.400000e+01 : f32
    %160 = vector.broadcast %cst_63 : f32 to vector<32x1xf32>
    %161 = arith.divf %159, %160 : vector<32x1xf32>
    %162 = vector.broadcast %161 : vector<32x1xf32> to vector<32x64xf32>
    %163 = arith.subf %153, %162 : vector<32x64xf32>
    %164 = arith.mulf %163, %163 : vector<32x64xf32>
    %cst_64 = arith.constant dense<0.000000e+00> : vector<32xf32>
    %165 = vector.multi_reduction <add>, %164, %cst_64 [1] : vector<32x64xf32> to vector<32xf32>
    %166 = vector.shape_cast %165 : vector<32xf32> to vector<32x1xf32>
    %cst_65 = arith.constant 6.400000e+01 : f32
    %167 = vector.broadcast %cst_65 : f32 to vector<32x1xf32>
    %168 = arith.divf %166, %167 : vector<32x1xf32>
    %169 = vector.broadcast %161 : vector<32x1xf32> to vector<32x64xf32>
    %170 = arith.subf %153, %169 : vector<32x64xf32>
    %cst_66 = arith.constant 9.99999974E-6 : f32
    %171 = vector.broadcast %cst_66 : f32 to vector<32x1xf32>
    %172 = arith.addf %168, %171 : vector<32x1xf32>
    %173 = math.rsqrt %172 : vector<32x1xf32>
    %174 = vector.broadcast %173 : vector<32x1xf32> to vector<32x64xf32>
    %175 = arith.mulf %170, %174 : vector<32x64xf32>
    %176 = vector.broadcast %155 : vector<1x64xf32> to vector<32x64xf32>
    %177 = arith.mulf %175, %176 : vector<32x64xf32>
    %178 = vector.broadcast %157 : vector<1x64xf32> to vector<32x64xf32>
    %179 = arith.addf %177, %178 : vector<32x64xf32>
    %180 = arith.truncf %179 : vector<32x64xf32> to vector<32x64xbf16>
    %c1_67 = arith.constant 1 : index
    %c0_68 = arith.constant 0 : index
    %c0_69 = arith.constant 0 : index
    %181 = vector.load %arg3[%c1_67, %c0_68, %c0_69] : memref<2x64x192xbf16, #tpu.memory_space<vmem>>, vector<1x64x192xbf16>
    %182 = vector.shape_cast %181 : vector<1x64x192xbf16> to vector<64x192xbf16>
    %cst_70 = arith.constant dense<0.000000e+00> : vector<32x192xf32>
    %183 = tpu.matmul %180, %182, %cst_70 {dimension_numbers = #tpu.dot_dimension_numbers<[1], [0], [0], [1], [0, 0, 1, 1], [], []>} : vector<32x64xbf16>, vector<64x192xbf16>, vector<32x192xf32> -> vector<32x192xf32>
    %c1_71 = arith.constant 1 : index
    %c0_72 = arith.constant 0 : index
    %c0_73 = arith.constant 0 : index
    %184 = vector.load %arg4[%c1_71, %c0_72, %c0_73] : memref<2x1x192xf32, #tpu.memory_space<vmem>>, vector<1x1x192xf32>
    %185 = vector.shape_cast %184 : vector<1x1x192xf32> to vector<1x192xf32>
    %186 = vector.broadcast %185 : vector<1x192xf32> to vector<32x192xf32>
    %187 = arith.addf %183, %186 : vector<32x192xf32>
    %188 = vector.extract_strided_slice %187 {offsets = [0, 0], sizes = [32, 16], strides = [1, 1]} : vector<32x192xf32> to vector<32x16xf32>
    %189 = vector.shape_cast %188 : vector<32x16xf32> to vector<2x16x16xf32>
    %190 = vector.extract_strided_slice %187 {offsets = [0, 16], sizes = [32, 16], strides = [1, 1]} : vector<32x192xf32> to vector<32x16xf32>
    %191 = vector.shape_cast %190 : vector<32x16xf32> to vector<2x16x16xf32>
    %192 = vector.extract_strided_slice %187 {offsets = [0, 32], sizes = [32, 16], strides = [1, 1]} : vector<32x192xf32> to vector<32x16xf32>
    %193 = vector.shape_cast %192 : vector<32x16xf32> to vector<2x16x16xf32>
    %194 = vector.extract_strided_slice %187 {offsets = [0, 48], sizes = [32, 16], strides = [1, 1]} : vector<32x192xf32> to vector<32x16xf32>
    %195 = vector.shape_cast %194 : vector<32x16xf32> to vector<2x16x16xf32>
    %196 = tpu.concatenate %189, %191, %193, %195 in 0 : vector<2x16x16xf32>, vector<2x16x16xf32>, vector<2x16x16xf32>, vector<2x16x16xf32> -> vector<8x16x16xf32>
    %197 = arith.truncf %196 : vector<8x16x16xf32> to vector<8x16x16xbf16>
    %198 = vector.extract_strided_slice %187 {offsets = [0, 64], sizes = [32, 16], strides = [1, 1]} : vector<32x192xf32> to vector<32x16xf32>
    %199 = vector.shape_cast %198 : vector<32x16xf32> to vector<2x16x16xf32>
    %200 = vector.extract_strided_slice %187 {offsets = [0, 80], sizes = [32, 16], strides = [1, 1]} : vector<32x192xf32> to vector<32x16xf32>
    %201 = vector.shape_cast %200 : vector<32x16xf32> to vector<2x16x16xf32>
    %202 = vector.extract_strided_slice %187 {offsets = [0, 96], sizes = [32, 16], strides = [1, 1]} : vector<32x192xf32> to vector<32x16xf32>
    %203 = vector.shape_cast %202 : vector<32x16xf32> to vector<2x16x16xf32>
    %204 = vector.extract_strided_slice %187 {offsets = [0, 112], sizes = [32, 16], strides = [1, 1]} : vector<32x192xf32> to vector<32x16xf32>
    %205 = vector.shape_cast %204 : vector<32x16xf32> to vector<2x16x16xf32>
    %206 = tpu.concatenate %199, %201, %203, %205 in 0 : vector<2x16x16xf32>, vector<2x16x16xf32>, vector<2x16x16xf32>, vector<2x16x16xf32> -> vector<8x16x16xf32>
    %207 = arith.truncf %206 : vector<8x16x16xf32> to vector<8x16x16xbf16>
    %208 = vector.extract_strided_slice %187 {offsets = [0, 128], sizes = [32, 16], strides = [1, 1]} : vector<32x192xf32> to vector<32x16xf32>
    %209 = vector.shape_cast %208 : vector<32x16xf32> to vector<2x16x16xf32>
    %210 = vector.extract_strided_slice %187 {offsets = [0, 144], sizes = [32, 16], strides = [1, 1]} : vector<32x192xf32> to vector<32x16xf32>
    %211 = vector.shape_cast %210 : vector<32x16xf32> to vector<2x16x16xf32>
    %212 = vector.extract_strided_slice %187 {offsets = [0, 160], sizes = [32, 16], strides = [1, 1]} : vector<32x192xf32> to vector<32x16xf32>
    %213 = vector.shape_cast %212 : vector<32x16xf32> to vector<2x16x16xf32>
    %214 = vector.extract_strided_slice %187 {offsets = [0, 176], sizes = [32, 16], strides = [1, 1]} : vector<32x192xf32> to vector<32x16xf32>
    %215 = vector.shape_cast %214 : vector<32x16xf32> to vector<2x16x16xf32>
    %216 = tpu.concatenate %209, %211, %213, %215 in 0 : vector<2x16x16xf32>, vector<2x16x16xf32>, vector<2x16x16xf32>, vector<2x16x16xf32> -> vector<8x16x16xf32>
    %217 = arith.truncf %216 : vector<8x16x16xf32> to vector<8x16x16xbf16>
    "tpu.trace_start"() <{level = 10 : i32, message = "nqd,nkd->nqk"}> : () -> ()
    %cst_74 = arith.constant dense<0.000000e+00> : vector<8x16x16xf32>
    %218 = tpu.matmul %197, %207, %cst_74 {dimension_numbers = #tpu.dot_dimension_numbers<[2], [2], [1], [1], [0, 0, 0, 1, 1, 1], [0], [0]>} : vector<8x16x16xbf16>, vector<8x16x16xbf16>, vector<8x16x16xf32> -> vector<8x16x16xf32>
    %cst_75 = arith.constant -1.000000e+30 : f32
    "tpu.trace_stop"() : () -> ()
    %219 = vector.shape_cast %3 : vector<1x16x16xi1> to vector<1x16x16xi1>
    %220 = vector.broadcast %219 : vector<1x16x16xi1> to vector<8x16x16xi1>
    %221 = vector.broadcast %cst_75 : f32 to vector<8x16x16xf32>
    %222 = arith.select %220, %218, %221 : vector<8x16x16xi1>, vector<8x16x16xf32>
    %cst_76 = arith.constant dense<0xFF800000> : vector<8x16xf32>
    %223 = vector.multi_reduction <maximumf>, %222, %cst_76 [2] : vector<8x16x16xf32> to vector<8x16xf32>
    %224 = vector.shape_cast %223 : vector<8x16xf32> to vector<8x16x1xf32>
    %225 = vector.broadcast %224 : vector<8x16x1xf32> to vector<8x16x16xf32>
    %226 = arith.subf %222, %225 : vector<8x16x16xf32>
    %227 = math.exp %226 : vector<8x16x16xf32>
    %cst_77 = arith.constant dense<0.000000e+00> : vector<8x16xf32>
    %228 = vector.multi_reduction <add>, %227, %cst_77 [2] : vector<8x16x16xf32> to vector<8x16xf32>
    %229 = vector.shape_cast %228 : vector<8x16xf32> to vector<8x16x1xf32>
    %230 = tpu.reciprocal %229 {approx = true} : vector<8x16x1xf32> -> vector<8x16x1xf32>
    %231 = vector.broadcast %230 : vector<8x16x1xf32> to vector<8x16x16xf32>
    %232 = arith.mulf %227, %231 : vector<8x16x16xf32>
    %233 = arith.truncf %232 : vector<8x16x16xf32> to vector<8x16x16xbf16>
    "tpu.trace_start"() <{level = 10 : i32, message = "nqk,nkd->nqd"}> : () -> ()
    %cst_78 = arith.constant dense<0.000000e+00> : vector<8x16x16xf32>
    %234 = tpu.matmul %233, %217, %cst_78 {dimension_numbers = #tpu.dot_dimension_numbers<[2], [1], [1], [2], [0, 0, 0, 1, 1, 2], [0], [0]>} : vector<8x16x16xbf16>, vector<8x16x16xbf16>, vector<8x16x16xf32> -> vector<8x16x16xf32>
    "tpu.trace_stop"() : () -> ()
    %235 = vector.extract_strided_slice %234 {offsets = [0, 0, 0], sizes = [2, 16, 16], strides = [1, 1, 1]} : vector<8x16x16xf32> to vector<2x16x16xf32>
    %236 = vector.shape_cast %235 : vector<2x16x16xf32> to vector<32x16xf32>
    %237 = vector.extract_strided_slice %234 {offsets = [2, 0, 0], sizes = [2, 16, 16], strides = [1, 1, 1]} : vector<8x16x16xf32> to vector<2x16x16xf32>
    %238 = vector.shape_cast %237 : vector<2x16x16xf32> to vector<32x16xf32>
    %239 = vector.extract_strided_slice %234 {offsets = [4, 0, 0], sizes = [2, 16, 16], strides = [1, 1, 1]} : vector<8x16x16xf32> to vector<2x16x16xf32>
    %240 = vector.shape_cast %239 : vector<2x16x16xf32> to vector<32x16xf32>
    %241 = vector.extract_strided_slice %234 {offsets = [6, 0, 0], sizes = [2, 16, 16], strides = [1, 1, 1]} : vector<8x16x16xf32> to vector<2x16x16xf32>
    %242 = vector.shape_cast %241 : vector<2x16x16xf32> to vector<32x16xf32>
    %243 = tpu.concatenate %236, %238, %240, %242 in 1 : vector<32x16xf32>, vector<32x16xf32>, vector<32x16xf32>, vector<32x16xf32> -> vector<32x64xf32>
    %244 = arith.truncf %243 : vector<32x64xf32> to vector<32x64xbf16>
    %c1_79 = arith.constant 1 : index
    %c0_80 = arith.constant 0 : index
    %c0_81 = arith.constant 0 : index
    %245 = vector.load %arg5[%c1_79, %c0_80, %c0_81] : memref<2x64x64xbf16, #tpu.memory_space<vmem>>, vector<1x64x64xbf16>
    %246 = vector.shape_cast %245 : vector<1x64x64xbf16> to vector<64x64xbf16>
    %cst_82 = arith.constant dense<0.000000e+00> : vector<32x64xf32>
    %247 = tpu.matmul %244, %246, %cst_82 {dimension_numbers = #tpu.dot_dimension_numbers<[1], [0], [0], [1], [0, 0, 1, 1], [], []>} : vector<32x64xbf16>, vector<64x64xbf16>, vector<32x64xf32> -> vector<32x64xf32>
    %c1_83 = arith.constant 1 : index
    %c0_84 = arith.constant 0 : index
    %c0_85 = arith.constant 0 : index
    %248 = vector.load %arg6[%c1_83, %c0_84, %c0_85] : memref<2x1x64xf32, #tpu.memory_space<vmem>>, vector<1x1x64xf32>
    %249 = vector.shape_cast %248 : vector<1x1x64xf32> to vector<1x64xf32>
    %250 = vector.broadcast %249 : vector<1x64xf32> to vector<32x64xf32>
    %251 = arith.addf %247, %250 : vector<32x64xf32>
    %252 = arith.addf %153, %251 : vector<32x64xf32>
    %c1_86 = arith.constant 1 : index
    %c0_87 = arith.constant 0 : index
    %c0_88 = arith.constant 0 : index
    %253 = vector.load %arg7[%c1_86, %c0_87, %c0_88] : memref<2x1x64xf32, #tpu.memory_space<vmem>>, vector<1x1x64xf32>
    %254 = vector.shape_cast %253 : vector<1x1x64xf32> to vector<1x64xf32>
    %c1_89 = arith.constant 1 : index
    %c0_90 = arith.constant 0 : index
    %c0_91 = arith.constant 0 : index
    %255 = vector.load %arg8[%c1_89, %c0_90, %c0_91] : memref<2x1x64xf32, #tpu.memory_space<vmem>>, vector<1x1x64xf32>
    %256 = vector.shape_cast %255 : vector<1x1x64xf32> to vector<1x64xf32>
    %cst_92 = arith.constant dense<0.000000e+00> : vector<32xf32>
    %257 = vector.multi_reduction <add>, %252, %cst_92 [1] : vector<32x64xf32> to vector<32xf32>
    %258 = vector.shape_cast %257 : vector<32xf32> to vector<32x1xf32>
    %cst_93 = arith.constant 6.400000e+01 : f32
    %259 = vector.broadcast %cst_93 : f32 to vector<32x1xf32>
    %260 = arith.divf %258, %259 : vector<32x1xf32>
    %261 = vector.broadcast %260 : vector<32x1xf32> to vector<32x64xf32>
    %262 = arith.subf %252, %261 : vector<32x64xf32>
    %263 = arith.mulf %262, %262 : vector<32x64xf32>
    %cst_94 = arith.constant dense<0.000000e+00> : vector<32xf32>
    %264 = vector.multi_reduction <add>, %263, %cst_94 [1] : vector<32x64xf32> to vector<32xf32>
    %265 = vector.shape_cast %264 : vector<32xf32> to vector<32x1xf32>
    %cst_95 = arith.constant 6.400000e+01 : f32
    %266 = vector.broadcast %cst_95 : f32 to vector<32x1xf32>
    %267 = arith.divf %265, %266 : vector<32x1xf32>
    %268 = vector.broadcast %260 : vector<32x1xf32> to vector<32x64xf32>
    %269 = arith.subf %252, %268 : vector<32x64xf32>
    %cst_96 = arith.constant 9.99999974E-6 : f32
    %270 = vector.broadcast %cst_96 : f32 to vector<32x1xf32>
    %271 = arith.addf %267, %270 : vector<32x1xf32>
    %272 = math.rsqrt %271 : vector<32x1xf32>
    %273 = vector.broadcast %272 : vector<32x1xf32> to vector<32x64xf32>
    %274 = arith.mulf %269, %273 : vector<32x64xf32>
    %275 = vector.broadcast %254 : vector<1x64xf32> to vector<32x64xf32>
    %276 = arith.mulf %274, %275 : vector<32x64xf32>
    %277 = vector.broadcast %256 : vector<1x64xf32> to vector<32x64xf32>
    %278 = arith.addf %276, %277 : vector<32x64xf32>
    %279 = arith.truncf %278 : vector<32x64xf32> to vector<32x64xbf16>
    %c1_97 = arith.constant 1 : index
    %c0_98 = arith.constant 0 : index
    %c0_99 = arith.constant 0 : index
    %280 = vector.load %arg9[%c1_97, %c0_98, %c0_99] : memref<2x64x256xbf16, #tpu.memory_space<vmem>>, vector<1x64x256xbf16>
    %281 = vector.shape_cast %280 : vector<1x64x256xbf16> to vector<64x256xbf16>
    %cst_100 = arith.constant dense<0.000000e+00> : vector<32x256xf32>
    %282 = tpu.matmul %279, %281, %cst_100 {dimension_numbers = #tpu.dot_dimension_numbers<[1], [0], [0], [1], [0, 0, 1, 1], [], []>} : vector<32x64xbf16>, vector<64x256xbf16>, vector<32x256xf32> -> vector<32x256xf32>
    %c1_101 = arith.constant 1 : index
    %c0_102 = arith.constant 0 : index
    %c0_103 = arith.constant 0 : index
    %283 = vector.load %arg10[%c1_101, %c0_102, %c0_103] : memref<2x1x256xf32, #tpu.memory_space<vmem>>, vector<1x1x256xf32>
    %284 = vector.shape_cast %283 : vector<1x1x256xf32> to vector<1x256xf32>
    %285 = vector.broadcast %284 : vector<1x256xf32> to vector<32x256xf32>
    %286 = arith.addf %282, %285 : vector<32x256xf32>
    %cst_104 = arith.constant 1.702000e+00 : f32
    %287 = vector.broadcast %cst_104 : f32 to vector<32x256xf32>
    %288 = arith.mulf %287, %286 : vector<32x256xf32>
    %289 = arith.negf %288 : vector<32x256xf32>
    %290 = math.exp %289 : vector<32x256xf32>
    %cst_105 = arith.constant 1.000000e+00 : f32
    %291 = vector.broadcast %cst_105 : f32 to vector<32x256xf32>
    %292 = arith.addf %291, %290 : vector<32x256xf32>
    %293 = arith.divf %291, %292 : vector<32x256xf32>
    %294 = arith.mulf %286, %293 : vector<32x256xf32>
    %295 = arith.truncf %294 : vector<32x256xf32> to vector<32x256xbf16>
    %c1_106 = arith.constant 1 : index
    %c0_107 = arith.constant 0 : index
    %c0_108 = arith.constant 0 : index
    %296 = vector.load %arg11[%c1_106, %c0_107, %c0_108] : memref<2x256x64xbf16, #tpu.memory_space<vmem>>, vector<1x256x64xbf16>
    %297 = vector.shape_cast %296 : vector<1x256x64xbf16> to vector<256x64xbf16>
    %cst_109 = arith.constant dense<0.000000e+00> : vector<32x64xf32>
    %298 = tpu.matmul %295, %297, %cst_109 {dimension_numbers = #tpu.dot_dimension_numbers<[1], [0], [0], [1], [0, 0, 1, 1], [], []>} : vector<32x256xbf16>, vector<256x64xbf16>, vector<32x64xf32> -> vector<32x64xf32>
    %c1_110 = arith.constant 1 : index
    %c0_111 = arith.constant 0 : index
    %c0_112 = arith.constant 0 : index
    %299 = vector.load %arg12[%c1_110, %c0_111, %c0_112] : memref<2x1x64xf32, #tpu.memory_space<vmem>>, vector<1x1x64xf32>
    %300 = vector.shape_cast %299 : vector<1x1x64xf32> to vector<1x64xf32>
    %301 = vector.broadcast %300 : vector<1x64xf32> to vector<32x64xf32>
    %302 = arith.addf %298, %301 : vector<32x64xf32>
    %303 = arith.addf %252, %302 : vector<32x64xf32>
    %c0_113 = arith.constant 0 : index
    %c0_114 = arith.constant 0 : index
    %304 = vector.load %arg13[%c0_113, %c0_114] : memref<1x64xf32, #tpu.memory_space<vmem>>, vector<1x64xf32>
    %c0_115 = arith.constant 0 : index
    %c0_116 = arith.constant 0 : index
    %305 = vector.load %arg14[%c0_115, %c0_116] : memref<1x64xf32, #tpu.memory_space<vmem>>, vector<1x64xf32>
    %cst_117 = arith.constant dense<0.000000e+00> : vector<32xf32>
    %306 = vector.multi_reduction <add>, %303, %cst_117 [1] : vector<32x64xf32> to vector<32xf32>
    %307 = vector.shape_cast %306 : vector<32xf32> to vector<32x1xf32>
    %cst_118 = arith.constant 6.400000e+01 : f32
    %308 = vector.broadcast %cst_118 : f32 to vector<32x1xf32>
    %309 = arith.divf %307, %308 : vector<32x1xf32>
    %310 = vector.broadcast %309 : vector<32x1xf32> to vector<32x64xf32>
    %311 = arith.subf %303, %310 : vector<32x64xf32>
    %312 = arith.mulf %311, %311 : vector<32x64xf32>
    %cst_119 = arith.constant dense<0.000000e+00> : vector<32xf32>
    %313 = vector.multi_reduction <add>, %312, %cst_119 [1] : vector<32x64xf32> to vector<32xf32>
    %314 = vector.shape_cast %313 : vector<32xf32> to vector<32x1xf32>
    %cst_120 = arith.constant 6.400000e+01 : f32
    %315 = vector.broadcast %cst_120 : f32 to vector<32x1xf32>
    %316 = arith.divf %314, %315 : vector<32x1xf32>
    %317 = vector.broadcast %309 : vector<32x1xf32> to vector<32x64xf32>
    %318 = arith.subf %303, %317 : vector<32x64xf32>
    %cst_121 = arith.constant 9.99999974E-6 : f32
    %319 = vector.broadcast %cst_121 : f32 to vector<32x1xf32>
    %320 = arith.addf %316, %319 : vector<32x1xf32>
    %321 = math.rsqrt %320 : vector<32x1xf32>
    %322 = vector.broadcast %321 : vector<32x1xf32> to vector<32x64xf32>
    %323 = arith.mulf %318, %322 : vector<32x64xf32>
    %324 = vector.broadcast %304 : vector<1x64xf32> to vector<32x64xf32>
    %325 = arith.mulf %323, %324 : vector<32x64xf32>
    %326 = vector.broadcast %305 : vector<1x64xf32> to vector<32x64xf32>
    %327 = arith.addf %325, %326 : vector<32x64xf32>
    %c0_122 = arith.constant 0 : index
    %c0_123 = arith.constant 0 : index
    %328 = vector.load %arg15[%c0_122, %c0_123] : memref<32x64xf32, #tpu.memory_space<vmem>>, vector<32x64xf32>
    tpu.vector_store %arg15[%c0_122, %c0_123], %327 {strides = array<i32>} : memref<32x64xf32, #tpu.memory_space<vmem>>, vector<32x64xf32>,
    return
  }
}

</mosaic_0001>

<bundles_post_ra>
// kernel: tpu_custom_call.1
= control target key start
LH: loop header
LB: loop body
LE: loop exit
PB: predicated region body
PF: predicated region fallthrough
CT: control target
= control target key end

     0   :  { %vm65_vm0 = vcmask 523264   ;;  %s6270_s0 = inlined_call_operand.vmem [shape: f32[32,64], index: 0, kind: input, shape index: {}]   ;;  %s6271_s1 = inlined_call_operand.vmem [shape: f32[2,1,64], index: 1, kind: input, shape index: {}]   ;;  %s6272_s2 = inlined_call_operand.vmem [shape: f32[2,1,64], index: 2, kind: input, shape index: {}]   ;;  %s6273_s3 = inlined_call_operand.vmem [shape: bf16[2,64,192], index: 3, kind: input, shape index: {}]   ;;  %s6274_s4 = inlined_call_operand.vmem [shape: f32[2,1,192], index: 4, kind: input, shape index: {}]   ;;  %s6275_s5 = inlined_call_operand.vmem [shape: bf16[2,64,64], index: 5, kind: input, shape index: {}]   ;;  %s6276_s6 = inlined_call_operand.vmem [shape: f32[2,1,64], index: 6, kind: input, shape index: {}]   ;;  %s6277_s7 = inlined_call_operand.vmem [shape: f32[2,1,64], index: 7, kind: input, shape index: {}]   ;;  %s6278_s8 = inlined_call_operand.vmem [shape: f32[2,1,64], index: 8, kind: input, shape index: {}]   ;;  %s6279_s9 = inlined_call_operand.vmem [shape: bf16[2,64,256], index: 9, kind: input, shape index: {}]   ;;  %s6280_s10 = inlined_call_operand.vmem [shape: f32[2,1,256], index: 10, kind: input, shape index: {}]   ;;  %s6281_s11 = inlined_call_operand.vmem [shape: bf16[2,256,64], index: 11, kind: input, shape index: {}]   ;;  %s6282_s12 = inlined_call_operand.vmem [shape: f32[2,1,64], index: 12, kind: input, shape index: {}]   ;;  %s6283_s13 = inlined_call_operand.vmem [shape: f32[1,64], index: 13, kind: input, shape index: {}]   ;;  %s6284_s14 = inlined_call_operand.vmem [shape: f32[1,64], index: 14, kind: input, shape index: {}]   ;;  %s6285_s15 = inlined_call_operand.hbm [shape: f32[32,64], index: 15, kind: output, shape index: {}]  }
   0x1   :  { %v52_v0 = vld [vmem:[%s6270_s0] sm:$0xff]  ;;  %v54_v1 = vld [vmem:[%s6270_s0 + $0x10] sm:$0xff]  ;;  %v53_v2 = vld [vmem:[%s6270_s0 + $0x8] sm:$0xff] }
   0x2   :  { %v66_v3 = vsel %vm65_vm0, %v52_v0, 0.0  ;;  %v72_v4 = vsel %vm65_vm0, %v54_v1, 0.0  ;;  %v55_v5 = vld [vmem:[%s6270_s0 + $0x18] sm:$0xff]  ;;  %v69_v6 = vsel %vm65_vm0, %v53_v2, 0.0 }
   0x3   :  { %67 = vadd.xlane.f32.xlu0 %v66_v3  ;;  %73 = vadd.xlane.f32.xlu1 %v72_v4  ;;  %v75_v7 = vsel %vm65_vm0, %v55_v5, 0.0 }
   0x7   :  { %70 = vadd.xlane.f32.xlu0 %v69_v6  ;;  %76 = vadd.xlane.f32.xlu1 %v75_v7 }
   0x8   :  { %20 = vsyncpa [#allocation3], 0  ;;  %v4637_v28 = vld [vmem:[%s6273_s3 + $0x4] ss:$8 sps:$4 sm:$0xff]   ;;  %v4639_v29 = vld [vmem:[%s6273_s3] ss:$8 sps:$4 sm:$0xff]  }
   0x9   :  { %207 = vmatprep.subr.bf16.mxu0 %v4637_v28  ;;  %v4640_v30 = vld [vmem:[%s6273_s3 + $0x14] ss:$8 sps:$4 sm:$0xff]   ;;  %v4642_v31 = vld [vmem:[%s6273_s3 + $0x10] ss:$8 sps:$4 sm:$0xff]   ;;  %v4643_v32 = vld [vmem:[%s6273_s3 + $0x24] ss:$8 sps:$4 sm:$0xff]  }
   0xa   :  { %208 = vmatpush1.bf16.msra.mxu0 %v4639_v29  ;;  %v4985_v33 = vmov 0   ;;  %v4645_v34 = vld [vmem:[%s6273_s3 + $0x20] ss:$8 sps:$4 sm:$0xff]   ;;  %v4646_v35 = vld [vmem:[%s6273_s3 + $0x34] ss:$8 sps:$4 sm:$0xff]   ;;  %s4987_s18 = smov 112  }
   0xb   :  { %209 = vmatprep.subr.bf16.mxu0 %v4640_v30  ;;  %239 = vmatprep.mubr.bf16.mxu0 %v4985_v33  ;;  %v4648_v36 = vld [vmem:[%s6273_s3 + $0x30] ss:$8 sps:$4 sm:$0xff]   ;;  %v3886_v51 = vld [vmem:[%s6271_s1] ss:$0 sm:$0xff]  ;;  %vm4988_vm1 = vmmov 0   ;;  %s4989_s19 = smov 80  }
   0xc   :  { %v3887_v56 = vld [vmem:[%s6272_s2] ss:$0 sm:$0xff]  ;;  %s4990_s20 = smov 64   ;;  %s4991_s21 = smov 96   ;;  %vm359_vm2 = vcmask 130048   ;;  %vm1365_vm5 = vcmask 261120  }
   0xd   :  { %s4992_s22 = smov 16   ;;  %s4993_s23 = smov 32   ;;  %vm1370_vm6 = vcmask 392192  }
   0xe   :  { %210 = vmatpush1.bf16.msra.mxu0 %v4642_v31  ;;  %s6286_s30 = smov 48   ;;  %s6292_s16 = smov 48  }
   0xf   :  { %211 = vmatprep.subr.bf16.mxu0 %v4643_v32 }
  0x12   :  { %212 = vmatpush1.bf16.msra.mxu0 %v4645_v34 }
  0x13   :  { %213 = vmatprep.subr.bf16.mxu0 %v4646_v35 }
  0x16   :  { %214 = vmatpush1.bf16.msra.mxu0 %v4648_v36 }
  0x90   :  { %v68_v8 = vpop.xlane.xlu0 %67  ;;  %v74_v9 = vpop.xlane.xlu1 %73 }
  0x91   :  { %v79_v10 = vmul.f32 0.015625, %v68_v8  ;;  %v81_v11 = vmul.f32 0.015625, %v74_v9  ;;  %v149_v8 = vld [vmem:[%s6274_s4] sm:$0x3] }
  0x93   :  { %v83_v12 = vsub.f32 %v52_v0, %v79_v10  ;;  %v5094_v13 = vsub.f32 %v54_v1, %v81_v11 }
  0x94   :  { %v71_v14 = vpop.xlane.xlu0 %70  ;;  %v77_v15 = vpop.xlane.xlu1 %76 }
  0x95   :  { %v80_v16 = vmul.f32 0.015625, %v71_v14  ;;  %v82_v17 = vmul.f32 0.015625, %v77_v15  ;;  %v87_v18 = vmul.f32 %v83_v12, %v83_v12  ;;  %v89_v19 = vmul.f32 %v5094_v13, %v5094_v13 }
  0x97   :  { %v84_v20 = vsub.f32 %v53_v2, %v80_v16  ;;  %v86_v21 = vsub.f32 %v55_v5, %v82_v17  ;;  %v91_v22 = vsel %vm65_vm0, %v87_v18, 0.0  ;;  %v97_v23 = vsel %vm65_vm0, %v89_v19, 0.0 }
  0x98   :  { %92 = vadd.xlane.f32.xlu0 %v91_v22  ;;  %v56_v5 = vlaneseq  ;;  %v4986_v18 = vmov 0.0  }
  0x99   :  { %v88_v24 = vmul.f32 %v84_v20, %v84_v20  ;;  %v90_v25 = vmul.f32 %v86_v21, %v86_v21  ;;  %4228 = vmatprep.subr.bf16.mxu0 %v4986_v18  ;;  %4234 = vmatprep.subr.bf16.mxu1 %v4986_v18 }
  0x9a   :  { %v5138_v6 = vshrl.u32 %v56_v5, 7  ;;  %4236 = vmatprep.mubr.msk.bf16.mxu1 %vm4988_vm1, %v4986_v18 }
  0x9b   :  { %v94_v26 = vsel %vm65_vm0, %v88_v24, 0.0  ;;  %v100_v27 = vsel %vm65_vm0, %v90_v25, 0.0 }
  0x9c   :  { %98 = vadd.xlane.f32.xlu0 %v97_v23  ;;  %95 = vadd.xlane.f32.xlu1 %v94_v26  ;;  %v5141_v7 = vsub.s32 0, %v5138_v6  ;;  %v5147_v9 = vsub.s32 1, %v5138_v6 }
  0x9e   :  { %v154_v10 = vrot.slane %v149_v8, %v5141_v7 }
  0xa0   :  { %101 = vadd.xlane.f32.xlu1 %v100_v27 }
 0x125   :  { %v93_v37 = vpop.xlane.xlu0 %92 }
 0x126   :  { %v103_v38 = vmul.f32 0.015625, %v93_v37 }
 0x128   :  { %v107_v39 = vadd.f32 1e-05, %v103_v38 }
 0x129   :  { %v96_v40 = vpop.xlane.xlu1 %95  ;;  %v99_v41 = vpop.xlane.xlu0 %98 }
 0x12a   :  { %4725 = vrsqrt.f32 %v107_v39  ;;  %v104_v42 = vmul.f32 0.015625, %v96_v40  ;;  %v105_v43 = vmul.f32 0.015625, %v99_v41 }
 0x12c   :  { %v108_v44 = vadd.f32 1e-05, %v104_v42  ;;  %v109_v45 = vadd.f32 1e-05, %v105_v43 }
 0x12d   :  { %v102_v46 = vpop.xlane.xlu1 %101 }
 0x12e   :  { %4727 = vrsqrt.f32 %v108_v44  ;;  %v106_v47 = vmul.f32 0.015625, %v102_v46 }
 0x12f   :  { %4729 = vrsqrt.f32 %v109_v45 }
 0x130   :  { %v110_v48 = vadd.f32 1e-05, %v106_v47 }
 0x132   :  { %4731 = vrsqrt.f32 %v110_v48 }
 0x134   :  { %v4726_v49 = vpop.eup %4725 }
 0x135   :  { %v115_v50 = vmul.f32 %v4726_v49, %v83_v12  ;;  %v158_v12 = vrot.slane %v149_v8, %v5147_v9 }
 0x137   :  { %v125_v54 = vmul.f32 %v3886_v51, %v115_v50 }
 0x138   :  { %v4728_v52 = vpop.eup %4727 }
 0x139   :  { %v116_v53 = vmul.f32 %v4728_v52, %v84_v20  ;;  %v4730_v55 = vpop.eup %4729  ;;  %v135_v59 = vadd.f32 %v3887_v56, %v125_v54 }
 0x13a   :  { %v117_v61 = vmul.f32 %v4730_v55, %v5094_v13 }
 0x13b   :  { %v126_v57 = vmul.f32 %v3886_v51, %v116_v53 }
 0x13c   :  { %v4732_v58 = vpop.eup %4731  ;;  %v127_v1 = vmul.f32 %v3886_v51, %v117_v61 }
 0x13d   :  { %v136_v60 = vadd.f32 %v3887_v56, %v126_v57  ;;  %v118_v62 = vmul.f32 %v4732_v58, %v86_v21 }
 0x13e   :  { %v137_v3 = vadd.f32 %v3887_v56, %v127_v1 }
 0x13f   :  { %v139_v63 = vpack.c.bf16 %v136_v60, %v135_v59  ;;  %v128_v0 = vmul.f32 %v3886_v51, %v118_v62 }
 0x141   :  { %3896 = vmatmul.mubr.msk.bf16.vlgmr.msra.gmra.mrb[0].mxu0 %vm65_vm0, %v139_v63  ;;  %v138_v2 = vadd.f32 %v3887_v56, %v128_v0 }
 0x142   :  { %249 = vmatprep.mubr.bf16.mxu0 %v4985_v33 }
 0x143   :  { %v140_v4 = vpack.c.bf16 %v138_v2, %v137_v3 }
 0x149   :  { %3897 = vmatmul.mubr.msk.bf16.gmra.mrb[4].mxu0 %vm65_vm0, %v140_v4 }
 0x14a   :  { %4230 = vmatprep.mubr.msk.bf16.mxu0 %vm4988_vm1, %v4986_v18 }
 0x214   :  { %v241_v11 = vpop.f32.mrb[0].mxu0 }
 0x215   :  { %v243_v13 = vpop.f32.mrb[1].mxu0  ;;  %v242_v15 = vadd.f32 %v241_v11, %v154_v10 }
 0x216   :  { %v245_v14 = vpop.f32.mrb[2].mxu0  ;;  %v5153_v19 = vadd.f32 %v243_v13, %v158_v12 }
 0x217   :  { %v246_v16 = vadd.f32 %v245_v14, %v154_v10  ;;  %v247_v17 = vpop.f32.mrb[3].mxu0 }
 0x218   :  { %v5155_v20 = vadd.f32 %v247_v17, %v158_v12 }
 0x219   :  { %v4457_v21 = vpack.i.bf16 %v246_v16, %v242_v15  ;;  %v300_v22 = vpack.c.bf16 %v246_v16, %v242_v15 }
 0x21a   :  { %v348_v23 = vpack.c.bf16 %v5155_v20, %v5153_v19  ;;  %v5161_v24 = vpack.i.bf16 %v5155_v20, %v5153_v19  ;;  %v58_v19 = vadd.s32 8, %v5138_v6 }
 0x21b   :  { %4458 = vrot.lane.b32.xlu0 %v4457_v21, %s4987_s18 }
 0x21c   :  { %v251_v25 = vpop.f32.mrb[4].mxu0 }
 0x21d   :  { %v253_v26 = vpop.f32.mrb[5].mxu0  ;;  %v252_v28 = vadd.f32 %v251_v25, %v154_v10 }
 0x21e   :  { %v255_v27 = vpop.f32.mrb[6].mxu0  ;;  %v5169_v31 = vadd.f32 %v253_v26, %v158_v12 }
 0x21f   :  { %v256_v29 = vadd.f32 %v255_v27, %v154_v10  ;;  %4478 = vrot.lane.b32.xlu0 %v4457_v21, %s4989_s19  ;;  %v257_v30 = vpop.f32.mrb[7].mxu0 }
 0x220   :  { %v5171_v32 = vadd.f32 %v257_v30, %v158_v12 }
 0x221   :  { %v4462_v34 = vpack.i.bf16 %v256_v29, %v252_v28  ;;  %v301_v35 = vpack.c.bf16 %v256_v29, %v252_v28 }
 0x222   :  { %v349_v36 = vpack.c.bf16 %v5171_v32, %v5169_v31  ;;  %v5177_v37 = vpack.i.bf16 %v5171_v32, %v5169_v31 }
 0x223   :  { %357 = vrot.lane.b32.xlu0 %v300_v22, %s4990_s20  ;;  %4463 = vrot.lane.b32.xlu1 %v4462_v34, %s4987_s18 }
 0x227   :  { %4468 = vrot.lane.b32.xlu1 %v4457_v21, %s4991_s21  ;;  %v60_v21 = vand.u32 127, %v56_v5 }
 0x229   :  { %vm5242_vm3 = vcmp.le.s32.totalorder %v60_v21, %v5138_v6  ;;  %vm5246_vm4 = vcmp.le.s32.totalorder %v60_v21, %v58_v19 }
 0x22b   :  { %4473 = vrot.lane.b32.xlu1 %v4462_v34, %s4991_s21 }
 0x22f   :  { %4483 = vrot.lane.b32.xlu1 %v4462_v34, %s4989_s19 }
 0x233   :  { %408 = vrot.lane.b32.xlu1 %v301_v35, %s4990_s20 }
 0x28d   :  { %v4459_v38 = vpop.permute.xlu0 %4458 }
 0x28e   :  { %v4461_v39 = vunpack.i.h.bf16 %v4459_v38  ;;  %v4460_v40 = vunpack.i.l.bf16 %v4459_v38 }
 0x290   :  { %v302_v41 = vpack.c.bf16 %v4461_v39, %v4460_v40 }
 0x291   :  { %v4479_v42 = vpop.permute.xlu0 %4478 }
 0x292   :  { %458 = vrot.lane.b32.xlu0 %v302_v41, %s4990_s20  ;;  %v4481_v52 = vunpack.i.h.bf16 %v4479_v42  ;;  %v4480_v53 = vunpack.i.l.bf16 %v4479_v42 }
 0x294   :  { %v306_v59 = vpack.c.bf16 %v4481_v52, %v4480_v53 }
 0x295   :  { %v4464_v43 = vpop.permute.xlu1 %4463  ;;  %v358_v44 = vpop.permute.xlu0 %357 }
 0x296   :  { %v4466_v45 = vunpack.i.h.bf16 %v4464_v43  ;;  %v4465_v46 = vunpack.i.l.bf16 %v4464_v43  ;;  %v364_v47 = vsel %vm359_vm2, %v358_v44, 0 }
 0x297   :  { %4229 = vmatpush3.bf16.xpose.msra.mxu0 %v364_v47 }
 0x298   :  { %v303_v48 = vpack.c.bf16 %v4466_v45, %v4465_v46  ;;  %4246 = vmatprep.subr.bf16.mxu0 %v4986_v18 }
 0x299   :  { %v4469_v49 = vpop.permute.xlu1 %4468 }
 0x29a   :  { %v4471_v50 = vunpack.i.h.bf16 %v4469_v49  ;;  %v4470_v51 = vunpack.i.l.bf16 %v4469_v49  ;;  %508 = vrot.lane.b32.xlu1 %v303_v48, %s4990_s20 }
 0x29c   :  { %v304_v54 = vpack.c.bf16 %v4471_v50, %v4470_v51 }
 0x29d   :  { %v4474_v55 = vpop.permute.xlu1 %4473 }
 0x29e   :  { %v4476_v56 = vunpack.i.h.bf16 %v4474_v55  ;;  %v4475_v57 = vunpack.i.l.bf16 %v4474_v55  ;;  %4231 = vmatmul.mubr.msk.bf16.vlgmr.msra.gmra.mrb[8].mxu0 %vm359_vm2, %v300_v22  ;;  %558 = vrot.lane.b32.xlu0 %v304_v54, %s4990_s20 }
 0x29f   :  { %4248 = vmatprep.mubr.msk.bf16.mxu0 %vm4988_vm1, %v4986_v18 }
 0x2a0   :  { %v305_v58 = vpack.c.bf16 %v4476_v56, %v4475_v57 }
 0x2a1   :  { %v4484_v60 = vpop.permute.xlu1 %4483 }
 0x2a2   :  { %v4486_v61 = vunpack.i.h.bf16 %v4484_v60  ;;  %v4485_v62 = vunpack.i.l.bf16 %v4484_v60  ;;  %608 = vrot.lane.b32.xlu1 %v305_v58, %s4990_s20  ;;  %658 = vrot.lane.b32.xlu0 %v306_v59, %s4990_s20 }
 0x2a4   :  { %v307_v63 = vpack.c.bf16 %v4486_v61, %v4485_v62 }
 0x2a5   :  { %v409_v0 = vpop.permute.xlu1 %408 }
 0x2a6   :  { %708 = vrot.lane.b32.xlu1 %v307_v63, %s4990_s20  ;;  %v414_v1 = vsel %vm359_vm2, %v409_v0, 0 }
 0x2a7   :  { %4235 = vmatpush3.bf16.xpose.msra.mxu1 %v414_v1 }
 0x2a8   :  { %4240 = vmatprep.subr.bf16.mxu1 %v4986_v18 }
 0x2ae   :  { %4237 = vmatmul.mubr.msk.bf16.vlgmr.msra.gmra.mrb[0].mxu1 %vm359_vm2, %v301_v35 }
 0x2af   :  { %4242 = vmatprep.mubr.msk.bf16.mxu1 %vm4988_vm1, %v4986_v18 }
 0x304   :  { %v459_v2 = vpop.permute.xlu0 %458 }
 0x305   :  { %v464_v3 = vsel %vm359_vm2, %v459_v2, 0 }
 0x306   :  { %4241 = vmatpush3.bf16.xpose.msra.mxu1 %v464_v3 }
 0x307   :  { %4252 = vmatprep.subr.bf16.mxu1 %v4986_v18 }
 0x30c   :  { %v509_v4 = vpop.permute.xlu1 %508 }
 0x30d   :  { %v514_v8 = vsel %vm359_vm2, %v509_v4, 0  ;;  %4243 = vmatmul.mubr.msk.bf16.vlgmr.msra.gmra.mrb[4].mxu1 %vm359_vm2, %v302_v41 }
 0x30e   :  { %4247 = vmatpush3.bf16.xpose.msra.mxu0 %v514_v8  ;;  %4254 = vmatprep.mubr.msk.bf16.mxu1 %vm4988_vm1, %v4986_v18 }
 0x30f   :  { %4258 = vmatprep.subr.bf16.mxu0 %v4986_v18 }
 0x310   :  { %v559_v10 = vpop.permute.xlu0 %558 }
 0x311   :  { %v564_v11 = vsel %vm359_vm2, %v559_v10, 0 }
 0x312   :  { %4253 = vmatpush3.bf16.xpose.msra.mxu1 %v564_v11 }
 0x313   :  { %4264 = vmatprep.subr.bf16.mxu1 %v4986_v18 }
 0x314   :  { %v609_v12 = vpop.permute.xlu1 %608  ;;  %v659_v14 = vpop.permute.xlu0 %658 }
 0x315   :  { %v614_v13 = vsel %vm359_vm2, %v609_v12, 0  ;;  %4249 = vmatmul.mubr.msk.bf16.vlgmr.msra.gmra.mrb[12].mxu0 %vm359_vm2, %v303_v48  ;;  %v664_v15 = vsel %vm359_vm2, %v659_v14, 0 }
 0x316   :  { %4259 = vmatpush3.bf16.xpose.msra.mxu0 %v614_v13  ;;  %4260 = vmatprep.mubr.msk.bf16.mxu0 %vm4988_vm1, %v4986_v18 }
 0x317   :  { %4270 = vmatprep.subr.bf16.mxu0 %v4986_v18 }
 0x318   :  { %v709_v16 = vpop.permute.xlu1 %708 }
 0x319   :  { %4255 = vmatmul.mubr.msk.bf16.vlgmr.msra.gmra.mrb[8].mxu1 %vm359_vm2, %v304_v54  ;;  %v714_v17 = vsel %vm359_vm2, %v709_v16, 0 }
 0x31a   :  { %4265 = vmatpush3.bf16.xpose.msra.mxu1 %v664_v15  ;;  %4266 = vmatprep.mubr.msk.bf16.mxu1 %vm4988_vm1, %v4986_v18 }
 0x31b   :  { %4276 = vmatprep.subr.bf16.mxu1 %v4986_v18 }
 0x31d   :  { %4261 = vmatmul.mubr.msk.bf16.vlgmr.msra.gmra.mrb[16].mxu0 %vm359_vm2, %v305_v58 }
 0x31e   :  { %4271 = vmatpush3.bf16.xpose.msra.mxu0 %v714_v17  ;;  %4272 = vmatprep.mubr.msk.bf16.mxu0 %vm4988_vm1, %v4986_v18 }
 0x31f   :  { %4282 = vmatprep.subr.bf16.mxu0 %v4986_v18 }
 0x321   :  { %4267 = vmatmul.mubr.msk.bf16.vlgmr.msra.gmra.mrb[12].mxu1 %vm359_vm2, %v306_v59 }
 0x322   :  { %4277 = vmatpush3.bf16.msra.mxu1 %v348_v23  ;;  %4278 = vmatprep.mubr.msk.bf16.mxu1 %vm4988_vm1, %v4986_v18 }
 0x323   :  { %4288 = vmatprep.subr.bf16.mxu1 %v4986_v18 }
 0x325   :  { %4273 = vmatmul.mubr.msk.bf16.vlgmr.msra.gmra.mrb[20].mxu0 %vm359_vm2, %v307_v63 }
 0x326   :  { %4283 = vmatpush3.bf16.msra.mxu0 %v349_v36  ;;  %4284 = vmatprep.mubr.msk.bf16.mxu0 %vm4988_vm1, %v4986_v18 }
 0x327   :  { %4294 = vmatprep.subr.bf16.mxu0 %v4986_v18 }
 0x371   :  { %v400_v23 = vpop.f32.mrb[8].mxu0 }
 0x372   :  { %v5252_v25 = vsel %vm5242_vm3, %v400_v23, -1e+30  ;;  %v4232_v26 = vpop.f32.mrb[9].mxu0 }
 0x373   :  { %v403_v27 = vpop.f32.mrb[10].mxu0  ;;  %v777_v5 = vsel %vm359_vm2, %v5252_v25, -inf }
 0x374   :  { %v5258_v6 = vsel %vm5246_vm4, %v403_v27, -1e+30  ;;  %v4233_v28 = vpop.f32.mrb[11].mxu0  ;;  %778 = vmax.xlane.f32.xlu0 %v777_v5 }
 0x375   :  { %v780_v29 = vsel %vm359_vm2, %v5258_v6, -inf }
 0x376   :  { %781 = vmax.xlane.f32.xlu1 %v780_v29 }
 0x381   :  { %v450_v30 = vpop.f32.mrb[0].mxu1 }
 0x382   :  { %v5264_v31 = vsel %vm5242_vm3, %v450_v30, -1e+30  ;;  %v4238_v32 = vpop.f32.mrb[1].mxu1 }
 0x383   :  { %v453_v34 = vpop.f32.mrb[2].mxu1  ;;  %v783_v35 = vsel %vm359_vm2, %v5264_v31, -inf }
 0x384   :  { %v5270_v36 = vsel %vm5246_vm4, %v453_v34, -1e+30  ;;  %v4239_v38 = vpop.f32.mrb[3].mxu1  ;;  %784 = vmax.xlane.f32.xlu0 %v783_v35 }
 0x385   :  { %v786_v39 = vsel %vm359_vm2, %v5270_v36, -inf }
 0x388   :  { %787 = vmax.xlane.f32.xlu0 %v786_v39 }
 0x3e0   :  { %v500_v40 = vpop.f32.mrb[4].mxu1 }
 0x3e1   :  { %v5276_v41 = vsel %vm5242_vm3, %v500_v40, -1e+30  ;;  %v4244_v42 = vpop.f32.mrb[5].mxu1 }
 0x3e2   :  { %v503_v43 = vpop.f32.mrb[6].mxu1  ;;  %v789_v44 = vsel %vm359_vm2, %v5276_v41, -inf }
 0x3e3   :  { %v5282_v45 = vsel %vm5246_vm4, %v503_v43, -1e+30  ;;  %790 = vmax.xlane.f32.xlu0 %v789_v44  ;;  %v4245_v46 = vpop.f32.mrb[7].mxu1 }
 0x3e4   :  { %v792_v47 = vsel %vm359_vm2, %v5282_v45, -inf }
 0x3e5   :  { %793 = vmax.xlane.f32.xlu1 %v792_v47 }
 0x3e8   :  { %v550_v48 = vpop.f32.mrb[12].mxu0 }
 0x3e9   :  { %v5288_v49 = vsel %vm5242_vm3, %v550_v48, -1e+30  ;;  %v4250_v50 = vpop.f32.mrb[13].mxu0 }
 0x3ea   :  { %v553_v51 = vpop.f32.mrb[14].mxu0  ;;  %v795_v52 = vsel %vm359_vm2, %v5288_v49, -inf }
 0x3eb   :  { %v5294_v53 = vsel %vm5246_vm4, %v553_v51, -1e+30  ;;  %v4251_v54 = vpop.f32.mrb[15].mxu0  ;;  %796 = vmax.xlane.f32.xlu0 %v795_v52 }
 0x3ec   :  { %v600_v55 = vpop.f32.mrb[8].mxu1  ;;  %v798_v56 = vsel %vm359_vm2, %v5294_v53, -inf }
 0x3ed   :  { %v5300_v57 = vsel %vm5242_vm3, %v600_v55, -1e+30  ;;  %799 = vmax.xlane.f32.xlu1 %v798_v56  ;;  %v4256_v58 = vpop.f32.mrb[9].mxu1 }
 0x3ee   :  { %v603_v59 = vpop.f32.mrb[10].mxu1  ;;  %v801_v60 = vsel %vm359_vm2, %v5300_v57, -inf }
 0x3ef   :  { %v5306_v61 = vsel %vm5246_vm4, %v603_v59, -1e+30  ;;  %802 = vmax.xlane.f32.xlu0 %v801_v60  ;;  %v4257_v62 = vpop.f32.mrb[11].mxu1 }
 0x3f0   :  { %v650_v63 = vpop.f32.mrb[16].mxu0  ;;  %v804_v0 = vsel %vm359_vm2, %v5306_v61, -inf }
 0x3f1   :  { %v5312_v1 = vsel %vm5242_vm3, %v650_v63, -1e+30  ;;  %v4262_v2 = vpop.f32.mrb[17].mxu0  ;;  %805 = vmax.xlane.f32.xlu1 %v804_v0 }
 0x3f2   :  { %v653_v3 = vpop.f32.mrb[18].mxu0  ;;  %v807_v4 = vsel %vm359_vm2, %v5312_v1, -inf }
 0x3f3   :  { %v5318_v8 = vsel %vm5246_vm4, %v653_v3, -1e+30  ;;  %v4263_v10 = vpop.f32.mrb[19].mxu0  ;;  %808 = vmax.xlane.f32.xlu0 %v807_v4 }
 0x3f4   :  { %v700_v11 = vpop.f32.mrb[12].mxu1  ;;  %v810_v12 = vsel %vm359_vm2, %v5318_v8, -inf }
 0x3f5   :  { %v5324_v13 = vsel %vm5242_vm3, %v700_v11, -1e+30  ;;  %811 = vmax.xlane.f32.xlu1 %v810_v12  ;;  %v4268_v14 = vpop.f32.mrb[13].mxu1 }
 0x3f6   :  { %v703_v15 = vpop.f32.mrb[14].mxu1  ;;  %v813_v16 = vsel %vm359_vm2, %v5324_v13, -inf }
 0x3f7   :  { %v5330_v17 = vsel %vm5246_vm4, %v703_v15, -1e+30  ;;  %814 = vmax.xlane.f32.xlu0 %v813_v16  ;;  %v4269_v21 = vpop.f32.mrb[15].mxu1 }
 0x3f8   :  { %v750_v19 = vpop.f32.mrb[20].mxu0  ;;  %v816_v23 = vsel %vm359_vm2, %v5330_v17, -inf }
 0x3f9   :  { %v5336_v26 = vsel %vm5242_vm3, %v750_v19, -1e+30  ;;  %v4274_v27 = vpop.f32.mrb[21].mxu0  ;;  %817 = vmax.xlane.f32.xlu1 %v816_v23 }
 0x3fa   :  { %v753_v5 = vpop.f32.mrb[22].mxu0  ;;  %v819_v28 = vsel %vm359_vm2, %v5336_v26, -inf }
 0x3fb   :  { %v4275_v29 = vpop.f32.mrb[23].mxu0  ;;  %820 = vmax.xlane.f32.xlu0 %v819_v28  ;;  %v5352_v42 = vsel %vm5246_vm4, %v753_v5, -1e+30 }
 0x401   :  { %v779_v30 = vpop.xlane.xlu0 %778 }
 0x402   :  { %v825_v32 = vsub.f32 %v5252_v25, %v779_v30  ;;  %v822_v25 = vsel %vm359_vm2, %v5352_v42, -inf }
 0x403   :  { %v782_v46 = vpop.xlane.xlu1 %781 }
 0x404   :  { %v841_v35 = vmul.f32 1.442695, %v825_v32  ;;  %v826_v47 = vsub.f32 %v5258_v6, %v782_v46 }
 0x406   :  { %4733 = vpow2.f32 %v841_v35  ;;  %v843_v50 = vmul.f32 1.442695, %v826_v47 }
 0x40a   :  { %4493 = vrot.lane.b32.xlu1 %v5177_v37, %s4987_s18 }
 0x40e   :  { %4498 = vrot.lane.b32.xlu1 %v5161_v24, %s4991_s21 }
 0x410   :  { %v5348_v40 = vpop.eup %4733 }
 0x411   :  { %4488 = vrot.lane.b32.xlu0 %v5161_v24, %s4987_s18  ;;  %v785_v34 = vpop.xlane.xlu0 %784  ;;  %v873_v43 = vsel %vm359_vm2, %v5348_v40, 0.0 }
 0x412   :  { %v827_v38 = vsub.f32 %v5264_v31, %v785_v34 }
 0x414   :  { %v845_v39 = vmul.f32 1.442695, %v827_v38 }
 0x415   :  { %v788_v48 = vpop.xlane.xlu0 %787 }
 0x416   :  { %4735 = vpow2.f32 %v845_v39  ;;  %v828_v51 = vsub.f32 %v5270_v36, %v788_v48 }
 0x417   :  { %4737 = vpow2.f32 %v843_v50 }
 0x418   :  { %v847_v52 = vmul.f32 1.442695, %v828_v51 }
 0x41a   :  { %4739 = vpow2.f32 %v847_v52 }
 0x420   :  { %v5356_v44 = vpop.eup %4735 }
 0x421   :  { %v879_v31 = vsel %vm359_vm2, %v5356_v44, 0.0  ;;  %v5366_v54 = vpop.eup %4737 }
 0x422   :  { %v876_v55 = vsel %vm359_vm2, %v5366_v54, 0.0 }
 0x424   :  { %v5370_v56 = vpop.eup %4739 }
 0x425   :  { %v882_v58 = vsel %vm359_vm2, %v5370_v56, 0.0 }
 0x430   :  { %874 = vadd.xlane.f32.xlu0 %v873_v43 }
 0x432   :  { %823 = vmax.xlane.f32.xlu1 %v822_v25 }
 0x434   :  { %880 = vadd.xlane.f32.xlu0 %v879_v31 }
 0x443   :  { %4503 = vrot.lane.b32.xlu1 %v5177_v37, %s4991_s21 }
 0x467   :  { %877 = vadd.xlane.f32.xlu1 %v876_v55 }
 0x46b   :  { %883 = vadd.xlane.f32.xlu1 %v882_v58 }
 0x470   :  { %v791_v6 = vpop.xlane.xlu0 %790 }
 0x471   :  { %v829_v59 = vsub.f32 %v5276_v41, %v791_v6 }
 0x472   :  { %v794_v60 = vpop.xlane.xlu1 %793 }
 0x473   :  { %v849_v36 = vmul.f32 1.442695, %v829_v59  ;;  %v830_v62 = vsub.f32 %v5282_v45, %v794_v60 }
 0x475   :  { %4741 = vpow2.f32 %v849_v36  ;;  %v851_v63 = vmul.f32 1.442695, %v830_v62 }
 0x477   :  { %4743 = vpow2.f32 %v851_v63 }
 0x478   :  { %v797_v0 = vpop.xlane.xlu0 %796 }
 0x479   :  { %v831_v2 = vsub.f32 %v5288_v49, %v797_v0 }
 0x47a   :  { %v800_v3 = vpop.xlane.xlu1 %799 }
 0x47b   :  { %v853_v4 = vmul.f32 1.442695, %v831_v2  ;;  %v832_v10 = vsub.f32 %v5294_v53, %v800_v3 }
 0x47c   :  { %v803_v11 = vpop.xlane.xlu0 %802 }
 0x47d   :  { %4745 = vpow2.f32 %v853_v4  ;;  %v855_v12 = vmul.f32 1.442695, %v832_v10  ;;  %v833_v14 = vsub.f32 %v5300_v57, %v803_v11 }
 0x47e   :  { %v806_v41 = vpop.xlane.xlu1 %805 }
 0x47f   :  { %v5379_v15 = vpop.eup %4741  ;;  %4747 = vpow2.f32 %v855_v12  ;;  %v857_v45 = vmul.f32 1.442695, %v833_v14  ;;  %v834_v16 = vsub.f32 %v5306_v61, %v806_v41 }
 0x480   :  { %v809_v21 = vpop.xlane.xlu0 %808  ;;  %v885_v49 = vsel %vm359_vm2, %v5379_v15, 0.0 }
 0x481   :  { %v5384_v19 = vpop.eup %4743  ;;  %4749 = vpow2.f32 %v857_v45  ;;  %v859_v53 = vmul.f32 1.442695, %v834_v16  ;;  %v835_v23 = vsub.f32 %v5312_v1, %v809_v21  ;;  %886 = vadd.xlane.f32.xlu0 %v885_v49 }
 0x482   :  { %v812_v27 = vpop.xlane.xlu1 %811  ;;  %v888_v57 = vsel %vm359_vm2, %v5384_v19, 0.0 }
 0x483   :  { %4751 = vpow2.f32 %v859_v53  ;;  %v861_v5 = vmul.f32 1.442695, %v835_v23  ;;  %v836_v28 = vsub.f32 %v5318_v8, %v812_v27  ;;  %889 = vadd.xlane.f32.xlu1 %v888_v57 }
 0x484   :  { %v815_v61 = vpop.xlane.xlu0 %814 }
 0x485   :  { %4753 = vpow2.f32 %v861_v5  ;;  %v863_v29 = vmul.f32 1.442695, %v836_v28  ;;  %v837_v30 = vsub.f32 %v5324_v13, %v815_v61 }
 0x486   :  { %v818_v32 = vpop.xlane.xlu1 %817 }
 0x487   :  { %v5391_v34 = vpop.eup %4745  ;;  %4755 = vpow2.f32 %v863_v29  ;;  %v865_v1 = vmul.f32 1.442695, %v837_v30  ;;  %v838_v35 = vsub.f32 %v5330_v17, %v818_v32 }
 0x488   :  { %v821_v38 = vpop.xlane.xlu0 %820  ;;  %v891_v39 = vsel %vm359_vm2, %v5391_v34, 0.0 }
 0x489   :  { %v5396_v43 = vpop.eup %4747  ;;  %4757 = vpow2.f32 %v865_v1  ;;  %v867_v8 = vmul.f32 1.442695, %v838_v35  ;;  %v839_v25 = vsub.f32 %v5336_v26, %v821_v38  ;;  %892 = vadd.xlane.f32.xlu0 %v891_v39 }
 0x48a   :  { %v894_v13 = vsel %vm359_vm2, %v5396_v43, 0.0  ;;  %v4494_v62 = vpop.permute.xlu1 %4493 }
 0x48b   :  { %v5401_v31 = vpop.eup %4749  ;;  %4759 = vpow2.f32 %v867_v8  ;;  %v869_v46 = vmul.f32 1.442695, %v839_v25  ;;  %895 = vadd.xlane.f32.xlu1 %v894_v13  ;;  %v4496_v5 = vunpack.i.h.bf16 %v4494_v62  ;;  %v4495_v28 = vunpack.i.l.bf16 %v4494_v62 }
 0x48c   :  { %v897_v17 = vsel %vm359_vm2, %v5401_v31, 0.0  ;;  %v4489_v11 = vpop.permute.xlu0 %4488 }
 0x48d   :  { %v5405_v47 = vpop.eup %4751  ;;  %4761 = vpow2.f32 %v869_v46  ;;  %898 = vadd.xlane.f32.xlu0 %v897_v17  ;;  %v4491_v21 = vunpack.i.h.bf16 %v4489_v11  ;;  %v4490_v49 = vunpack.i.l.bf16 %v4489_v11 }
 0x48e   :  { %v900_v48 = vsel %vm359_vm2, %v5405_v47, 0.0  ;;  %v5431_v63 = vpop.permute.xlu1 %4498 }
 0x48f   :  { %v5409_v26 = vpop.eup %4753  ;;  %901 = vadd.xlane.f32.xlu1 %v900_v48  ;;  %v350_v61 = vpack.c.bf16 %v4491_v21, %v4490_v49  ;;  %v4501_v8 = vunpack.i.h.bf16 %v5431_v63  ;;  %v4500_v25 = vunpack.i.l.bf16 %v5431_v63 }
 0x490   :  { %v903_v50 = vsel %vm359_vm2, %v5409_v26, 0.0 }
 0x491   :  { %v5413_v51 = vpop.eup %4755  ;;  %904 = vadd.xlane.f32.xlu0 %v903_v50 }
 0x492   :  { %v906_v52 = vsel %vm359_vm2, %v5413_v51, 0.0 }
 0x493   :  { %v5417_v55 = vpop.eup %4757  ;;  %907 = vadd.xlane.f32.xlu1 %v906_v52  ;;  %v352_v52 = vpack.c.bf16 %v4501_v8, %v4500_v25 }
 0x494   :  { %v909_v58 = vsel %vm359_vm2, %v5417_v55, 0.0 }
 0x495   :  { %v5421_v6 = vpop.eup %4759  ;;  %910 = vadd.xlane.f32.xlu0 %v909_v58 }
 0x496   :  { %v912_v59 = vsel %vm359_vm2, %v5421_v6, 0.0 }
 0x497   :  { %v5425_v60 = vpop.eup %4761  ;;  %913 = vadd.xlane.f32.xlu1 %v912_v59 }
 0x498   :  { %v915_v36 = vsel %vm359_vm2, %v5425_v60, 0.0 }
 0x499   :  { %916 = vadd.xlane.f32.xlu0 %v915_v36 }
 0x4af   :  { %4508 = vrot.lane.b32.xlu0 %v5161_v24, %s4989_s19 }
 0x4bd   :  { %v875_v12 = vpop.xlane.xlu0 %874 }
 0x4bf   :  { %v824_v0 = vpop.xlane.xlu1 %823 }
 0x4c0   :  { %v840_v2 = vsub.f32 %v5352_v42, %v824_v0 }
 0x4c1   :  { %v881_v14 = vpop.xlane.xlu0 %880 }
 0x4c2   :  { %v871_v3 = vmul.f32 1.442695, %v840_v2 }
 0x4c3   :  { %v5440_v24 = vpop.permute.xlu1 %4503 }
 0x4c4   :  { %4763 = vpow2.f32 %v871_v3  ;;  %v4505_v62 = vunpack.i.l.bf16 %v5440_v24 }
 0x4c5   :  { %4765 = vrcp.f32 %v875_v12 }
 0x4ce   :  { %v5434_v4 = vpop.eup %4763 }
 0x4cf   :  { %v918_v10 = vsel %vm359_vm2, %v5434_v4, 0.0  ;;  %v4766_v45 = vpop.eup %4765 }
 0x4d0   :  { %919 = vadd.xlane.f32.xlu1 %v918_v10  ;;  %v937_v53 = vmul.f32 %v4766_v45, %v5348_v40  ;;  %v351_v40 = vpack.c.bf16 %v4496_v5, %v4495_v28 }
 0x4e1   :  { %4513 = vrot.lane.b32.xlu1 %v5177_v37, %s4989_s19 }
 0x4f4   :  { %v878_v41 = vpop.xlane.xlu1 %877 }
 0x4f5   :  { %4767 = vrcp.f32 %v878_v41 }
 0x4f6   :  { %4769 = vrcp.f32 %v881_v14 }
 0x4f8   :  { %v884_v42 = vpop.xlane.xlu1 %883 }
 0x4f9   :  { %4771 = vrcp.f32 %v884_v42 }
 0x4ff   :  { %v4768_v16 = vpop.eup %4767 }
 0x500   :  { %v938_v23 = vmul.f32 %v4768_v16, %v5366_v54  ;;  %v4770_v37 = vpop.eup %4769 }
 0x501   :  { %v939_v29 = vmul.f32 %v4770_v37, %v5356_v44 }
 0x502   :  { %v953_v27 = vpack.c.bf16 %v938_v23, %v937_v53 }
 0x503   :  { %v4772_v57 = vpop.eup %4771 }
 0x504   :  { %v940_v30 = vmul.f32 %v4772_v57, %v5370_v56  ;;  %4279 = vmatmul.mubr.msk.bf16.vlgmr.msra.gmra.mrb[16].mxu1 %vm359_vm2, %v953_v27 }
 0x505   :  { %4289 = vmatpush3.bf16.msra.mxu1 %v350_v61  ;;  %4290 = vmatprep.mubr.msk.bf16.mxu1 %vm4988_vm1, %v4986_v18 }
 0x506   :  { %v954_v32 = vpack.c.bf16 %v940_v30, %v939_v29  ;;  %4300 = vmatprep.subr.bf16.mxu1 %v4986_v18 }
 0x508   :  { %4285 = vmatmul.mubr.msk.bf16.vlgmr.msra.gmra.mrb[24].mxu0 %vm359_vm2, %v954_v32 }
 0x509   :  { %4295 = vmatpush3.bf16.msra.mxu0 %v351_v40  ;;  %4296 = vmatprep.mubr.msk.bf16.mxu0 %vm4988_vm1, %v4986_v18 }
 0x50a   :  { %4306 = vmatprep.subr.bf16.mxu0 %v4986_v18 }
 0x50e   :  { %v887_v44 = vpop.xlane.xlu0 %886 }
 0x50f   :  { %4773 = vrcp.f32 %v887_v44 }
 0x510   :  { %v890_v54 = vpop.xlane.xlu1 %889 }
 0x511   :  { %4775 = vrcp.f32 %v890_v54 }
 0x516   :  { %v893_v56 = vpop.xlane.xlu0 %892 }
 0x517   :  { %4777 = vrcp.f32 %v893_v56 }
 0x518   :  { %v896_v1 = vpop.xlane.xlu1 %895 }
 0x519   :  { %v4774_v35 = vpop.eup %4773  ;;  %4779 = vrcp.f32 %v896_v1 }
 0x51a   :  { %v899_v38 = vpop.xlane.xlu0 %898  ;;  %v941_v13 = vmul.f32 %v4774_v35, %v5379_v15 }
 0x51b   :  { %v4776_v39 = vpop.eup %4775  ;;  %4781 = vrcp.f32 %v899_v38 }
 0x51c   :  { %v942_v46 = vmul.f32 %v4776_v39, %v5384_v19  ;;  %v902_v17 = vpop.xlane.xlu1 %901  ;;  %v4506_v19 = vunpack.i.h.bf16 %v5440_v24 }
 0x51d   :  { %4783 = vrcp.f32 %v902_v17 }
 0x51e   :  { %v905_v48 = vpop.xlane.xlu0 %904  ;;  %v955_v50 = vpack.c.bf16 %v942_v46, %v941_v13  ;;  %v353_v14 = vpack.c.bf16 %v4506_v19, %v4505_v62 }
 0x51f   :  { %4785 = vrcp.f32 %v905_v48 }
 0x520   :  { %v908_v58 = vpop.xlane.xlu1 %907  ;;  %4291 = vmatmul.mubr.msk.bf16.vlgmr.msra.gmra.mrb[20].mxu1 %vm359_vm2, %v955_v50 }
 0x521   :  { %v4778_v59 = vpop.eup %4777  ;;  %4787 = vrcp.f32 %v908_v58  ;;  %4301 = vmatpush3.bf16.msra.mxu1 %v352_v52  ;;  %4302 = vmatprep.mubr.msk.bf16.mxu1 %vm4988_vm1, %v4986_v18 }
 0x522   :  { %v911_v36 = vpop.xlane.xlu0 %910  ;;  %4312 = vmatprep.subr.bf16.mxu1 %v4986_v18  ;;  %v943_v63 = vmul.f32 %v4778_v59, %v5391_v34 }
 0x523   :  { %v4780_v15 = vpop.eup %4779  ;;  %4789 = vrcp.f32 %v911_v36 }
 0x524   :  { %v944_v0 = vmul.f32 %v4780_v15, %v5396_v43  ;;  %v914_v2 = vpop.xlane.xlu1 %913 }
 0x525   :  { %v4782_v3 = vpop.eup %4781  ;;  %4791 = vrcp.f32 %v914_v2  ;;  %v4649_v2 = vld [vmem:[%s6275_s5] sm:$0xff]  }
 0x526   :  { %v917_v10 = vpop.xlane.xlu0 %916  ;;  %v956_v11 = vpack.c.bf16 %v944_v0, %v943_v63  ;;  %v945_v41 = vmul.f32 %v4782_v3, %v5401_v31  ;;  %v4650_v3 = vld [vmem:[%s6275_s5 + $0x8] sm:$0xff]  }
 0x527   :  { %v4784_v12 = vpop.eup %4783  ;;  %4793 = vrcp.f32 %v917_v10 }
 0x528   :  { %v946_v42 = vmul.f32 %v4784_v12, %v5405_v47  ;;  %4297 = vmatmul.mubr.msk.bf16.vlgmr.msra.gmra.mrb[28].mxu0 %vm359_vm2, %v956_v11 }
 0x529   :  { %v4786_v45 = vpop.eup %4785  ;;  %4307 = vmatpush3.bf16.msra.mxu0 %v353_v14  ;;  %4308 = vmatprep.mubr.msk.bf16.mxu0 %vm4988_vm1, %v4986_v18 }
 0x52a   :  { %v4509_v34 = vpop.permute.xlu0 %4508  ;;  %v957_v43 = vpack.c.bf16 %v946_v42, %v945_v41  ;;  %4318 = vmatprep.subr.bf16.mxu0 %v4986_v18  ;;  %v947_v49 = vmul.f32 %v4786_v45, %v5409_v26  ;;  %v4651_v42 = vld [vmem:[%s6275_s5 + $0x10] sm:$0xff]  }
 0x52b   :  { %v4788_v24 = vpop.eup %4787  ;;  %v4511_v16 = vunpack.i.h.bf16 %v4509_v34  ;;  %v4510_v21 = vunpack.i.l.bf16 %v4509_v34 }
 0x52c   :  { %v948_v31 = vmul.f32 %v4788_v24, %v5413_v51  ;;  %4303 = vmatmul.mubr.msk.bf16.vlgmr.msra.gmra.mrb[24].mxu1 %vm359_vm2, %v957_v43  ;;  %v4652_v24 = vld [vmem:[%s6275_s5 + $0x18] sm:$0xff]  }
 0x52d   :  { %v4790_v47 = vpop.eup %4789  ;;  %v354_v53 = vpack.c.bf16 %v4511_v16, %v4510_v21  ;;  %4314 = vmatprep.mubr.msk.bf16.mxu1 %vm4988_vm1, %v4986_v18 }
 0x52e   :  { %v958_v23 = vpack.c.bf16 %v948_v31, %v947_v49  ;;  %v949_v27 = vmul.f32 %v4790_v47, %v5417_v55 }
 0x52f   :  { %v4792_v37 = vpop.eup %4791  ;;  %4313 = vmatpush3.bf16.msra.mxu1 %v354_v53 }
 0x530   :  { %v950_v57 = vmul.f32 %v4792_v37, %v5421_v6  ;;  %4309 = vmatmul.mubr.msk.bf16.vlgmr.msra.gmra.mrb[32].mxu0 %vm359_vm2, %v958_v23  ;;  %4324 = vmatprep.subr.bf16.mxu1 %v4649_v2 }
 0x531   :  { %4320 = vmatprep.mubr.msk.bf16.mxu0 %vm4988_vm1, %v4986_v18  ;;  %v4794_v30 = vpop.eup %4793 }
 0x532   :  { %v959_v26 = vpack.c.bf16 %v950_v57, %v949_v27  ;;  %v951_v6 = vmul.f32 %v4794_v30, %v5425_v60 }
 0x534   :  { %4315 = vmatmul.mubr.msk.bf16.vlgmr.msra.gmra.mrb[28].mxu1 %vm359_vm2, %v959_v26 }
 0x535   :  { %4325 = vmatpush3.bf16.msra.mxu1 %v4649_v2 }
 0x536   :  { %4326 = vmatprep.subr.bf16.mxu1 %v4650_v3 }
 0x539   :  { %4327 = vmatpush3.bf16.msra.mxu1 %v4650_v3  ;;  %v4958_v3 = vld [vmem:[%s6270_s0 + $0x10] sm:$0xff] }
 0x53a   :  { %4328 = vmatprep.subr.bf16.mxu1 %v4651_v42 }
 0x53d   :  { %4329 = vmatpush3.bf16.msra.mxu1 %v4651_v42 }
 0x53e   :  { %4330 = vmatprep.subr.bf16.mxu1 %v4652_v24 }
 0x541   :  { %4331 = vmatpush3.bf16.msra.mxu1 %v4652_v24 }
 0x55d   :  { %v920_v51 = vpop.xlane.xlu1 %919 }
 0x55e   :  { %4795 = vrcp.f32 %v920_v51 }
 0x561   :  { %v4514_v5 = vpop.permute.xlu1 %4513 }
 0x562   :  { %v4516_v28 = vunpack.i.h.bf16 %v4514_v5  ;;  %v4515_v61 = vunpack.i.l.bf16 %v4514_v5 }
 0x564   :  { %v355_v29 = vpack.c.bf16 %v4516_v28, %v4515_v61 }
 0x566   :  { %4319 = vmatpush3.bf16.msra.mxu0 %v355_v29 }
 0x568   :  { %v4796_v55 = vpop.eup %4795 }
 0x569   :  { %v952_v32 = vmul.f32 %v4796_v55, %v5434_v4 }
 0x56b   :  { %v960_v40 = vpack.c.bf16 %v952_v32, %v951_v6 }
 0x56d   :  { %4321 = vmatmul.mubr.msk.bf16.vlgmr.msra.gmra.mrb[36].mxu0 %vm359_vm2, %v960_v40 }
 0x56e   :  { %1649 = vmatprep.mubr.bf16.mxu0 %v4985_v33 }
 0x5d7   :  { %v5487_v44 = vpop.f32.mrb[16].mxu1 }
 0x5d8   :  { %v4280_v54 = vpop.f32.mrb[17].mxu1 }
 0x5d9   :  { %v5489_v56 = vpop.f32.mrb[18].mxu1 }
 0x5da   :  { %v4281_v1 = vpop.f32.mrb[19].mxu1 }
 0x5db   :  { %v5491_v35 = vpop.f32.mrb[24].mxu0 }
 0x5dc   :  { %v4286_v38 = vpop.f32.mrb[25].mxu0 }
 0x5dd   :  { %v5493_v39 = vpop.f32.mrb[26].mxu0 }
 0x5de   :  { %v4287_v8 = vpop.f32.mrb[27].mxu0 }
 0x5f3   :  { %v1086_v60 = vpop.f32.mrb[20].mxu1 }
 0x5f4   :  { %v4292_v25 = vpop.f32.mrb[21].mxu1 }
 0x5f5   :  { %v1089_v4 = vpop.f32.mrb[22].mxu1 }
 0x5f6   :  { %v4517_v13 = vpack.i.bf16 %v1089_v4, %v1086_v60  ;;  %v4293_v46 = vpop.f32.mrb[23].mxu1 }
 0x5f8   :  { %4518 = vrot.lane.b32.xlu0 %v4517_v13, %s4992_s22 }
 0x5fb   :  { %v1130_v17 = vpop.f32.mrb[28].mxu0 }
 0x5fc   :  { %v4298_v48 = vpop.f32.mrb[29].mxu0 }
 0x5fd   :  { %v1133_v50 = vpop.f32.mrb[30].mxu0 }
 0x5fe   :  { %v4522_v52 = vpack.i.bf16 %v1133_v50, %v1130_v17  ;;  %v4299_v58 = vpop.f32.mrb[31].mxu0 }
 0x5ff   :  { %v1174_v59 = vpop.f32.mrb[24].mxu1 }
 0x600   :  { %4523 = vrot.lane.b32.xlu1 %v4522_v52, %s4992_s22  ;;  %v4304_v36 = vpop.f32.mrb[25].mxu1 }
 0x601   :  { %v1177_v15 = vpop.f32.mrb[26].mxu1 }
 0x602   :  { %v4527_v19 = vpack.i.bf16 %v1177_v15, %v1174_v59  ;;  %v4305_v62 = vpop.f32.mrb[27].mxu1 }
 0x603   :  { %v1218_v63 = vpop.f32.mrb[32].mxu0 }
 0x604   :  { %v4310_v0 = vpop.f32.mrb[33].mxu0  ;;  %4528 = vrot.lane.b32.xlu0 %v4527_v19, %s4993_s23 }
 0x605   :  { %v1221_v10 = vpop.f32.mrb[34].mxu0 }
 0x606   :  { %v4532_v11 = vpack.i.bf16 %v1221_v10, %v1218_v63  ;;  %v4311_v12 = vpop.f32.mrb[35].mxu0  ;;  %v4957_v63 = vld [vmem:[%s6270_s0] sm:$0xff] }
 0x607   :  { %v1262_v14 = vpop.f32.mrb[28].mxu1  ;;  %v4959_v12 = vld [vmem:[%s6270_s0 + $0x8] sm:$0xff] }
 0x608   :  { %4533 = vrot.lane.b32.xlu1 %v4532_v11, %s4993_s23  ;;  %v4316_v41 = vpop.f32.mrb[29].mxu1 }
 0x609   :  { %v1265_v45 = vpop.f32.mrb[30].mxu1 }
 0x60a   :  { %v4537_v34 = vpack.i.bf16 %v1265_v45, %v1262_v14  ;;  %v4317_v43 = vpop.f32.mrb[31].mxu1  ;;  %v4960_v45 = vld [vmem:[%s6270_s0 + $0x18] sm:$0xff] }
 0x60c   :  { %4538 = vrot.lane.b32.xlu0 %v4537_v34, %s6286_s30 }
 0x640   :  { %v1306_v16 = vpop.f32.mrb[36].mxu0 }
 0x641   :  { %v4322_v21 = vpop.f32.mrb[37].mxu0 }
 0x642   :  { %v1309_v49 = vpop.f32.mrb[38].mxu0 }
 0x643   :  { %v4542_v31 = vpack.i.bf16 %v1309_v49, %v1306_v16  ;;  %v4323_v47 = vpop.f32.mrb[39].mxu0 }
 0x645   :  { %4543 = vrot.lane.b32.xlu1 %v4542_v31, %s6286_s30 }
 0x66a   :  { %v4519_v53 = vpop.permute.xlu0 %4518 }
 0x66b   :  { %v4521_v37 = vunpack.i.h.bf16 %v4519_v53  ;;  %v4520_v27 = vunpack.i.l.bf16 %v4519_v53 }
 0x66d   :  { %v1362_v5 = vsel %vm359_vm2, %v5489_v56, %v4521_v37  ;;  %v1361_v28 = vsel %vm359_vm2, %v5487_v44, %v4520_v27 }
 0x672   :  { %v4524_v54 = vpop.permute.xlu1 %4523 }
 0x673   :  { %v4526_v38 = vunpack.i.h.bf16 %v4524_v54  ;;  %v4525_v56 = vunpack.i.l.bf16 %v4524_v54  ;;  %v4653_v54 = vld [vmem:[%s6279_s9] ss:$8 sps:$4 sm:$0xff]  }
 0x675   :  { %v1364_v25 = vsel %vm359_vm2, %v5493_v39, %v4526_v38  ;;  %v1363_v4 = vsel %vm359_vm2, %v5491_v35, %v4525_v56  ;;  %v3914_v39 = vld [vmem:[%s6276_s6] ss:$0 sm:$0xff]  ;;  %v4656_v38 = vld [vmem:[%s6279_s9 + $0x10] ss:$8 sps:$4 sm:$0xff]   ;;  %v4661_v56 = vld [vmem:[%s6279_s9 + $0x24] ss:$8 sps:$4 sm:$0xff]  }
 0x676   :  { %v4529_v23 = vpop.permute.xlu0 %4528 }
 0x677   :  { %v4531_v57 = vunpack.i.h.bf16 %v4529_v23  ;;  %v4530_v26 = vunpack.i.l.bf16 %v4529_v23 }
 0x679   :  { %v1367_v30 = vsel %vm1365_vm5, %v1362_v5, %v4531_v57  ;;  %v1366_v55 = vsel %vm1365_vm5, %v1361_v28, %v4530_v26 }
 0x67a   :  { %v4534_v1 = vpop.permute.xlu1 %4533 }
 0x67b   :  { %v4536_v8 = vunpack.i.h.bf16 %v4534_v1  ;;  %v4535_v60 = vunpack.i.l.bf16 %v4534_v1  ;;  %v4658_v1 = vld [vmem:[%s6279_s9 + $0x14] ss:$8 sps:$4 sm:$0xff]  }
 0x67d   :  { %v1369_v17 = vsel %vm1365_vm5, %v1364_v25, %v4536_v8  ;;  %v1368_v48 = vsel %vm1365_vm5, %v1363_v4, %v4535_v60  ;;  %v4659_v8 = vld [vmem:[%s6279_s9 + $0x20] ss:$8 sps:$4 sm:$0xff]   ;;  %v4664_v60 = vld [vmem:[%s6279_s9 + $0x34] ss:$8 sps:$4 sm:$0xff]  }
 0x67e   :  { %v4539_v51 = vpop.permute.xlu0 %4538 }
 0x67f   :  { %v4541_v61 = vunpack.i.h.bf16 %v4539_v51  ;;  %v4540_v29 = vunpack.i.l.bf16 %v4539_v51 }
 0x681   :  { %v1372_v6 = vsel %vm1370_vm6, %v1367_v30, %v4541_v61  ;;  %v1371_v32 = vsel %vm1370_vm6, %v1366_v55, %v4540_v29 }
 0x682   :  { %v1375_v40 = vpack.c.bf16 %v1372_v6, %v1371_v32 }
 0x684   :  { %4332 = vmatprep.mubr.msk.bf16.mxu1 %vm65_vm0, %v1375_v40  ;;  %v4655_v40 = vld [vmem:[%s6279_s9 + $0x4] ss:$8 sps:$4 sm:$0xff]  }
 0x685   :  { %1617 = vmatprep.subr.bf16.mxu0 %v4655_v40  ;;  %v4679_v40 = vld [vmem:[%s6281_s11 + $0x78] sm:$0xff]  }
 0x686   :  { %1618 = vmatpush1.bf16.msra.mxu0 %v4653_v54  ;;  %v4680_v54 = vld [vmem:[%s6281_s11 + $0x38] sm:$0xff]  }
 0x687   :  { %1619 = vmatprep.subr.bf16.mxu0 %v4658_v1  ;;  %v1559_v1 = vld [vmem:[%s6280_s10] sm:$0x3] }
 0x68a   :  { %1620 = vmatpush1.bf16.msra.mxu0 %v4656_v38  ;;  %v1564_v38 = vrot.slane %v1559_v1, %v5141_v7 }
 0x68b   :  { %1621 = vmatprep.subr.bf16.mxu0 %v4661_v56  ;;  %v1568_v56 = vrot.slane %v1559_v1, %v5147_v9 }
 0x68e   :  { %1622 = vmatpush1.bf16.msra.mxu0 %v4659_v8 }
 0x68f   :  { %1623 = vmatprep.subr.bf16.mxu0 %v4664_v60 }
 0x6b7   :  { %v4544_v44 = vpop.permute.xlu1 %4543 }
 0x6b8   :  { %v4546_v13 = vunpack.i.h.bf16 %v4544_v44  ;;  %v4545_v46 = vunpack.i.l.bf16 %v4544_v44  ;;  %v4662_v44 = vld [vmem:[%s6279_s9 + $0x30] ss:$8 sps:$4 sm:$0xff]  }
 0x6b9   :  { %1624 = vmatpush1.bf16.msra.mxu0 %v4662_v44 }
 0x6ba   :  { %v1374_v50 = vsel %vm1370_vm6, %v1369_v17, %v4546_v13  ;;  %v1373_v52 = vsel %vm1370_vm6, %v1368_v48, %v4545_v46 }
 0x6bb   :  { %v1376_v58 = vpack.c.bf16 %v1374_v50, %v1373_v52 }
 0x6bd   :  { %4333 = vmatmul.mubr.msk.bf16.vlgmr.msra.gmra.mrb[32].mxu1 %vm65_vm0, %v1376_v58 }
 0x790   :  { %v4334_v59 = vpop.f32.mrb[32].mxu1 }
 0x791   :  { %v1456_v36 = vpop.f32.mrb[33].mxu1  ;;  %v1465_v35 = vadd.f32 %v4334_v59, %v3914_v39 }
 0x792   :  { %v1457_v15 = vadd.f32 %v3914_v39, %v1456_v36  ;;  %v4335_v19 = vpop.f32.mrb[34].mxu1 }
 0x793   :  { %v1459_v62 = vpop.f32.mrb[35].mxu1  ;;  %v5542_v10 = vadd.f32 %v4958_v3, %v1465_v35  ;;  %v1468_v11 = vadd.f32 %v4335_v19, %v3914_v39 }
 0x794   :  { %v5537_v0 = vadd.f32 %v4957_v63, %v1457_v15  ;;  %v1460_v2 = vadd.f32 %v3914_v39, %v1459_v62  ;;  %v3921_v15 = vld [vmem:[%s6277_s7] ss:$0 sm:$0xff] }
 0x795   :  { %v5556_v34 = vadd.f32 %v4960_v45, %v1468_v11  ;;  %v1483_v43 = vsel %vm65_vm0, %v5542_v10, 0.0  ;;  %v3922_v11 = vld [vmem:[%s6278_s8] ss:$0 sm:$0xff] }
 0x796   :  { %v5547_v14 = vadd.f32 %v4959_v12, %v1460_v2  ;;  %v1477_v41 = vsel %vm65_vm0, %v5537_v0, 0.0 }
 0x797   :  { %1478 = vadd.xlane.f32.xlu0 %v1477_v41  ;;  %v1486_v24 = vsel %vm65_vm0, %v5556_v34, 0.0 }
 0x798   :  { %v1480_v42 = vsel %vm65_vm0, %v5547_v14, 0.0 }
 0x799   :  { %1481 = vadd.xlane.f32.xlu1 %v1480_v42 }
 0x79b   :  { %1484 = vadd.xlane.f32.xlu0 %v1483_v43 }
 0x79f   :  { %1487 = vadd.xlane.f32.xlu0 %v1486_v24 }
 0x824   :  { %v1479_v16 = vpop.xlane.xlu0 %1478 }
 0x825   :  { %v1489_v21 = vmul.f32 0.015625, %v1479_v16 }
 0x826   :  { %v1482_v49 = vpop.xlane.xlu1 %1481 }
 0x827   :  { %v1493_v31 = vsub.f32 %v5537_v0, %v1489_v21  ;;  %v1490_v47 = vmul.f32 0.015625, %v1482_v49 }
 0x828   :  { %v1485_v53 = vpop.xlane.xlu0 %1484 }
 0x829   :  { %v1494_v23 = vsub.f32 %v5547_v14, %v1490_v47  ;;  %v1491_v37 = vmul.f32 0.015625, %v1485_v53  ;;  %v1497_v27 = vmul.f32 %v1493_v31, %v1493_v31 }
 0x82b   :  { %v1495_v57 = vsub.f32 %v5542_v10, %v1491_v37  ;;  %v1501_v26 = vsel %vm65_vm0, %v1497_v27, 0.0  ;;  %v1498_v51 = vmul.f32 %v1494_v23, %v1494_v23  ;;  %v4666_v37 = vld [vmem:[%s6281_s11] sm:$0xff]   ;;  %v4667_v27 = vld [vmem:[%s6281_s11 + $0x48] sm:$0xff]  }
 0x82c   :  { %1502 = vadd.xlane.f32.xlu0 %v1501_v26  ;;  %v1488_v5 = vpop.xlane.xlu0 %1487  ;;  %v4669_v26 = vld [vmem:[%s6281_s11 + $0x50] sm:$0xff]  }
 0x82d   :  { %v1492_v28 = vmul.f32 0.015625, %v1488_v5  ;;  %v1504_v61 = vsel %vm65_vm0, %v1498_v51, 0.0  ;;  %v1499_v29 = vmul.f32 %v1495_v57, %v1495_v57  ;;  %v4670_v51 = vld [vmem:[%s6281_s11 + $0x10] sm:$0xff]   ;;  %v4671_v5 = vld [vmem:[%s6281_s11 + $0x58] sm:$0xff]  }
 0x82e   :  { %1505 = vadd.xlane.f32.xlu1 %v1504_v61  ;;  %v4673_v61 = vld [vmem:[%s6281_s11 + $0x60] sm:$0xff]  }
 0x82f   :  { %v1496_v30 = vsub.f32 %v5556_v34, %v1492_v28  ;;  %v1507_v55 = vsel %vm65_vm0, %v1499_v29, 0.0  ;;  %v4672_v28 = vld [vmem:[%s6281_s11 + $0x18] sm:$0xff]   ;;  %v4674_v29 = vld [vmem:[%s6281_s11 + $0x20] sm:$0xff]  }
 0x830   :  { %1508 = vadd.xlane.f32.xlu0 %v1507_v55  ;;  %v4676_v55 = vld [vmem:[%s6281_s11 + $0x28] sm:$0xff]  }
 0x831   :  { %v1500_v6 = vmul.f32 %v1496_v30, %v1496_v30 }
 0x833   :  { %v1510_v32 = vsel %vm65_vm0, %v1500_v6, 0.0  ;;  %v4677_v6 = vld [vmem:[%s6281_s11 + $0x70] sm:$0xff]  }
 0x834   :  { %1511 = vadd.xlane.f32.xlu1 %v1510_v32  ;;  %v4678_v32 = vld [vmem:[%s6281_s11 + $0x30] sm:$0xff]  }
 0x8b9   :  { %v1503_v25 = vpop.xlane.xlu0 %1502 }
 0x8ba   :  { %v1513_v4 = vmul.f32 0.015625, %v1503_v25 }
 0x8bb   :  { %v1506_v13 = vpop.xlane.xlu1 %1505 }
 0x8bc   :  { %v1517_v46 = vadd.f32 1e-05, %v1513_v4  ;;  %v1514_v17 = vmul.f32 0.015625, %v1506_v13 }
 0x8bd   :  { %v1509_v48 = vpop.xlane.xlu0 %1508 }
 0x8be   :  { %4797 = vrsqrt.f32 %v1517_v46  ;;  %v1518_v50 = vadd.f32 1e-05, %v1514_v17  ;;  %v1515_v52 = vmul.f32 0.015625, %v1509_v48 }
 0x8c0   :  { %4799 = vrsqrt.f32 %v1518_v50  ;;  %v1519_v58 = vadd.f32 1e-05, %v1515_v52 }
 0x8c1   :  { %v1512_v39 = vpop.xlane.xlu1 %1511 }
 0x8c2   :  { %4801 = vrsqrt.f32 %v1519_v58  ;;  %v1516_v59 = vmul.f32 0.015625, %v1512_v39 }
 0x8c4   :  { %v1520_v36 = vadd.f32 1e-05, %v1516_v59 }
 0x8c6   :  { %4803 = vrsqrt.f32 %v1520_v36 }
 0x8c8   :  { %v4798_v35 = vpop.eup %4797 }
 0x8c9   :  { %v1525_v19 = vmul.f32 %v4798_v35, %v1493_v31 }
 0x8ca   :  { %v4800_v62 = vpop.eup %4799 }
 0x8cb   :  { %v1535_v63 = vmul.f32 %v3921_v15, %v1525_v19  ;;  %v1526_v2 = vmul.f32 %v4800_v62, %v1494_v23  ;;  %v4665_v23 = vld [vmem:[%s6281_s11 + $0x40] sm:$0xff]  }
 0x8cc   :  { %v4802_v3 = vpop.eup %4801  ;;  %4134 = vmatprep.subr.bf16.mxu1 %v4665_v23 }
 0x8cd   :  { %v1536_v12 = vmul.f32 %v3921_v15, %v1526_v2  ;;  %v1527_v41 = vmul.f32 %v4802_v3, %v1495_v57  ;;  %v1545_v42 = vadd.f32 %v3922_v11, %v1535_v63  ;;  %4135 = vmatpush3.bf16.msra.mxu1 %v4666_v37  ;;  %v4668_v57 = vld [vmem:[%s6281_s11 + $0x8] sm:$0xff]  }
 0x8ce   :  { %4136 = vmatprep.subr.bf16.mxu1 %v4667_v27 }
 0x8cf   :  { %v1546_v45 = vadd.f32 %v3922_v11, %v1536_v12  ;;  %v1537_v21 = vmul.f32 %v3921_v15, %v1527_v41 }
 0x8d0   :  { %v4804_v43 = vpop.eup %4803 }
 0x8d1   :  { %v1528_v24 = vmul.f32 %v4804_v43, %v1496_v30  ;;  %v1549_v16 = vpack.c.bf16 %v1546_v45, %v1545_v42  ;;  %v1547_v47 = vadd.f32 %v3922_v11, %v1537_v21  ;;  %4137 = vmatpush3.bf16.msra.mxu1 %v4668_v57  ;;  %v4675_v30 = vld [vmem:[%s6281_s11 + $0x68] sm:$0xff]  }
 0x8d2   :  { %4138 = vmatprep.subr.bf16.mxu1 %v4669_v26 }
 0x8d3   :  { %3931 = vmatmul.mubr.msk.bf16.vlgmr.msra.gmra.mrb[40].mxu0 %vm65_vm0, %v1549_v16  ;;  %v1538_v49 = vmul.f32 %v3921_v15, %v1528_v24 }
 0x8d4   :  { %1659 = vmatprep.mubr.bf16.mxu0 %v4985_v33 }
 0x8d5   :  { %v1548_v31 = vadd.f32 %v3922_v11, %v1538_v49  ;;  %4139 = vmatpush3.bf16.msra.mxu1 %v4670_v51 }
 0x8d6   :  { %4140 = vmatprep.subr.bf16.mxu1 %v4671_v5 }
 0x8d7   :  { %v1550_v53 = vpack.c.bf16 %v1548_v31, %v1547_v47 }
 0x8d9   :  { %4141 = vmatpush3.bf16.msra.mxu1 %v4672_v28 }
 0x8da   :  { %4142 = vmatprep.subr.bf16.mxu1 %v4673_v61 }
 0x8db   :  { %3932 = vmatmul.mubr.msk.bf16.gmra.mrb[44].mxu0 %vm65_vm0, %v1550_v53 }
 0x8dc   :  { %2104 = vmatprep.mubr.bf16.mxu0 %v4985_v33 }
 0x8dd   :  { %4143 = vmatpush3.bf16.msra.mxu1 %v4674_v29 }
 0x8de   :  { %4144 = vmatprep.subr.bf16.mxu1 %v4675_v30 }
 0x8e1   :  { %4145 = vmatpush3.bf16.msra.mxu1 %v4676_v55 }
 0x8e2   :  { %4146 = vmatprep.subr.bf16.mxu1 %v4677_v6 }
 0x8e5   :  { %4147 = vmatpush3.bf16.msra.mxu1 %v4678_v32 }
 0x8e6   :  { %4148 = vmatprep.subr.bf16.mxu1 %v4679_v40 }
 0x8e9   :  { %4149 = vmatpush3.bf16.msra.mxu1 %v4680_v54 }
 0x8ea   :  { %4348 = vmatprep.subr.bf16.mxu1 %v4986_v18 }
 0x9a6   :  { %v1651_v8 = vpop.f32.mrb[40].mxu0 }
 0x9a7   :  { %v5658_v60 = vadd.f32 %v1651_v8, %v1564_v38  ;;  %v1653_v44 = vpop.f32.mrb[41].mxu0 }
 0x9a8   :  { %v5660_v25 = vadd.f32 %v1653_v44, %v1568_v56  ;;  %v1655_v4 = vpop.f32.mrb[42].mxu0 }
 0x9a9   :  { %v3933_v13 = vmul.f32 -1.702, %v5658_v60  ;;  %v5663_v46 = vadd.f32 %v1655_v4, %v1564_v38  ;;  %v1657_v17 = vpop.f32.mrb[43].mxu0 }
 0x9aa   :  { %v3934_v48 = vmul.f32 -1.702, %v5660_v25  ;;  %v1658_v50 = vadd.f32 %v1657_v17, %v1568_v56 }
 0x9ab   :  { %v1686_v52 = vmul.f32 1.442695, %v3933_v13  ;;  %v3935_v58 = vmul.f32 -1.702, %v5663_v46 }
 0x9ac   :  { %v1688_v39 = vmul.f32 1.442695, %v3934_v48  ;;  %v3936_v59 = vmul.f32 -1.702, %v1658_v50 }
 0x9ad   :  { %4805 = vpow2.f32 %v1686_v52  ;;  %v1690_v36 = vmul.f32 1.442695, %v3935_v58 }
 0x9ae   :  { %4807 = vpow2.f32 %v1688_v39  ;;  %v1692_v35 = vmul.f32 1.442695, %v3936_v59  ;;  %v1661_v15 = vpop.f32.mrb[44].mxu0 }
 0x9af   :  { %4809 = vpow2.f32 %v1690_v36  ;;  %v1662_v19 = vadd.f32 %v1661_v15, %v1564_v38  ;;  %v1663_v62 = vpop.f32.mrb[45].mxu0 }
 0x9b0   :  { %4811 = vpow2.f32 %v1692_v35  ;;  %v1664_v63 = vadd.f32 %v1663_v62, %v1568_v56  ;;  %v1665_v2 = vpop.f32.mrb[46].mxu0 }
 0x9b1   :  { %v3937_v3 = vmul.f32 -1.702, %v1662_v19  ;;  %v1666_v11 = vadd.f32 %v1665_v2, %v1564_v38  ;;  %v1667_v12 = vpop.f32.mrb[47].mxu0 }
 0x9b2   :  { %v3938_v41 = vmul.f32 -1.702, %v1664_v63  ;;  %v1668_v42 = vadd.f32 %v1667_v12, %v1568_v56 }
 0x9b3   :  { %v1694_v45 = vmul.f32 1.442695, %v3937_v3  ;;  %v3939_v43 = vmul.f32 -1.702, %v1666_v11 }
 0x9b4   :  { %v1696_v24 = vmul.f32 1.442695, %v3938_v41  ;;  %v3940_v16 = vmul.f32 -1.702, %v1668_v42 }
 0x9b5   :  { %4813 = vpow2.f32 %v1694_v45  ;;  %v1698_v21 = vmul.f32 1.442695, %v3939_v43 }
 0x9b6   :  { %4815 = vpow2.f32 %v1696_v24  ;;  %v1700_v49 = vmul.f32 1.442695, %v3940_v16 }
 0x9b7   :  { %v4806_v31 = vpop.eup %4805  ;;  %4817 = vpow2.f32 %v1698_v21 }
 0x9b8   :  { %v4808_v47 = vpop.eup %4807  ;;  %v1702_v53 = vadd.f32 1.0, %v4806_v31  ;;  %4819 = vpow2.f32 %v1700_v49 }
 0x9b9   :  { %v4810_v23 = vpop.eup %4809  ;;  %v1703_v37 = vadd.f32 1.0, %v4808_v47 }
 0x9ba   :  { %v4812_v27 = vpop.eup %4811  ;;  %4821 = vrcp.f32 %v1702_v53  ;;  %v1704_v57 = vadd.f32 1.0, %v4810_v23 }
 0x9bb   :  { %4823 = vrcp.f32 %v1703_v37  ;;  %v1705_v26 = vadd.f32 1.0, %v4812_v27 }
 0x9bc   :  { %4825 = vrcp.f32 %v1704_v57 }
 0x9bd   :  { %4827 = vrcp.f32 %v1705_v26 }
 0x9bf   :  { %v4814_v51 = vpop.eup %4813 }
 0x9c0   :  { %v4816_v5 = vpop.eup %4815  ;;  %v1706_v28 = vadd.f32 1.0, %v4814_v51 }
 0x9c1   :  { %v4818_v61 = vpop.eup %4817  ;;  %v1707_v29 = vadd.f32 1.0, %v4816_v5 }
 0x9c2   :  { %v4820_v30 = vpop.eup %4819  ;;  %4829 = vrcp.f32 %v1706_v28  ;;  %v1708_v55 = vadd.f32 1.0, %v4818_v61 }
 0x9c3   :  { %4831 = vrcp.f32 %v1707_v29  ;;  %v1709_v6 = vadd.f32 1.0, %v4820_v30 }
 0x9c4   :  { %v4822_v32 = vpop.eup %4821  ;;  %4833 = vrcp.f32 %v1708_v55 }
 0x9c5   :  { %v4824_v40 = vpop.eup %4823  ;;  %4835 = vrcp.f32 %v1709_v6  ;;  %v1726_v38 = vmul.f32 %v4822_v32, %v5658_v60 }
 0x9c6   :  { %v4826_v54 = vpop.eup %4825  ;;  %v1727_v8 = vmul.f32 %v4824_v40, %v5660_v25  ;;  %v3941_v25 = vld [vmem:[%s6282_s12] ss:$0 sm:$0xff] }
 0x9c7   :  { %v4828_v1 = vpop.eup %4827  ;;  %v1728_v56 = vmul.f32 %v4826_v54, %v5663_v46 }
 0x9c8   :  { %v1729_v44 = vmul.f32 %v4828_v1, %v1658_v50 }
 0x9c9   :  { %v1734_v4 = vpack.c.bf16 %v1728_v56, %v1726_v38 }
 0x9ca   :  { %v1735_v13 = vpack.c.bf16 %v1729_v44, %v1727_v8  ;;  %v4683_v44 = vld [vmem:[%s6273_s3 + $0x44] ss:$8 sps:$4 sm:$0xff]  }
 0x9cb   :  { %2072 = vmatprep.subr.bf16.mxu0 %v4683_v44 }
 0x9cc   :  { %v4830_v17 = vpop.eup %4829  ;;  %1905 = vmatprep.mubr.bf16.mxu1 %v1735_v13  ;;  %v4686_v13 = vld [vmem:[%s6273_s3 + $0x54] ss:$8 sps:$4 sm:$0xff]  }
 0x9cd   :  { %v4832_v48 = vpop.eup %4831  ;;  %1906 = vmatmul.mubr.bf16.vlgmr.msra.gmra.mrb[36].mxu1 %v1734_v4  ;;  %v1730_v39 = vmul.f32 %v4830_v17, %v1662_v19  ;;  %v4681_v4 = vld [vmem:[%s6273_s3 + $0x40] ss:$8 sps:$4 sm:$0xff]   ;;  %v4684_v17 = vld [vmem:[%s6273_s3 + $0x50] ss:$8 sps:$4 sm:$0xff]  }
 0x9ce   :  { %v4834_v52 = vpop.eup %4833  ;;  %v1731_v36 = vmul.f32 %v4832_v48, %v1664_v63  ;;  %2073 = vmatpush1.bf16.msra.mxu0 %v4681_v4  ;;  %v4689_v48 = vld [vmem:[%s6273_s3 + $0x64] ss:$8 sps:$4 sm:$0xff]  }
 0x9cf   :  { %v4836_v58 = vpop.eup %4835  ;;  %v1732_v59 = vmul.f32 %v4834_v52, %v1666_v11  ;;  %2074 = vmatprep.subr.bf16.mxu0 %v4686_v13  ;;  %v4687_v52 = vld [vmem:[%s6273_s3 + $0x60] ss:$8 sps:$4 sm:$0xff]  }
 0x9d0   :  { %v1733_v35 = vmul.f32 %v4836_v58, %v1668_v42  ;;  %v4692_v58 = vld [vmem:[%s6273_s3 + $0x74] ss:$8 sps:$4 sm:$0xff]  }
 0x9d1   :  { %v1736_v15 = vpack.c.bf16 %v1732_v59, %v1730_v39  ;;  %v4690_v39 = vld [vmem:[%s6273_s3 + $0x70] ss:$8 sps:$4 sm:$0xff]  }
 0x9d2   :  { %v1737_v62 = vpack.c.bf16 %v1733_v35, %v1731_v36  ;;  %2075 = vmatpush1.bf16.msra.mxu0 %v4684_v17 }
 0x9d3   :  { %2076 = vmatprep.subr.bf16.mxu0 %v4689_v48 }
 0x9d4   :  { %1913 = vmatprep.mubr.bf16.mxu1 %v1737_v62 }
 0x9d5   :  { %1914 = vmatmul.mubr.bf16.gmra.mrb[40].mxu1 %v1736_v15 }
 0x9d6   :  { %4350 = vmatprep.mubr.msk.bf16.mxu1 %vm4988_vm1, %v4986_v18  ;;  %2077 = vmatpush1.bf16.msra.mxu0 %v4687_v52 }
 0x9d7   :  { %2078 = vmatprep.subr.bf16.mxu0 %v4692_v58 }
 0x9da   :  { %2079 = vmatpush1.bf16.msra.mxu0 %v4690_v39 }
 0x9db   :  { %4336 = vmatprep.subr.bf16.mxu0 %v4986_v18 }
 0xaa0   :  { %v4150_v60 = vpop.f32.mrb[36].mxu1 }
 0xaa1   :  { %v4151_v46 = vpop.f32.mrb[37].mxu1 }
 0xaa2   :  { %v4152_v50 = vadd.f32 %v4151_v46, %v4150_v60  ;;  %v4153_v2 = vpop.f32.mrb[38].mxu1 }
 0xaa3   :  { %v4154_v3 = vpop.f32.mrb[39].mxu1 }
 0xaa4   :  { %v1908_v19 = vadd.f32 %v4152_v50, %v3941_v25  ;;  %v4155_v11 = vadd.f32 %v4154_v3, %v4153_v2 }
 0xaa6   :  { %v5676_v63 = vadd.f32 %v1908_v19, %v5537_v0  ;;  %v1911_v12 = vadd.f32 %v4155_v11, %v3941_v25 }
 0xaa8   :  { %v5679_v41 = vadd.f32 %v1911_v12, %v5547_v14  ;;  %v4156_v42 = vpop.f32.mrb[40].mxu1  ;;  %v1930_v45 = vsel %vm65_vm0, %v5676_v63, 0.0  ;;  %v3960_v12 = vld [vmem:[%s6271_s1 + $0x1] ss:$0 sm:$0xff] }
 0xaa9   :  { %1931 = vadd.xlane.f32.xlu0 %v1930_v45  ;;  %v4157_v43 = vpop.f32.mrb[41].mxu1 }
 0xaaa   :  { %v4158_v24 = vadd.f32 %v4157_v43, %v4156_v42  ;;  %v4159_v16 = vpop.f32.mrb[42].mxu1  ;;  %v1933_v21 = vsel %vm65_vm0, %v5679_v41, 0.0 }
 0xaab   :  { %1934 = vadd.xlane.f32.xlu1 %v1933_v21  ;;  %v4160_v49 = vpop.f32.mrb[43].mxu1 }
 0xaac   :  { %v1916_v31 = vadd.f32 %v4158_v24, %v3941_v25  ;;  %v4161_v0 = vadd.f32 %v4160_v49, %v4159_v16  ;;  %v3961_v16 = vld [vmem:[%s6272_s2 + $0x1] ss:$0 sm:$0xff] }
 0xaae   :  { %v5686_v47 = vadd.f32 %v1916_v31, %v5542_v10  ;;  %v1919_v14 = vadd.f32 %v4161_v0, %v3941_v25 }
 0xab0   :  { %v5689_v53 = vadd.f32 %v1919_v14, %v5556_v34  ;;  %v1936_v23 = vsel %vm65_vm0, %v5686_v47, 0.0 }
 0xab1   :  { %1937 = vadd.xlane.f32.xlu0 %v1936_v23 }
 0xab2   :  { %v1939_v37 = vsel %vm65_vm0, %v5689_v53, 0.0 }
 0xab3   :  { %1940 = vadd.xlane.f32.xlu1 %v1939_v37 }
 0xb36   :  { %v1932_v27 = vpop.xlane.xlu0 %1931 }
 0xb37   :  { %v1942_v57 = vmul.f32 0.015625, %v1932_v27 }
 0xb38   :  { %v1935_v26 = vpop.xlane.xlu1 %1934 }
 0xb39   :  { %v1946_v51 = vsub.f32 %v5676_v63, %v1942_v57  ;;  %v1943_v5 = vmul.f32 0.015625, %v1935_v26 }
 0xb3b   :  { %v1947_v10 = vsub.f32 %v5679_v41, %v1943_v5  ;;  %v1950_v28 = vmul.f32 %v1946_v51, %v1946_v51 }
 0xb3d   :  { %v1954_v34 = vsel %vm65_vm0, %v1950_v28, 0.0  ;;  %v1951_v61 = vmul.f32 %v1947_v10, %v1947_v10  ;;  %v3970_v28 = vld [vmem:[%s6274_s4 + $0x2] sm:$0x3] }
 0xb3e   :  { %1955 = vadd.xlane.f32.xlu0 %v1954_v34  ;;  %v1938_v29 = vpop.xlane.xlu0 %1937  ;;  %v2019_v34 = vrot.slane %v3970_v28, %v5141_v7 }
 0xb3f   :  { %v1944_v30 = vmul.f32 0.015625, %v1938_v29  ;;  %v1957_v55 = vsel %vm65_vm0, %v1951_v61, 0.0  ;;  %v2023_v29 = vrot.slane %v3970_v28, %v5147_v9 }
 0xb40   :  { %1958 = vadd.xlane.f32.xlu1 %v1957_v55  ;;  %v1941_v6 = vpop.xlane.xlu1 %1940 }
 0xb41   :  { %v1948_v32 = vsub.f32 %v5686_v47, %v1944_v30  ;;  %v1945_v40 = vmul.f32 0.015625, %v1941_v6 }
 0xb43   :  { %v1949_v54 = vsub.f32 %v5689_v53, %v1945_v40  ;;  %v1952_v1 = vmul.f32 %v1948_v32, %v1948_v32 }
 0xb45   :  { %v1960_v38 = vsel %vm65_vm0, %v1952_v1, 0.0  ;;  %v1953_v56 = vmul.f32 %v1949_v54, %v1949_v54 }
 0xb46   :  { %1961 = vadd.xlane.f32.xlu0 %v1960_v38 }
 0xb47   :  { %v1963_v8 = vsel %vm65_vm0, %v1953_v56, 0.0 }
 0xb48   :  { %1964 = vadd.xlane.f32.xlu1 %v1963_v8 }
 0xbcb   :  { %v1956_v59 = vpop.xlane.xlu0 %1955 }
 0xbcc   :  { %v1966_v36 = vmul.f32 0.015625, %v1956_v59 }
 0xbcd   :  { %v1959_v35 = vpop.xlane.xlu1 %1958 }
 0xbce   :  { %v1970_v15 = vadd.f32 1e-05, %v1966_v36  ;;  %v1967_v62 = vmul.f32 0.015625, %v1959_v35 }
 0xbd0   :  { %4837 = vrsqrt.f32 %v1970_v15  ;;  %v1971_v60 = vadd.f32 1e-05, %v1967_v62 }
 0xbd2   :  { %4839 = vrsqrt.f32 %v1971_v60 }
 0xbd3   :  { %v1962_v25 = vpop.xlane.xlu0 %1961 }
 0xbd4   :  { %v1968_v46 = vmul.f32 0.015625, %v1962_v25 }
 0xbd5   :  { %v1965_v50 = vpop.xlane.xlu1 %1964 }
 0xbd6   :  { %v1972_v2 = vadd.f32 1e-05, %v1968_v46  ;;  %v1969_v3 = vmul.f32 0.015625, %v1965_v50 }
 0xbd8   :  { %4841 = vrsqrt.f32 %v1972_v2  ;;  %v1973_v19 = vadd.f32 1e-05, %v1969_v3 }
 0xbda   :  { %v4838_v11 = vpop.eup %4837  ;;  %4843 = vrsqrt.f32 %v1973_v19 }
 0xbdb   :  { %v1978_v42 = vmul.f32 %v4838_v11, %v1946_v51 }
 0xbdc   :  { %v4840_v45 = vpop.eup %4839 }
 0xbdd   :  { %v1988_v43 = vmul.f32 %v3960_v12, %v1978_v42  ;;  %v1979_v24 = vmul.f32 %v4840_v45, %v1947_v10 }
 0xbdf   :  { %v1989_v21 = vmul.f32 %v3960_v12, %v1979_v24  ;;  %v1998_v49 = vadd.f32 %v3961_v16, %v1988_v43 }
 0xbe1   :  { %v1999_v31 = vadd.f32 %v3961_v16, %v1989_v21 }
 0xbe2   :  { %v4842_v0 = vpop.eup %4841 }
 0xbe3   :  { %v1980_v14 = vmul.f32 %v4842_v0, %v1948_v32  ;;  %v2002_v23 = vpack.c.bf16 %v1999_v31, %v1998_v49 }
 0xbe4   :  { %v4844_v37 = vpop.eup %4843 }
 0xbe5   :  { %v1981_v27 = vmul.f32 %v4844_v37, %v1949_v54  ;;  %3979 = vmatmul.mubr.msk.bf16.vlgmr.msra.gmra.mrb[48].mxu0 %vm65_vm0, %v2002_v23  ;;  %v1990_v57 = vmul.f32 %v3960_v12, %v1980_v14 }
 0xbe6   :  { %2114 = vmatprep.mubr.bf16.mxu0 %v4985_v33 }
 0xbe7   :  { %v1991_v26 = vmul.f32 %v3960_v12, %v1981_v27  ;;  %v2000_v51 = vadd.f32 %v3961_v16, %v1990_v57 }
 0xbe9   :  { %v2001_v5 = vadd.f32 %v3961_v16, %v1991_v26 }
 0xbeb   :  { %v2003_v10 = vpack.c.bf16 %v2001_v5, %v2000_v51 }
 0xbed   :  { %3980 = vmatmul.mubr.msk.bf16.gmra.mrb[52].mxu0 %vm65_vm0, %v2003_v10 }
 0xbee   :  { %4338 = vmatprep.mubr.msk.bf16.mxu0 %vm4988_vm1, %v4986_v18 }
 0xcb8   :  { %v2106_v61 = vpop.f32.mrb[48].mxu0 }
 0xcb9   :  { %v2108_v30 = vpop.f32.mrb[49].mxu0  ;;  %v2107_v6 = vadd.f32 %v2106_v61, %v2019_v34 }
 0xcba   :  { %v2110_v55 = vpop.f32.mrb[50].mxu0  ;;  %v5744_v54 = vadd.f32 %v2108_v30, %v2023_v29 }
 0xcbb   :  { %v2111_v32 = vadd.f32 %v2110_v55, %v2019_v34  ;;  %v2112_v40 = vpop.f32.mrb[51].mxu0 }
 0xcbc   :  { %v5746_v1 = vadd.f32 %v2112_v40, %v2023_v29 }
 0xcbd   :  { %v4547_v38 = vpack.i.bf16 %v2111_v32, %v2107_v6  ;;  %v2165_v56 = vpack.c.bf16 %v2111_v32, %v2107_v6 }
 0xcbe   :  { %v2213_v8 = vpack.c.bf16 %v5746_v1, %v5744_v54  ;;  %v5752_v44 = vpack.i.bf16 %v5746_v1, %v5744_v54 }
 0xcbf   :  { %4548 = vrot.lane.b32.xlu0 %v4547_v38, %s4987_s18 }
 0xcc0   :  { %v2116_v4 = vpop.f32.mrb[52].mxu0 }
 0xcc1   :  { %v2118_v13 = vpop.f32.mrb[53].mxu0  ;;  %v2117_v48 = vadd.f32 %v2116_v4, %v2019_v34 }
 0xcc2   :  { %v2120_v17 = vpop.f32.mrb[54].mxu0  ;;  %v5756_v39 = vadd.f32 %v2118_v13, %v2023_v29 }
 0xcc3   :  { %v2121_v52 = vadd.f32 %v2120_v17, %v2019_v34  ;;  %4568 = vrot.lane.b32.xlu0 %v4547_v38, %s4989_s19  ;;  %v2122_v58 = vpop.f32.mrb[55].mxu0 }
 0xcc4   :  { %v5758_v59 = vadd.f32 %v2122_v58, %v2023_v29 }
 0xcc5   :  { %v4552_v36 = vpack.i.bf16 %v2121_v52, %v2117_v48  ;;  %v2166_v35 = vpack.c.bf16 %v2121_v52, %v2117_v48 }
 0xcc6   :  { %v2214_v15 = vpack.c.bf16 %v5758_v59, %v5756_v39  ;;  %v5764_v62 = vpack.i.bf16 %v5758_v59, %v5756_v39 }
 0xcc7   :  { %2222 = vrot.lane.b32.xlu0 %v2165_v56, %s4990_s20  ;;  %4553 = vrot.lane.b32.xlu1 %v4552_v36, %s4987_s18 }
 0xccb   :  { %4558 = vrot.lane.b32.xlu1 %v4547_v38, %s4991_s21 }
 0xccf   :  { %4563 = vrot.lane.b32.xlu1 %v4552_v36, %s4991_s21 }
 0xcd3   :  { %4573 = vrot.lane.b32.xlu1 %v4552_v36, %s4989_s19 }
 0xcd7   :  { %2272 = vrot.lane.b32.xlu1 %v2166_v35, %s4990_s20 }
 0xd31   :  { %v4549_v60 = vpop.permute.xlu0 %4548 }
 0xd32   :  { %v4551_v25 = vunpack.i.h.bf16 %v4549_v60  ;;  %v4550_v46 = vunpack.i.l.bf16 %v4549_v60 }
 0xd34   :  { %v2167_v50 = vpack.c.bf16 %v4551_v25, %v4550_v46 }
 0xd35   :  { %v4569_v2 = vpop.permute.xlu0 %4568 }
 0xd36   :  { %2322 = vrot.lane.b32.xlu0 %v2167_v50, %s4990_s20  ;;  %v4571_v21 = vunpack.i.h.bf16 %v4569_v2  ;;  %v4570_v49 = vunpack.i.l.bf16 %v4569_v2 }
 0xd38   :  { %v2171_v37 = vpack.c.bf16 %v4571_v21, %v4570_v49 }
 0xd39   :  { %v4554_v3 = vpop.permute.xlu1 %4553  ;;  %v2223_v19 = vpop.permute.xlu0 %2222 }
 0xd3a   :  { %v4556_v11 = vunpack.i.h.bf16 %v4554_v3  ;;  %v4555_v12 = vunpack.i.l.bf16 %v4554_v3  ;;  %v2228_v42 = vsel %vm359_vm2, %v2223_v19, 0 }
 0xd3b   :  { %4337 = vmatpush3.bf16.xpose.msra.mxu0 %v2228_v42 }
 0xd3c   :  { %v2168_v45 = vpack.c.bf16 %v4556_v11, %v4555_v12  ;;  %4342 = vmatprep.subr.bf16.mxu0 %v4986_v18 }
 0xd3d   :  { %v4559_v43 = vpop.permute.xlu1 %4558 }
 0xd3e   :  { %v4561_v24 = vunpack.i.h.bf16 %v4559_v43  ;;  %v4560_v16 = vunpack.i.l.bf16 %v4559_v43  ;;  %2372 = vrot.lane.b32.xlu1 %v2168_v45, %s4990_s20 }
 0xd40   :  { %v2169_v31 = vpack.c.bf16 %v4561_v24, %v4560_v16 }
 0xd41   :  { %v4564_v0 = vpop.permute.xlu1 %4563 }
 0xd42   :  { %v4566_v14 = vunpack.i.h.bf16 %v4564_v0  ;;  %v4565_v23 = vunpack.i.l.bf16 %v4564_v0  ;;  %4339 = vmatmul.mubr.msk.bf16.vlgmr.msra.gmra.mrb[56].mxu0 %vm359_vm2, %v2165_v56  ;;  %2422 = vrot.lane.b32.xlu0 %v2169_v31, %s4990_s20 }
 0xd43   :  { %4344 = vmatprep.mubr.msk.bf16.mxu0 %vm4988_vm1, %v4986_v18 }
 0xd44   :  { %v2170_v27 = vpack.c.bf16 %v4566_v14, %v4565_v23 }
 0xd45   :  { %v4574_v57 = vpop.permute.xlu1 %4573 }
 0xd46   :  { %v4576_v26 = vunpack.i.h.bf16 %v4574_v57  ;;  %v4575_v51 = vunpack.i.l.bf16 %v4574_v57  ;;  %2472 = vrot.lane.b32.xlu1 %v2170_v27, %s4990_s20  ;;  %2522 = vrot.lane.b32.xlu0 %v2171_v37, %s4990_s20 }
 0xd48   :  { %v2172_v5 = vpack.c.bf16 %v4576_v26, %v4575_v51 }
 0xd49   :  { %v2273_v10 = vpop.permute.xlu1 %2272 }
 0xd4a   :  { %v2278_v28 = vsel %vm359_vm2, %v2273_v10, 0  ;;  %2572 = vrot.lane.b32.xlu1 %v2172_v5, %s4990_s20 }
 0xd4b   :  { %4343 = vmatpush3.bf16.xpose.msra.mxu0 %v2278_v28 }
 0xd4c   :  { %4354 = vmatprep.subr.bf16.mxu0 %v4986_v18 }
 0xd52   :  { %4345 = vmatmul.mubr.msk.bf16.vlgmr.msra.gmra.mrb[60].mxu0 %vm359_vm2, %v2166_v35 }
 0xd53   :  { %4356 = vmatprep.mubr.msk.bf16.mxu0 %vm4988_vm1, %v4986_v18 }
 0xda8   :  { %v2323_v34 = vpop.permute.xlu0 %2322 }
 0xda9   :  { %v2328_v61 = vsel %vm359_vm2, %v2323_v34, 0 }
 0xdaa   :  { %4349 = vmatpush3.bf16.xpose.msra.mxu1 %v2328_v61 }
 0xdab   :  { %4360 = vmatprep.subr.bf16.mxu1 %v4986_v18 }
 0xdb0   :  { %v2373_v29 = vpop.permute.xlu1 %2372 }
 0xdb1   :  { %v2378_v30 = vsel %vm359_vm2, %v2373_v29, 0  ;;  %4351 = vmatmul.mubr.msk.bf16.vlgmr.msra.gmra.mrb[44].mxu1 %vm359_vm2, %v2167_v50 }
 0xdb2   :  { %4355 = vmatpush3.bf16.xpose.msra.mxu0 %v2378_v30  ;;  %4362 = vmatprep.mubr.msk.bf16.mxu1 %vm4988_vm1, %v4986_v18 }
 0xdb3   :  { %4366 = vmatprep.subr.bf16.mxu0 %v4986_v18 }
 0xdb4   :  { %v2423_v55 = vpop.permute.xlu0 %2422 }
 0xdb5   :  { %v2428_v6 = vsel %vm359_vm2, %v2423_v55, 0 }
 0xdb6   :  { %4361 = vmatpush3.bf16.xpose.msra.mxu1 %v2428_v6 }
 0xdb7   :  { %4372 = vmatprep.subr.bf16.mxu1 %v4986_v18 }
 0xdb8   :  { %v2473_v32 = vpop.permute.xlu1 %2472  ;;  %v2523_v38 = vpop.permute.xlu0 %2522 }
 0xdb9   :  { %v2478_v40 = vsel %vm359_vm2, %v2473_v32, 0  ;;  %4357 = vmatmul.mubr.msk.bf16.vlgmr.msra.gmra.mrb[64].mxu0 %vm359_vm2, %v2168_v45  ;;  %v2528_v56 = vsel %vm359_vm2, %v2523_v38, 0 }
 0xdba   :  { %4367 = vmatpush3.bf16.xpose.msra.mxu0 %v2478_v40  ;;  %4368 = vmatprep.mubr.msk.bf16.mxu0 %vm4988_vm1, %v4986_v18 }
 0xdbb   :  { %4378 = vmatprep.subr.bf16.mxu0 %v4986_v18 }
 0xdbc   :  { %v2573_v4 = vpop.permute.xlu1 %2572 }
 0xdbd   :  { %4363 = vmatmul.mubr.msk.bf16.vlgmr.msra.gmra.mrb[48].mxu1 %vm359_vm2, %v2169_v31  ;;  %v2578_v13 = vsel %vm359_vm2, %v2573_v4, 0 }
 0xdbe   :  { %4373 = vmatpush3.bf16.xpose.msra.mxu1 %v2528_v56  ;;  %4374 = vmatprep.mubr.msk.bf16.mxu1 %vm4988_vm1, %v4986_v18 }
 0xdbf   :  { %4384 = vmatprep.subr.bf16.mxu1 %v4986_v18 }
 0xdc1   :  { %4369 = vmatmul.mubr.msk.bf16.vlgmr.msra.gmra.mrb[68].mxu0 %vm359_vm2, %v2170_v27 }
 0xdc2   :  { %4379 = vmatpush3.bf16.xpose.msra.mxu0 %v2578_v13  ;;  %4380 = vmatprep.mubr.msk.bf16.mxu0 %vm4988_vm1, %v4986_v18 }
 0xdc3   :  { %4390 = vmatprep.subr.bf16.mxu0 %v4986_v18 }
 0xdc5   :  { %4375 = vmatmul.mubr.msk.bf16.vlgmr.msra.gmra.mrb[52].mxu1 %vm359_vm2, %v2171_v37 }
 0xdc6   :  { %4385 = vmatpush3.bf16.msra.mxu1 %v2213_v8  ;;  %4386 = vmatprep.mubr.msk.bf16.mxu1 %vm4988_vm1, %v4986_v18 }
 0xdc7   :  { %4396 = vmatprep.subr.bf16.mxu1 %v4986_v18 }
 0xdc9   :  { %4381 = vmatmul.mubr.msk.bf16.vlgmr.msra.gmra.mrb[72].mxu0 %vm359_vm2, %v2172_v5 }
 0xdca   :  { %4391 = vmatpush3.bf16.msra.mxu0 %v2214_v15  ;;  %4392 = vmatprep.mubr.msk.bf16.mxu0 %vm4988_vm1, %v4986_v18 }
 0xdcb   :  { %4402 = vmatprep.subr.bf16.mxu0 %v4986_v18 }
 0xe15   :  { %v2264_v17 = vpop.f32.mrb[56].mxu0 }
 0xe16   :  { %v5828_v54 = vsel %vm5242_vm3, %v2264_v17, -1e+30  ;;  %v4340_v1 = vpop.f32.mrb[57].mxu0 }
 0xe17   :  { %v2267_v8 = vpop.f32.mrb[58].mxu0  ;;  %v2637_v48 = vsel %vm359_vm2, %v5828_v54, -inf }
 0xe18   :  { %v5834_v52 = vsel %vm5246_vm4, %v2267_v8, -1e+30  ;;  %v4341_v58 = vpop.f32.mrb[59].mxu0  ;;  %2638 = vmax.xlane.f32.xlu0 %v2637_v48 }
 0xe19   :  { %v2640_v39 = vsel %vm359_vm2, %v5834_v52, -inf }
 0xe1a   :  { %2641 = vmax.xlane.f32.xlu1 %v2640_v39 }
 0xe25   :  { %v2314_v59 = vpop.f32.mrb[60].mxu0 }
 0xe26   :  { %v5840_v36 = vsel %vm5242_vm3, %v2314_v59, -1e+30  ;;  %v4346_v35 = vpop.f32.mrb[61].mxu0 }
 0xe27   :  { %v2317_v15 = vpop.f32.mrb[62].mxu0  ;;  %v2643_v60 = vsel %vm359_vm2, %v5840_v36, -inf }
 0xe28   :  { %v5846_v25 = vsel %vm5246_vm4, %v2317_v15, -1e+30  ;;  %v4347_v46 = vpop.f32.mrb[63].mxu0  ;;  %2644 = vmax.xlane.f32.xlu0 %v2643_v60 }
 0xe29   :  { %v2646_v50 = vsel %vm359_vm2, %v5846_v25, -inf }
 0xe2c   :  { %2647 = vmax.xlane.f32.xlu0 %v2646_v50 }
 0xe84   :  { %v2364_v2 = vpop.f32.mrb[44].mxu1 }
 0xe85   :  { %v5852_v3 = vsel %vm5242_vm3, %v2364_v2, -1e+30  ;;  %v4352_v19 = vpop.f32.mrb[45].mxu1 }
 0xe86   :  { %v2649_v11 = vsel %vm359_vm2, %v5852_v3, -inf  ;;  %v2367_v12 = vpop.f32.mrb[46].mxu1 }
 0xe87   :  { %v5858_v42 = vsel %vm5246_vm4, %v2367_v12, -1e+30  ;;  %2650 = vmax.xlane.f32.xlu0 %v2649_v11  ;;  %v4353_v45 = vpop.f32.mrb[47].mxu1 }
 0xe88   :  { %v2652_v43 = vsel %vm359_vm2, %v5858_v42, -inf }
 0xe89   :  { %2653 = vmax.xlane.f32.xlu1 %v2652_v43 }
 0xe8c   :  { %v2414_v24 = vpop.f32.mrb[64].mxu0 }
 0xe8d   :  { %v5864_v16 = vsel %vm5242_vm3, %v2414_v24, -1e+30  ;;  %v4358_v21 = vpop.f32.mrb[65].mxu0 }
 0xe8e   :  { %v2655_v49 = vsel %vm359_vm2, %v5864_v16, -inf  ;;  %v2417_v31 = vpop.f32.mrb[66].mxu0 }
 0xe8f   :  { %v5870_v0 = vsel %vm5246_vm4, %v2417_v31, -1e+30  ;;  %v4359_v14 = vpop.f32.mrb[67].mxu0  ;;  %2656 = vmax.xlane.f32.xlu0 %v2655_v49 }
 0xe90   :  { %v2658_v23 = vsel %vm359_vm2, %v5870_v0, -inf  ;;  %v2464_v37 = vpop.f32.mrb[48].mxu1 }
 0xe91   :  { %v5876_v27 = vsel %vm5242_vm3, %v2464_v37, -1e+30  ;;  %2659 = vmax.xlane.f32.xlu1 %v2658_v23  ;;  %v4364_v57 = vpop.f32.mrb[49].mxu1 }
 0xe92   :  { %v2661_v26 = vsel %vm359_vm2, %v5876_v27, -inf  ;;  %v2467_v51 = vpop.f32.mrb[50].mxu1 }
 0xe93   :  { %v5882_v5 = vsel %vm5246_vm4, %v2467_v51, -1e+30  ;;  %2662 = vmax.xlane.f32.xlu0 %v2661_v26  ;;  %v4365_v10 = vpop.f32.mrb[51].mxu1 }
 0xe94   :  { %v2664_v28 = vsel %vm359_vm2, %v5882_v5, -inf  ;;  %v2514_v34 = vpop.f32.mrb[68].mxu0 }
 0xe95   :  { %v5888_v61 = vsel %vm5242_vm3, %v2514_v34, -1e+30  ;;  %v4370_v29 = vpop.f32.mrb[69].mxu0  ;;  %2665 = vmax.xlane.f32.xlu1 %v2664_v28 }
 0xe96   :  { %v2667_v30 = vsel %vm359_vm2, %v5888_v61, -inf  ;;  %v2517_v55 = vpop.f32.mrb[70].mxu0 }
 0xe97   :  { %v5894_v6 = vsel %vm5246_vm4, %v2517_v55, -1e+30  ;;  %v4371_v32 = vpop.f32.mrb[71].mxu0  ;;  %2668 = vmax.xlane.f32.xlu0 %v2667_v30 }
 0xe98   :  { %v2670_v40 = vsel %vm359_vm2, %v5894_v6, -inf  ;;  %v2564_v38 = vpop.f32.mrb[52].mxu1 }
 0xe99   :  { %v5900_v56 = vsel %vm5242_vm3, %v2564_v38, -1e+30  ;;  %2671 = vmax.xlane.f32.xlu1 %v2670_v40  ;;  %v4376_v4 = vpop.f32.mrb[53].mxu1 }
 0xe9a   :  { %v2673_v13 = vsel %vm359_vm2, %v5900_v56, -inf  ;;  %v2567_v17 = vpop.f32.mrb[54].mxu1 }
 0xe9b   :  { %v5906_v1 = vsel %vm5246_vm4, %v2567_v17, -1e+30  ;;  %2674 = vmax.xlane.f32.xlu0 %v2673_v13  ;;  %v4377_v8 = vpop.f32.mrb[55].mxu1 }
 0xe9c   :  { %v2676_v48 = vsel %vm359_vm2, %v5906_v1, -inf  ;;  %v2614_v58 = vpop.f32.mrb[72].mxu0 }
 0xe9d   :  { %v5912_v39 = vsel %vm5242_vm3, %v2614_v58, -1e+30  ;;  %v4382_v59 = vpop.f32.mrb[73].mxu0  ;;  %2677 = vmax.xlane.f32.xlu1 %v2676_v48 }
 0xe9e   :  { %v2679_v35 = vsel %vm359_vm2, %v5912_v39, -inf  ;;  %v2617_v15 = vpop.f32.mrb[74].mxu0 }
 0xe9f   :  { %v4383_v60 = vpop.f32.mrb[75].mxu0  ;;  %2680 = vmax.xlane.f32.xlu0 %v2679_v35  ;;  %v5928_v45 = vsel %vm5246_vm4, %v2617_v15, -1e+30 }
 0xea5   :  { %v2639_v20 = vpop.xlane.xlu0 %2638 }
 0xea6   :  { %v2685_v46 = vsub.f32 %v5828_v54, %v2639_v20  ;;  %v2682_v54 = vsel %vm359_vm2, %v5928_v45, -inf }
 0xea7   :  { %v2642_v22 = vpop.xlane.xlu1 %2641 }
 0xea8   :  { %v2701_v2 = vmul.f32 1.442695, %v2685_v46  ;;  %v2686_v21 = vsub.f32 %v5834_v52, %v2642_v22 }
 0xeaa   :  { %4845 = vpow2.f32 %v2701_v2  ;;  %v2703_v31 = vmul.f32 1.442695, %v2686_v21 }
 0xeae   :  { %4583 = vrot.lane.b32.xlu1 %v5764_v62, %s4987_s18 }
 0xeb2   :  { %4588 = vrot.lane.b32.xlu1 %v5752_v44, %s4991_s21 }
 0xeb4   :  { %v5924_v12 = vpop.eup %4845 }
 0xeb5   :  { %4578 = vrot.lane.b32.xlu0 %v5752_v44, %s4987_s18  ;;  %v2645_v50 = vpop.xlane.xlu0 %2644  ;;  %v2733_v43 = vsel %vm359_vm2, %v5924_v12, 0.0 }
 0xeb6   :  { %v2687_v19 = vsub.f32 %v5840_v36, %v2645_v50 }
 0xeb8   :  { %v2705_v11 = vmul.f32 1.442695, %v2687_v19 }
 0xeb9   :  { %v2648_v49 = vpop.xlane.xlu0 %2647 }
 0xeba   :  { %4847 = vpow2.f32 %v2705_v11  ;;  %v2688_v14 = vsub.f32 %v5846_v25, %v2648_v49 }
 0xebb   :  { %4849 = vpow2.f32 %v2703_v31 }
 0xebc   :  { %v2707_v23 = vmul.f32 1.442695, %v2688_v14 }
 0xebe   :  { %4851 = vpow2.f32 %v2707_v23 }
 0xec4   :  { %v5932_v24 = vpop.eup %4847 }
 0xec5   :  { %v2739_v36 = vsel %vm359_vm2, %v5932_v24, 0.0  ;;  %v5942_v37 = vpop.eup %4849 }
 0xec6   :  { %v2736_v57 = vsel %vm359_vm2, %v5942_v37, 0.0 }
 0xec8   :  { %v5946_v26 = vpop.eup %4851 }
 0xec9   :  { %v2742_v51 = vsel %vm359_vm2, %v5946_v26, 0.0 }
 0xed4   :  { %2734 = vadd.xlane.f32.xlu0 %v2733_v43 }
 0xed6   :  { %2683 = vmax.xlane.f32.xlu1 %v2682_v54 }
 0xed8   :  { %2740 = vadd.xlane.f32.xlu0 %v2739_v36 }
 0xee7   :  { %4593 = vrot.lane.b32.xlu1 %v5764_v62, %s4991_s21 }
 0xf0b   :  { %2737 = vadd.xlane.f32.xlu1 %v2736_v57 }
 0xf0f   :  { %2743 = vadd.xlane.f32.xlu1 %v2742_v51 }
 0xf14   :  { %v2651_v52 = vpop.xlane.xlu0 %2650 }
 0xf15   :  { %v2689_v10 = vsub.f32 %v5852_v3, %v2651_v52 }
 0xf16   :  { %v2654_v28 = vpop.xlane.xlu1 %2653 }
 0xf17   :  { %v2709_v25 = vmul.f32 1.442695, %v2689_v10  ;;  %v2690_v34 = vsub.f32 %v5858_v42, %v2654_v28 }
 0xf19   :  { %4853 = vpow2.f32 %v2709_v25  ;;  %v2711_v29 = vmul.f32 1.442695, %v2690_v34 }
 0xf1b   :  { %4855 = vpow2.f32 %v2711_v29 }
 0xf1c   :  { %v2657_v30 = vpop.xlane.xlu0 %2656 }
 0xf1d   :  { %v2691_v55 = vsub.f32 %v5864_v16, %v2657_v30 }
 0xf1e   :  { %v2660_v32 = vpop.xlane.xlu1 %2659 }
 0xf1f   :  { %v2713_v40 = vmul.f32 1.442695, %v2691_v55  ;;  %v2692_v38 = vsub.f32 %v5870_v0, %v2660_v32 }
 0xf20   :  { %v2663_v4 = vpop.xlane.xlu0 %2662 }
 0xf21   :  { %4857 = vpow2.f32 %v2713_v40  ;;  %v2715_v13 = vmul.f32 1.442695, %v2692_v38  ;;  %v2693_v17 = vsub.f32 %v5876_v27, %v2663_v4 }
 0xf22   :  { %v2666_v3 = vpop.xlane.xlu1 %2665 }
 0xf23   :  { %v5955_v8 = vpop.eup %4853  ;;  %4859 = vpow2.f32 %v2715_v13  ;;  %v2717_v42 = vmul.f32 1.442695, %v2693_v17  ;;  %v2694_v48 = vsub.f32 %v5882_v5, %v2666_v3 }
 0xf24   :  { %v2669_v58 = vpop.xlane.xlu0 %2668  ;;  %v2745_v16 = vsel %vm359_vm2, %v5955_v8, 0.0 }
 0xf25   :  { %v5960_v59 = vpop.eup %4855  ;;  %4861 = vpow2.f32 %v2717_v42  ;;  %v2719_v0 = vmul.f32 1.442695, %v2694_v48  ;;  %v2695_v35 = vsub.f32 %v5888_v61, %v2669_v58  ;;  %2746 = vadd.xlane.f32.xlu0 %v2745_v16 }
 0xf26   :  { %v2672_v15 = vpop.xlane.xlu1 %2671  ;;  %v2748_v27 = vsel %vm359_vm2, %v5960_v59, 0.0 }
 0xf27   :  { %4863 = vpow2.f32 %v2719_v0  ;;  %v2721_v60 = vmul.f32 1.442695, %v2695_v35  ;;  %v2696_v20 = vsub.f32 %v5894_v6, %v2672_v15  ;;  %2749 = vadd.xlane.f32.xlu1 %v2748_v27 }
 0xf28   :  { %v2675_v5 = vpop.xlane.xlu0 %2674 }
 0xf29   :  { %4865 = vpow2.f32 %v2721_v60  ;;  %v2723_v46 = vmul.f32 1.442695, %v2696_v20  ;;  %v2697_v50 = vsub.f32 %v5900_v56, %v2675_v5 }
 0xf2a   :  { %v2678_v2 = vpop.xlane.xlu1 %2677 }
 0xf2b   :  { %v5967_v19 = vpop.eup %4857  ;;  %4867 = vpow2.f32 %v2723_v46  ;;  %v2725_v61 = vmul.f32 1.442695, %v2697_v50  ;;  %v2698_v11 = vsub.f32 %v5906_v1, %v2678_v2 }
 0xf2c   :  { %v2681_v43 = vpop.xlane.xlu0 %2680  ;;  %v2751_v54 = vsel %vm359_vm2, %v5967_v19, 0.0 }
 0xf2d   :  { %v5972_v36 = vpop.eup %4859  ;;  %4869 = vpow2.f32 %v2725_v61  ;;  %v2727_v6 = vmul.f32 1.442695, %v2698_v11  ;;  %v2699_v22 = vsub.f32 %v5912_v39, %v2681_v43  ;;  %2752 = vadd.xlane.f32.xlu0 %v2751_v54 }
 0xf2e   :  { %v2754_v56 = vsel %vm359_vm2, %v5972_v36, 0.0  ;;  %v4584_v30 = vpop.permute.xlu1 %4583 }
 0xf2f   :  { %v5977_v21 = vpop.eup %4861  ;;  %4871 = vpow2.f32 %v2727_v6  ;;  %v2729_v49 = vmul.f32 1.442695, %v2699_v22  ;;  %2755 = vadd.xlane.f32.xlu1 %v2754_v56  ;;  %v4586_v5 = vunpack.i.h.bf16 %v4584_v30  ;;  %v4585_v46 = vunpack.i.l.bf16 %v4584_v30 }
 0xf30   :  { %v2757_v1 = vsel %vm359_vm2, %v5977_v21, 0.0  ;;  %v4579_v17 = vpop.permute.xlu0 %4578 }
 0xf31   :  { %v5981_v31 = vpop.eup %4863  ;;  %4873 = vpow2.f32 %v2729_v49  ;;  %2758 = vadd.xlane.f32.xlu0 %v2757_v1  ;;  %v4581_v0 = vunpack.i.h.bf16 %v4579_v17  ;;  %v4580_v35 = vunpack.i.l.bf16 %v4579_v17 }
 0xf32   :  { %v2760_v14 = vsel %vm359_vm2, %v5981_v31, 0.0  ;;  %v6007_v55 = vpop.permute.xlu1 %4588 }
 0xf33   :  { %v5985_v39 = vpop.eup %4865  ;;  %2761 = vadd.xlane.f32.xlu1 %v2760_v14  ;;  %v2215_v50 = vpack.c.bf16 %v4581_v0, %v4580_v35  ;;  %v4591_v56 = vunpack.i.h.bf16 %v6007_v55  ;;  %v4590_v49 = vunpack.i.l.bf16 %v6007_v55 }
 0xf34   :  { %v2763_v23 = vsel %vm359_vm2, %v5985_v39, 0.0 }
 0xf35   :  { %v5989_v57 = vpop.eup %4867  ;;  %2764 = vadd.xlane.f32.xlu0 %v2763_v23 }
 0xf36   :  { %v2766_v51 = vsel %vm359_vm2, %v5989_v57, 0.0 }
 0xf37   :  { %v5993_v52 = vpop.eup %4869  ;;  %2767 = vadd.xlane.f32.xlu1 %v2766_v51 }
 0xf38   :  { %v2769_v10 = vsel %vm359_vm2, %v5993_v52, 0.0 }
 0xf39   :  { %v5997_v28 = vpop.eup %4871  ;;  %2770 = vadd.xlane.f32.xlu0 %v2769_v10 }
 0xf3a   :  { %v2772_v25 = vsel %vm359_vm2, %v5997_v28, 0.0 }
 0xf3b   :  { %v6001_v34 = vpop.eup %4873  ;;  %2773 = vadd.xlane.f32.xlu1 %v2772_v25  ;;  %v2217_v25 = vpack.c.bf16 %v4591_v56, %v4590_v49 }
 0xf3c   :  { %v2775_v29 = vsel %vm359_vm2, %v6001_v34, 0.0 }
 0xf3d   :  { %2776 = vadd.xlane.f32.xlu0 %v2775_v29 }
 0xf53   :  { %4598 = vrot.lane.b32.xlu0 %v5752_v44, %s4989_s19 }
 0xf61   :  { %v2735_v3 = vpop.xlane.xlu0 %2734 }
 0xf63   :  { %v2684_v32 = vpop.xlane.xlu1 %2683 }
 0xf64   :  { %v2700_v40 = vsub.f32 %v5928_v45, %v2684_v32 }
 0xf65   :  { %v2741_v42 = vpop.xlane.xlu0 %2740 }
 0xf66   :  { %v2731_v38 = vmul.f32 1.442695, %v2700_v40 }
 0xf67   :  { %v6016_v44 = vpop.permute.xlu1 %4593 }
 0xf68   :  { %4875 = vpow2.f32 %v2731_v38  ;;  %v4595_v32 = vunpack.i.l.bf16 %v6016_v44 }
 0xf69   :  { %4877 = vrcp.f32 %v2735_v3 }
 0xf72   :  { %v6010_v4 = vpop.eup %4875 }
 0xf73   :  { %v2778_v13 = vsel %vm359_vm2, %v6010_v4, 0.0  ;;  %v4878_v58 = vpop.eup %4877 }
 0xf74   :  { %2779 = vadd.xlane.f32.xlu1 %v2778_v13  ;;  %v2797_v15 = vmul.f32 %v4878_v58, %v5924_v12  ;;  %v2216_v12 = vpack.c.bf16 %v4586_v5, %v4585_v46 }
 0xf85   :  { %4603 = vrot.lane.b32.xlu1 %v5764_v62, %s4989_s19 }
 0xf98   :  { %v2738_v48 = vpop.xlane.xlu1 %2737 }
 0xf99   :  { %4879 = vrcp.f32 %v2738_v48 }
 0xf9a   :  { %4881 = vrcp.f32 %v2741_v42 }
 0xf9c   :  { %v2744_v45 = vpop.xlane.xlu1 %2743 }
 0xf9d   :  { %4883 = vrcp.f32 %v2744_v45 }
 0xfa3   :  { %v4880_v16 = vpop.eup %4879 }
 0xfa4   :  { %v2798_v27 = vmul.f32 %v4880_v16, %v5942_v37  ;;  %v4882_v62 = vpop.eup %4881 }
 0xfa5   :  { %v2799_v2 = vmul.f32 %v4882_v62, %v5932_v24 }
 0xfa6   :  { %v2813_v60 = vpack.c.bf16 %v2798_v27, %v2797_v15 }
 0xfa7   :  { %v4884_v20 = vpop.eup %4883 }
 0xfa8   :  { %v2800_v61 = vmul.f32 %v4884_v20, %v5946_v26  ;;  %4387 = vmatmul.mubr.msk.bf16.vlgmr.msra.gmra.mrb[56].mxu1 %vm359_vm2, %v2813_v60 }
 0xfa9   :  { %4397 = vmatpush3.bf16.msra.mxu1 %v2215_v50  ;;  %4398 = vmatprep.mubr.msk.bf16.mxu1 %vm4988_vm1, %v4986_v18 }
 0xfaa   :  { %v2814_v11 = vpack.c.bf16 %v2800_v61, %v2799_v2  ;;  %4408 = vmatprep.subr.bf16.mxu1 %v4986_v18 }
 0xfac   :  { %4393 = vmatmul.mubr.msk.bf16.vlgmr.msra.gmra.mrb[76].mxu0 %vm359_vm2, %v2814_v11 }
 0xfad   :  { %4403 = vmatpush3.bf16.msra.mxu0 %v2216_v12  ;;  %4404 = vmatprep.mubr.msk.bf16.mxu0 %vm4988_vm1, %v4986_v18 }
 0xfae   :  { %4414 = vmatprep.subr.bf16.mxu0 %v4986_v18 }
 0xfb2   :  { %v2747_v24 = vpop.xlane.xlu0 %2746 }
 0xfb3   :  { %4885 = vrcp.f32 %v2747_v24 }
 0xfb4   :  { %v2750_v37 = vpop.xlane.xlu1 %2749 }
 0xfb5   :  { %4887 = vrcp.f32 %v2750_v37 }
 0xfba   :  { %v2753_v26 = vpop.xlane.xlu0 %2752 }
 0xfbb   :  { %4889 = vrcp.f32 %v2753_v26 }
 0xfbc   :  { %v2756_v43 = vpop.xlane.xlu1 %2755 }
 0xfbd   :  { %v4886_v54 = vpop.eup %4885  ;;  %4891 = vrcp.f32 %v2756_v43 }
 0xfbe   :  { %v2759_v6 = vpop.xlane.xlu0 %2758  ;;  %v2801_v1 = vmul.f32 %v4886_v54, %v5955_v8 }
 0xfbf   :  { %v4888_v22 = vpop.eup %4887  ;;  %4893 = vrcp.f32 %v2759_v6 }
 0xfc0   :  { %v2802_v14 = vmul.f32 %v4888_v22, %v5960_v59  ;;  %v2762_v23 = vpop.xlane.xlu1 %2761  ;;  %v4596_v59 = vunpack.i.h.bf16 %v6016_v44 }
 0xfc1   :  { %4895 = vrcp.f32 %v2762_v23 }
 0xfc2   :  { %v2765_v51 = vpop.xlane.xlu0 %2764  ;;  %v2815_v10 = vpack.c.bf16 %v2802_v14, %v2801_v1  ;;  %v2218_v45 = vpack.c.bf16 %v4596_v59, %v4595_v32 }
 0xfc3   :  { %4897 = vrcp.f32 %v2765_v51 }
 0xfc4   :  { %v2768_v29 = vpop.xlane.xlu1 %2767  ;;  %4399 = vmatmul.mubr.msk.bf16.vlgmr.msra.gmra.mrb[60].mxu1 %vm359_vm2, %v2815_v10 }
 0xfc5   :  { %v4890_v30 = vpop.eup %4889  ;;  %4899 = vrcp.f32 %v2768_v29  ;;  %4409 = vmatpush3.bf16.msra.mxu1 %v2217_v25  ;;  %4410 = vmatprep.mubr.msk.bf16.mxu1 %vm4988_vm1, %v4986_v18 }
 0xfc6   :  { %v2771_v55 = vpop.xlane.xlu0 %2770  ;;  %4420 = vmatprep.subr.bf16.mxu1 %v4986_v18  ;;  %v2803_v40 = vmul.f32 %v4890_v30, %v5967_v19 }
 0xfc7   :  { %v4892_v8 = vpop.eup %4891  ;;  %4901 = vrcp.f32 %v2771_v55 }
 0xfc8   :  { %v2804_v38 = vmul.f32 %v4892_v8, %v5972_v36  ;;  %v2774_v13 = vpop.xlane.xlu1 %2773 }
 0xfc9   :  { %v4894_v17 = vpop.eup %4893  ;;  %4903 = vrcp.f32 %v2774_v13 }
 0xfca   :  { %v2777_v3 = vpop.xlane.xlu0 %2776  ;;  %v2816_v42 = vpack.c.bf16 %v2804_v38, %v2803_v40  ;;  %v2805_v58 = vmul.f32 %v4894_v17, %v5977_v21  ;;  %v4693_v17 = vld [vmem:[%s6275_s5 + $0x20] sm:$0xff]  }
 0xfcb   :  { %v4896_v48 = vpop.eup %4895  ;;  %4905 = vrcp.f32 %v2777_v3  ;;  %v4694_v3 = vld [vmem:[%s6275_s5 + $0x28] sm:$0xff]  }
 0xfcc   :  { %v2806_v16 = vmul.f32 %v4896_v48, %v5981_v31  ;;  %4405 = vmatmul.mubr.msk.bf16.vlgmr.msra.gmra.mrb[80].mxu0 %vm359_vm2, %v2816_v42 }
 0xfcd   :  { %v4898_v0 = vpop.eup %4897  ;;  %4415 = vmatpush3.bf16.msra.mxu0 %v2218_v45  ;;  %4416 = vmatprep.mubr.msk.bf16.mxu0 %vm4988_vm1, %v4986_v18 }
 0xfce   :  { %v4599_v19 = vpop.permute.xlu0 %4598  ;;  %v2817_v36 = vpack.c.bf16 %v2806_v16, %v2805_v58  ;;  %4426 = vmatprep.subr.bf16.mxu0 %v4986_v18  ;;  %v2807_v27 = vmul.f32 %v4898_v0, %v5985_v39  ;;  %v4695_v0 = vld [vmem:[%s6275_s5 + $0x30] sm:$0xff]  }
 0xfcf   :  { %v4900_v44 = vpop.eup %4899  ;;  %v4601_v35 = vunpack.i.h.bf16 %v4599_v19  ;;  %v4600_v15 = vunpack.i.l.bf16 %v4599_v19 }
 0xfd0   :  { %v2808_v21 = vmul.f32 %v4900_v44, %v5989_v57  ;;  %4411 = vmatmul.mubr.msk.bf16.vlgmr.msra.gmra.mrb[64].mxu1 %vm359_vm2, %v2817_v36 }
 0xfd1   :  { %v4902_v31 = vpop.eup %4901  ;;  %v2219_v62 = vpack.c.bf16 %v4601_v35, %v4600_v15  ;;  %4422 = vmatprep.mubr.msk.bf16.mxu1 %vm4988_vm1, %v4986_v18  ;;  %v4696_v35 = vld [vmem:[%s6275_s5 + $0x38] sm:$0xff]  }
 0xfd2   :  { %v2818_v60 = vpack.c.bf16 %v2808_v21, %v2807_v27  ;;  %v2809_v5 = vmul.f32 %v4902_v31, %v5993_v52 }
 0xfd3   :  { %v4904_v20 = vpop.eup %4903  ;;  %4421 = vmatpush3.bf16.msra.mxu1 %v2219_v62 }
 0xfd4   :  { %v2810_v46 = vmul.f32 %v4904_v20, %v5997_v28  ;;  %4417 = vmatmul.mubr.msk.bf16.vlgmr.msra.gmra.mrb[84].mxu0 %vm359_vm2, %v2818_v60  ;;  %4432 = vmatprep.subr.bf16.mxu1 %v4693_v17 }
 0xfd5   :  { %4428 = vmatprep.mubr.msk.bf16.mxu0 %vm4988_vm1, %v4986_v18  ;;  %v4906_v12 = vpop.eup %4905 }
 0xfd6   :  { %v2819_v39 = vpack.c.bf16 %v2810_v46, %v2809_v5  ;;  %v2811_v28 = vmul.f32 %v4906_v12, %v6001_v34 }
 0xfd8   :  { %4423 = vmatmul.mubr.msk.bf16.vlgmr.msra.gmra.mrb[68].mxu1 %vm359_vm2, %v2819_v39 }
 0xfd9   :  { %4433 = vmatpush3.bf16.msra.mxu1 %v4693_v17 }
 0xfda   :  { %4434 = vmatprep.subr.bf16.mxu1 %v4694_v3 }
 0xfdd   :  { %4435 = vmatpush3.bf16.msra.mxu1 %v4694_v3 }
 0xfde   :  { %4436 = vmatprep.subr.bf16.mxu1 %v4695_v0 }
 0xfe1   :  { %4437 = vmatpush3.bf16.msra.mxu1 %v4695_v0 }
 0xfe2   :  { %4438 = vmatprep.subr.bf16.mxu1 %v4696_v35 }
 0xfe5   :  { %4439 = vmatpush3.bf16.msra.mxu1 %v4696_v35 }
0x1001   :  { %v2780_v57 = vpop.xlane.xlu1 %2779 }
0x1002   :  { %4907 = vrcp.f32 %v2780_v57 }
0x1005   :  { %v4604_v50 = vpop.permute.xlu1 %4603 }
0x1006   :  { %v4606_v2 = vunpack.i.h.bf16 %v4604_v50  ;;  %v4605_v61 = vunpack.i.l.bf16 %v4604_v50 }
0x1008   :  { %v2220_v11 = vpack.c.bf16 %v4606_v2, %v4605_v61 }
0x100a   :  { %4427 = vmatpush3.bf16.msra.mxu0 %v2220_v11 }
0x100c   :  { %v4908_v52 = vpop.eup %4907 }
0x100d   :  { %v2812_v24 = vmul.f32 %v4908_v52, %v6010_v4 }
0x100f   :  { %v2820_v37 = vpack.c.bf16 %v2812_v24, %v2811_v28 }
0x1011   :  { %4429 = vmatmul.mubr.msk.bf16.vlgmr.msra.gmra.mrb[88].mxu0 %vm359_vm2, %v2820_v37 }
0x1012   :  { %3513 = vmatprep.mubr.bf16.mxu0 %v4985_v33 }
0x107b   :  { %v6063_v18 = vpop.f32.mrb[56].mxu1 }
0x107c   :  { %v4388_v26 = vpop.f32.mrb[57].mxu1 }
0x107d   :  { %v2861_v43 = vpop.f32.mrb[58].mxu1 }
0x107e   :  { %v4389_v54 = vpop.f32.mrb[59].mxu1 }
0x107f   :  { %v6065_v6 = vpop.f32.mrb[76].mxu0 }
0x1080   :  { %v4394_v22 = vpop.f32.mrb[77].mxu0 }
0x1081   :  { %v6067_v56 = vpop.f32.mrb[78].mxu0 }
0x1082   :  { %v4395_v49 = vpop.f32.mrb[79].mxu0 }
0x1097   :  { %v2946_v1 = vpop.f32.mrb[60].mxu1 }
0x1098   :  { %v4400_v34 = vpop.f32.mrb[61].mxu1 }
0x1099   :  { %v2949_v14 = vpop.f32.mrb[62].mxu1 }
0x109a   :  { %v4607_v4 = vpack.i.bf16 %v2949_v14, %v2946_v1  ;;  %v4401_v23 = vpop.f32.mrb[63].mxu1 }
0x109c   :  { %4608 = vrot.lane.b32.xlu0 %v4607_v4, %s4992_s22 }
0x109f   :  { %v2990_v51 = vpop.f32.mrb[80].mxu0 }
0x10a0   :  { %v4406_v10 = vpop.f32.mrb[81].mxu0 }
0x10a1   :  { %v2993_v25 = vpop.f32.mrb[82].mxu0 }
0x10a2   :  { %v4612_v29 = vpack.i.bf16 %v2993_v25, %v2990_v51  ;;  %v4407_v30 = vpop.f32.mrb[83].mxu0 }
0x10a3   :  { %v3034_v55 = vpop.f32.mrb[64].mxu1 }
0x10a4   :  { %4613 = vrot.lane.b32.xlu1 %v4612_v29, %s4992_s22  ;;  %v4412_v8 = vpop.f32.mrb[65].mxu1 }
0x10a5   :  { %v3037_v59 = vpop.f32.mrb[66].mxu1 }
0x10a6   :  { %v4617_v32 = vpack.i.bf16 %v3037_v59, %v3034_v55  ;;  %v4413_v40 = vpop.f32.mrb[67].mxu1 }
0x10a7   :  { %v3078_v38 = vpop.f32.mrb[84].mxu0 }
0x10a8   :  { %v4418_v13 = vpop.f32.mrb[85].mxu0  ;;  %4618 = vrot.lane.b32.xlu0 %v4617_v32, %s4993_s23 }
0x10a9   :  { %v3081_v42 = vpop.f32.mrb[86].mxu0 }
0x10aa   :  { %v4622_v48 = vpack.i.bf16 %v3081_v42, %v3078_v38  ;;  %v4419_v45 = vpop.f32.mrb[87].mxu0 }
0x10ab   :  { %v3122_v58 = vpop.f32.mrb[68].mxu1 }
0x10ac   :  { %4623 = vrot.lane.b32.xlu1 %v4622_v48, %s4993_s23  ;;  %v4424_v16 = vpop.f32.mrb[69].mxu1 }
0x10ad   :  { %v3125_v19 = vpop.f32.mrb[70].mxu1 }
0x10ae   :  { %v4627_v36 = vpack.i.bf16 %v3125_v19, %v3122_v58  ;;  %v4425_v44 = vpop.f32.mrb[71].mxu1 }
0x10b0   :  { %4628 = vrot.lane.b32.xlu0 %v4627_v36, %s6292_s16 }
0x10e4   :  { %v3166_v15 = vpop.f32.mrb[88].mxu0 }
0x10e5   :  { %v4430_v27 = vpop.f32.mrb[89].mxu0 }
0x10e6   :  { %v3169_v21 = vpop.f32.mrb[90].mxu0 }
0x10e7   :  { %v4632_v31 = vpack.i.bf16 %v3169_v21, %v3166_v15  ;;  %v4431_v62 = vpop.f32.mrb[91].mxu0 }
0x10e9   :  { %4633 = vrot.lane.b32.xlu1 %v4632_v31, %s6292_s16 }
0x110e   :  { %v4609_v60 = vpop.permute.xlu0 %4608 }
0x110f   :  { %v4611_v5 = vunpack.i.h.bf16 %v4609_v60  ;;  %v4610_v46 = vunpack.i.l.bf16 %v4609_v60 }
0x1111   :  { %v3222_v2 = vsel %vm359_vm2, %v2861_v43, %v4611_v5  ;;  %v3221_v61 = vsel %vm359_vm2, %v6063_v18, %v4610_v46 }
0x1116   :  { %v4614_v54 = vpop.permute.xlu1 %4613 }
0x1117   :  { %v4616_v49 = vunpack.i.h.bf16 %v4614_v54  ;;  %v4615_v43 = vunpack.i.l.bf16 %v4614_v54 }
0x1119   :  { %v3224_v14 = vsel %vm359_vm2, %v6067_v56, %v4616_v49  ;;  %v3223_v4 = vsel %vm359_vm2, %v6065_v6, %v4615_v43  ;;  %v4006_v56 = vld [vmem:[%s6276_s6 + $0x1] ss:$0 sm:$0xff] }
0x111a   :  { %v4619_v20 = vpop.permute.xlu0 %4618 }
0x111b   :  { %v4621_v39 = vunpack.i.h.bf16 %v4619_v20  ;;  %v4620_v57 = vunpack.i.l.bf16 %v4619_v20 }
0x111d   :  { %v3226_v52 = vsel %vm1365_vm5, %v3222_v2, %v4621_v39  ;;  %v3225_v28 = vsel %vm1365_vm5, %v3221_v61, %v4620_v57  ;;  %v4699_v61 = vld [vmem:[%s6279_s9 + $0x44] ss:$8 sps:$4 sm:$0xff]  }
0x111e   :  { %v4624_v22 = vpop.permute.xlu1 %4623  ;;  %3481 = vmatprep.subr.bf16.mxu0 %v4699_v61 }
0x111f   :  { %v4626_v1 = vunpack.i.h.bf16 %v4624_v22  ;;  %v4625_v34 = vunpack.i.l.bf16 %v4624_v22 }
0x1121   :  { %v3228_v10 = vsel %vm1365_vm5, %v3224_v14, %v4626_v1  ;;  %v3227_v25 = vsel %vm1365_vm5, %v3223_v4, %v4625_v34 }
0x1122   :  { %v4629_v50 = vpop.permute.xlu0 %4628 }
0x1123   :  { %v4631_v11 = vunpack.i.h.bf16 %v4629_v50  ;;  %v4630_v12 = vunpack.i.l.bf16 %v4629_v50 }
0x1125   :  { %v3230_v24 = vsel %vm1370_vm6, %v3226_v52, %v4631_v11  ;;  %v3229_v37 = vsel %vm1370_vm6, %v3225_v28, %v4630_v12  ;;  %v4697_v11 = vld [vmem:[%s6279_s9 + $0x40] ss:$8 sps:$4 sm:$0xff]   ;;  %v4702_v12 = vld [vmem:[%s6279_s9 + $0x54] ss:$8 sps:$4 sm:$0xff]   ;;  %v4700_v52 = vld [vmem:[%s6279_s9 + $0x50] ss:$8 sps:$4 sm:$0xff]  }
0x1126   :  { %v3233_v26 = vpack.c.bf16 %v3230_v24, %v3229_v37  ;;  %3482 = vmatpush1.bf16.msra.mxu0 %v4697_v11  ;;  %v4705_v28 = vld [vmem:[%s6279_s9 + $0x64] ss:$8 sps:$4 sm:$0xff]   ;;  %v4703_v24 = vld [vmem:[%s6279_s9 + $0x60] ss:$8 sps:$4 sm:$0xff]   ;;  %v4708_v37 = vld [vmem:[%s6279_s9 + $0x74] ss:$8 sps:$4 sm:$0xff]  }
0x1127   :  { %3483 = vmatprep.subr.bf16.mxu0 %v4702_v12 }
0x1128   :  { %4440 = vmatprep.mubr.msk.bf16.mxu1 %vm65_vm0, %v3233_v26  ;;  %v4706_v26 = vld [vmem:[%s6279_s9 + $0x70] ss:$8 sps:$4 sm:$0xff]  }
0x112a   :  { %3484 = vmatpush1.bf16.msra.mxu0 %v4700_v52 }
0x112b   :  { %3485 = vmatprep.subr.bf16.mxu0 %v4705_v28 }
0x112e   :  { %3486 = vmatpush1.bf16.msra.mxu0 %v4703_v24 }
0x112f   :  { %3487 = vmatprep.subr.bf16.mxu0 %v4708_v37 }
0x1132   :  { %3488 = vmatpush1.bf16.msra.mxu0 %v4706_v26 }
0x115b   :  { %v4634_v18 = vpop.permute.xlu1 %4633 }
0x115c   :  { %v4636_v23 = vunpack.i.h.bf16 %v4634_v18  ;;  %v4635_v51 = vunpack.i.l.bf16 %v4634_v18 }
0x115e   :  { %v3232_v29 = vsel %vm1370_vm6, %v3228_v10, %v4636_v23  ;;  %v3231_v30 = vsel %vm1370_vm6, %v3227_v25, %v4635_v51 }
0x115f   :  { %v3234_v55 = vpack.c.bf16 %v3232_v29, %v3231_v30  ;;  %v4015_v29 = vld [vmem:[%s6277_s7 + $0x1] ss:$0 sm:$0xff] }
0x1161   :  { %4441 = vmatmul.mubr.msk.bf16.vlgmr.msra.gmra.mrb[72].mxu1 %vm65_vm0, %v3234_v55 }
0x1234   :  { %v4442_v8 = vpop.f32.mrb[72].mxu1 }
0x1235   :  { %v3316_v59 = vpop.f32.mrb[73].mxu1  ;;  %v3325_v6 = vadd.f32 %v4442_v8, %v4006_v56 }
0x1236   :  { %v3317_v32 = vadd.f32 %v4006_v56, %v3316_v59  ;;  %v4443_v40 = vpop.f32.mrb[74].mxu1 }
0x1237   :  { %v3319_v38 = vpop.f32.mrb[75].mxu1  ;;  %v6111_v3 = vadd.f32 %v3325_v6, %v5686_v47  ;;  %v3328_v42 = vadd.f32 %v4443_v40, %v4006_v56  ;;  %v4016_v6 = vld [vmem:[%s6278_s8 + $0x1] ss:$0 sm:$0xff] }
0x1238   :  { %v6108_v13 = vadd.f32 %v3317_v32, %v5676_v63  ;;  %v3320_v17 = vadd.f32 %v4006_v56, %v3319_v38 }
0x1239   :  { %v6121_v16 = vadd.f32 %v3328_v42, %v5689_v53  ;;  %v3345_v63 = vsel %vm65_vm0, %v6111_v3, 0.0 }
0x123a   :  { %v6114_v48 = vadd.f32 %v3320_v17, %v5679_v41  ;;  %v3339_v45 = vsel %vm65_vm0, %v6108_v13, 0.0 }
0x123b   :  { %3340 = vadd.xlane.f32.xlu0 %v3339_v45  ;;  %v3348_v47 = vsel %vm65_vm0, %v6121_v16, 0.0 }
0x123c   :  { %v3342_v58 = vsel %vm65_vm0, %v6114_v48, 0.0 }
0x123d   :  { %3343 = vadd.xlane.f32.xlu1 %v3342_v58 }
0x123f   :  { %3346 = vadd.xlane.f32.xlu0 %v3345_v63 }
0x1243   :  { %3349 = vadd.xlane.f32.xlu0 %v3348_v47 }
0x12c8   :  { %v3341_v41 = vpop.xlane.xlu0 %3340 }
0x12c9   :  { %v3351_v0 = vmul.f32 0.015625, %v3341_v41 }
0x12ca   :  { %v3344_v19 = vpop.xlane.xlu1 %3343 }
0x12cb   :  { %v3355_v36 = vsub.f32 %v6108_v13, %v3351_v0  ;;  %v3352_v44 = vmul.f32 0.015625, %v3344_v19 }
0x12cc   :  { %v3347_v35 = vpop.xlane.xlu0 %3346 }
0x12cd   :  { %v3356_v15 = vsub.f32 %v6114_v48, %v3352_v44  ;;  %v3353_v27 = vmul.f32 0.015625, %v3347_v35  ;;  %v3359_v53 = vmul.f32 %v3355_v36, %v3355_v36  ;;  %v4710_v44 = vld [vmem:[%s6281_s11 + $0x80] sm:$0xff]   ;;  %v4711_v35 = vld [vmem:[%s6281_s11 + $0xc8] sm:$0xff]  }
0x12cf   :  { %v3357_v21 = vsub.f32 %v6111_v3, %v3353_v27  ;;  %v3363_v31 = vsel %vm65_vm0, %v3359_v53, 0.0  ;;  %v3360_v62 = vmul.f32 %v3356_v15, %v3356_v15  ;;  %v4714_v27 = vld [vmem:[%s6281_s11 + $0x90] sm:$0xff]   ;;  %v4715_v53 = vld [vmem:[%s6281_s11 + $0xd8] sm:$0xff]  }
0x12d0   :  { %3364 = vadd.xlane.f32.xlu0 %v3363_v31  ;;  %v3350_v60 = vpop.xlane.xlu0 %3349  ;;  %v4717_v31 = vld [vmem:[%s6281_s11 + $0xe0] sm:$0xff]  }
0x12d1   :  { %v3354_v20 = vmul.f32 0.015625, %v3350_v60  ;;  %v3366_v5 = vsel %vm65_vm0, %v3360_v62, 0.0  ;;  %v3361_v46 = vmul.f32 %v3357_v21, %v3357_v21  ;;  %v4718_v62 = vld [vmem:[%s6281_s11 + $0xa0] sm:$0xff]   ;;  %v4719_v60 = vld [vmem:[%s6281_s11 + $0xe8] sm:$0xff]  }
0x12d2   :  { %3367 = vadd.xlane.f32.xlu1 %v3366_v5  ;;  %v4721_v5 = vld [vmem:[%s6281_s11 + $0xf0] sm:$0xff]  }
0x12d3   :  { %v3358_v39 = vsub.f32 %v6121_v16, %v3354_v20  ;;  %v3369_v57 = vsel %vm65_vm0, %v3361_v46, 0.0  ;;  %v4720_v20 = vld [vmem:[%s6281_s11 + $0xa8] sm:$0xff]   ;;  %v4722_v46 = vld [vmem:[%s6281_s11 + $0xb0] sm:$0xff]  }
0x12d4   :  { %3370 = vadd.xlane.f32.xlu0 %v3369_v57  ;;  %v4724_v57 = vld [vmem:[%s6281_s11 + $0xb8] sm:$0xff]  }
0x12d5   :  { %v3362_v50 = vmul.f32 %v3358_v39, %v3358_v39 }
0x12d7   :  { %v3372_v2 = vsel %vm65_vm0, %v3362_v50, 0.0  ;;  %v4025_v50 = vld [vmem:[%s6280_s10 + $0x2] sm:$0x3] }
0x12d8   :  { %3373 = vadd.xlane.f32.xlu1 %v3372_v2  ;;  %v3428_v2 = vrot.slane %v4025_v50, %v5141_v7  ;;  %v3432_v61 = vrot.slane %v4025_v50, %v5147_v9 }
0x135d   :  { %v3365_v54 = vpop.xlane.xlu0 %3364 }
0x135e   :  { %v3375_v22 = vmul.f32 0.015625, %v3365_v54 }
0x135f   :  { %v3368_v49 = vpop.xlane.xlu1 %3367 }
0x1360   :  { %v3379_v43 = vadd.f32 1e-05, %v3375_v22  ;;  %v3376_v1 = vmul.f32 0.015625, %v3368_v49 }
0x1361   :  { %v3371_v34 = vpop.xlane.xlu0 %3370 }
0x1362   :  { %4909 = vrsqrt.f32 %v3379_v43  ;;  %v3380_v18 = vadd.f32 1e-05, %v3376_v1  ;;  %v3377_v14 = vmul.f32 0.015625, %v3371_v34 }
0x1364   :  { %4911 = vrsqrt.f32 %v3380_v18  ;;  %v3381_v4 = vadd.f32 1e-05, %v3377_v14 }
0x1365   :  { %v3374_v23 = vpop.xlane.xlu1 %3373 }
0x1366   :  { %4913 = vrsqrt.f32 %v3381_v4  ;;  %v3378_v51 = vmul.f32 0.015625, %v3374_v23 }
0x1368   :  { %v3382_v10 = vadd.f32 1e-05, %v3378_v51 }
0x136a   :  { %4915 = vrsqrt.f32 %v3382_v10 }
0x136c   :  { %v4910_v25 = vpop.eup %4909 }
0x136d   :  { %v3387_v30 = vmul.f32 %v4910_v25, %v3355_v36  ;;  %v4709_v36 = vld [vmem:[%s6281_s11 + $0xc0] sm:$0xff]  }
0x136e   :  { %v4912_v55 = vpop.eup %4911  ;;  %4200 = vmatprep.subr.bf16.mxu1 %v4709_v36 }
0x136f   :  { %v3397_v56 = vmul.f32 %v4015_v29, %v3387_v30  ;;  %v3388_v8 = vmul.f32 %v4912_v55, %v3356_v15  ;;  %4201 = vmatpush3.bf16.msra.mxu1 %v4710_v44  ;;  %v4713_v15 = vld [vmem:[%s6281_s11 + $0xd0] sm:$0xff]  }
0x1370   :  { %v4914_v59 = vpop.eup %4913  ;;  %4202 = vmatprep.subr.bf16.mxu1 %v4711_v35 }
0x1371   :  { %v3398_v32 = vmul.f32 %v4015_v29, %v3388_v8  ;;  %v3389_v40 = vmul.f32 %v4914_v59, %v3357_v21  ;;  %v3407_v38 = vadd.f32 %v4016_v6, %v3397_v56  ;;  %v4716_v21 = vld [vmem:[%s6281_s11 + $0x98] sm:$0xff]  }
0x1373   :  { %v3408_v17 = vadd.f32 %v4016_v6, %v3398_v32  ;;  %v3399_v63 = vmul.f32 %v4015_v29, %v3389_v40 }
0x1374   :  { %v4916_v42 = vpop.eup %4915 }
0x1375   :  { %v3390_v45 = vmul.f32 %v4916_v42, %v3358_v39  ;;  %v3411_v58 = vpack.c.bf16 %v3408_v17, %v3407_v38  ;;  %v3409_v0 = vadd.f32 %v4016_v6, %v3399_v63  ;;  %v4723_v39 = vld [vmem:[%s6281_s11 + $0xf8] sm:$0xff]  }
0x1377   :  { %4034 = vmatmul.mubr.msk.bf16.vlgmr.msra.gmra.mrb[92].mxu0 %vm65_vm0, %v3411_v58  ;;  %v3400_v47 = vmul.f32 %v4015_v29, %v3390_v45 }
0x1378   :  { %3523 = vmatprep.mubr.bf16.mxu0 %v4985_v33  ;;  %v4712_v33 = vld [vmem:[%s6281_s11 + $0x88] sm:$0xff]  }
0x1379   :  { %v3410_v41 = vadd.f32 %v4016_v6, %v3400_v47  ;;  %4203 = vmatpush3.bf16.msra.mxu1 %v4712_v33 }
0x137a   :  { %4204 = vmatprep.subr.bf16.mxu1 %v4713_v15 }
0x137b   :  { %v3412_v19 = vpack.c.bf16 %v3410_v41, %v3409_v0 }
0x137d   :  { %4205 = vmatpush3.bf16.msra.mxu1 %v4714_v27 }
0x137e   :  { %4206 = vmatprep.subr.bf16.mxu1 %v4715_v53 }
0x137f   :  { %4035 = vmatmul.mubr.msk.bf16.gmra.mrb[96].mxu0 %vm65_vm0, %v3412_v19 }
0x1381   :  { %4207 = vmatpush3.bf16.msra.mxu1 %v4716_v21 }
0x1382   :  { %4208 = vmatprep.subr.bf16.mxu1 %v4717_v31 }
0x1385   :  { %4209 = vmatpush3.bf16.msra.mxu1 %v4718_v62 }
0x1386   :  { %4210 = vmatprep.subr.bf16.mxu1 %v4719_v60 }
0x1389   :  { %4211 = vmatpush3.bf16.msra.mxu1 %v4720_v20 }
0x138a   :  { %4212 = vmatprep.subr.bf16.mxu1 %v4721_v5 }
0x138d   :  { %4213 = vmatpush3.bf16.msra.mxu1 %v4722_v46 }
0x138e   :  { %4214 = vmatprep.subr.bf16.mxu1 %v4723_v39 }
0x1391   :  { %4215 = vmatpush3.bf16.msra.mxu1 %v4724_v57 }
0x144a   :  { %v3515_v11 = vpop.f32.mrb[92].mxu0 }
0x144b   :  { %v6221_v12 = vadd.f32 %v3515_v11, %v3428_v2  ;;  %v3517_v52 = vpop.f32.mrb[93].mxu0 }
0x144c   :  { %v6223_v28 = vadd.f32 %v3517_v52, %v3432_v61  ;;  %v3519_v24 = vpop.f32.mrb[94].mxu0 }
0x144d   :  { %v4036_v37 = vmul.f32 -1.702, %v6221_v12  ;;  %v6226_v26 = vadd.f32 %v3519_v24, %v3428_v2  ;;  %v3521_v54 = vpop.f32.mrb[95].mxu0 }
0x144e   :  { %v4037_v22 = vmul.f32 -1.702, %v6223_v28  ;;  %v3522_v49 = vadd.f32 %v3521_v54, %v3432_v61 }
0x144f   :  { %v3550_v43 = vmul.f32 1.442695, %v4036_v37  ;;  %v4038_v7 = vmul.f32 -1.702, %v6226_v26 }
0x1450   :  { %v3552_v1 = vmul.f32 1.442695, %v4037_v22  ;;  %v4039_v9 = vmul.f32 -1.702, %v3522_v49 }
0x1451   :  { %4917 = vpow2.f32 %v3550_v43  ;;  %v3554_v34 = vmul.f32 1.442695, %v4038_v7 }
0x1452   :  { %4919 = vpow2.f32 %v3552_v1  ;;  %v3556_v18 = vmul.f32 1.442695, %v4039_v9  ;;  %v3525_v14 = vpop.f32.mrb[96].mxu0 }
0x1453   :  { %4921 = vpow2.f32 %v3554_v34  ;;  %v3526_v4 = vadd.f32 %v3525_v14, %v3428_v2  ;;  %v3527_v23 = vpop.f32.mrb[97].mxu0 }
0x1454   :  { %4923 = vpow2.f32 %v3556_v18  ;;  %v3528_v51 = vadd.f32 %v3527_v23, %v3432_v61  ;;  %v3529_v10 = vpop.f32.mrb[98].mxu0 }
0x1455   :  { %v4040_v25 = vmul.f32 -1.702, %v3526_v4  ;;  %v3530_v29 = vadd.f32 %v3529_v10, %v3428_v2  ;;  %v3531_v30 = vpop.f32.mrb[99].mxu0 }
0x1456   :  { %v4041_v55 = vmul.f32 -1.702, %v3528_v51  ;;  %v3532_v56 = vadd.f32 %v3531_v30, %v3432_v61 }
0x1457   :  { %v3558_v8 = vmul.f32 1.442695, %v4040_v25  ;;  %v4042_v59 = vmul.f32 -1.702, %v3530_v29 }
0x1458   :  { %v3560_v6 = vmul.f32 1.442695, %v4041_v55  ;;  %v4043_v32 = vmul.f32 -1.702, %v3532_v56 }
0x1459   :  { %4925 = vpow2.f32 %v3558_v8  ;;  %v3562_v40 = vmul.f32 1.442695, %v4042_v59 }
0x145a   :  { %4927 = vpow2.f32 %v3560_v6  ;;  %v3564_v38 = vmul.f32 1.442695, %v4043_v32 }
0x145b   :  { %v4918_v17 = vpop.eup %4917  ;;  %4929 = vpow2.f32 %v3562_v40 }
0x145c   :  { %v4920_v42 = vpop.eup %4919  ;;  %v3566_v45 = vadd.f32 1.0, %v4918_v17  ;;  %4931 = vpow2.f32 %v3564_v38 }
0x145d   :  { %v4922_v58 = vpop.eup %4921  ;;  %v3567_v63 = vadd.f32 1.0, %v4920_v42 }
0x145e   :  { %v4924_v47 = vpop.eup %4923  ;;  %4933 = vrcp.f32 %v3566_v45  ;;  %v3568_v41 = vadd.f32 1.0, %v4922_v58 }
0x145f   :  { %4935 = vrcp.f32 %v3567_v63  ;;  %v3569_v0 = vadd.f32 1.0, %v4924_v47 }
0x1460   :  { %4937 = vrcp.f32 %v3568_v41 }
0x1461   :  { %4939 = vrcp.f32 %v3569_v0 }
0x1463   :  { %v4926_v19 = vpop.eup %4925 }
0x1464   :  { %v4928_v36 = vpop.eup %4927  ;;  %v3570_v44 = vadd.f32 1.0, %v4926_v19 }
0x1465   :  { %v4930_v35 = vpop.eup %4929  ;;  %v3571_v33 = vadd.f32 1.0, %v4928_v36 }
0x1466   :  { %v4932_v15 = vpop.eup %4931  ;;  %4941 = vrcp.f32 %v3570_v44  ;;  %v3572_v27 = vadd.f32 1.0, %v4930_v35 }
0x1467   :  { %4943 = vrcp.f32 %v3571_v33  ;;  %v3573_v53 = vadd.f32 1.0, %v4932_v15 }
0x1468   :  { %v4934_v21 = vpop.eup %4933  ;;  %4945 = vrcp.f32 %v3572_v27 }
0x1469   :  { %v4936_v31 = vpop.eup %4935  ;;  %4947 = vrcp.f32 %v3573_v53  ;;  %v3590_v20 = vmul.f32 %v4934_v21, %v6221_v12 }
0x146a   :  { %v4938_v62 = vpop.eup %4937  ;;  %v3591_v46 = vmul.f32 %v4936_v31, %v6223_v28  ;;  %v4077_v28 = vld [vmem:[%s6282_s12 + $0x1] ss:$0 sm:$0xff] }
0x146b   :  { %v4940_v60 = vpop.eup %4939  ;;  %v3592_v5 = vmul.f32 %v4938_v62, %v6226_v26 }
0x146c   :  { %v3593_v39 = vmul.f32 %v4940_v60, %v3522_v49 }
0x146d   :  { %v3598_v57 = vpack.c.bf16 %v3592_v5, %v3590_v20 }
0x146e   :  { %v3599_v50 = vpack.c.bf16 %v3593_v39, %v3591_v46 }
0x1470   :  { %v4942_v2 = vpop.eup %4941  ;;  %3771 = vmatprep.mubr.bf16.mxu1 %v3599_v50 }
0x1471   :  { %v4944_v61 = vpop.eup %4943  ;;  %3772 = vmatmul.mubr.bf16.vlgmr.msra.gmra.mrb[76].mxu1 %v3598_v57  ;;  %v3594_v24 = vmul.f32 %v4942_v2, %v3526_v4 }
0x1472   :  { %v4946_v11 = vpop.eup %4945  ;;  %v3595_v54 = vmul.f32 %v4944_v61, %v3528_v51 }
0x1473   :  { %v4948_v52 = vpop.eup %4947  ;;  %v3596_v37 = vmul.f32 %v4946_v11, %v3530_v29 }
0x1474   :  { %v3597_v22 = vmul.f32 %v4948_v52, %v3532_v56 }
0x1475   :  { %v3600_v43 = vpack.c.bf16 %v3596_v37, %v3594_v24  ;;  %v4094_v24 = vld [vmem:[%s6283_s13] ss:$0 sm:$0xff]  ;;  %s4995_s13 = smov [#allocation2]  }
0x1476   :  { %v3601_v7 = vpack.c.bf16 %v3597_v22, %v3595_v54  ;;  %v4095_v22 = vld [vmem:[%s6284_s14] ss:$0 sm:$0xff]  ;;  %s3875_s28 = sshll.u32 %s4995_s13, 4  ;;  %s3876_s28 = int_to_ptr.vmem [resolvable:$true] %s3875_s28 }
0x1477   :  { %s4961_s14 = scalar_lea.vmem %s3876_s28, 512  ;;  %p4966_p1 = scmp.lt.s32.totalorder %s3876_s28, %s3876_s28 }
0x1478   :  { %3779 = vmatprep.mubr.bf16.mxu1 %v3601_v7  ;;  %p4962_p0 = scmp.ne.s32.totalorder %s3876_s28, %s4961_s14  ;;  %p4967_p2 = scmp.lt.s32.totalorder %s4961_s14, %s4961_s14 }
0x1479   :  { %3780 = vmatmul.mubr.bf16.gmra.mrb[80].mxu1 %v3600_v43 }
0x147a   :  { %p4968_p3 = por %p4967_p2, %p4966_p1 }
0x147c   :  { %p4969_p4 = pnand %p4968_p3, %p4962_p0 }
0x1544   :  { %v4216_v12 = vpop.f32.mrb[76].mxu1 }
0x1545   :  { %v4217_v26 = vpop.f32.mrb[77].mxu1 }
0x1546   :  { %v4218_v49 = vadd.f32 %v4217_v26, %v4216_v12  ;;  %v4219_v1 = vpop.f32.mrb[78].mxu1 }
0x1547   :  { %v4220_v9 = vpop.f32.mrb[79].mxu1 }
0x1548   :  { %v3774_v34 = vadd.f32 %v4218_v49, %v4077_v28  ;;  %v4221_v18 = vadd.f32 %v4220_v9, %v4219_v1 }
0x154a   :  { %v3777_v14 = vadd.f32 %v4221_v18, %v4077_v28  ;;  %v3788_v4 = vadd.f32 %v3774_v34, %v6108_v13 }
0x154c   :  { %v4222_v23 = vpop.f32.mrb[80].mxu1  ;;  %v3794_v51 = vsel %vm65_vm0, %v3788_v4, 0.0  ;;  %v3789_v10 = vadd.f32 %v3777_v14, %v6114_v48 }
0x154d   :  { %3795 = vadd.xlane.f32.xlu0 %v3794_v51  ;;  %v4223_v25 = vpop.f32.mrb[81].mxu1 }
0x154e   :  { %v4224_v29 = vadd.f32 %v4223_v25, %v4222_v23  ;;  %v4225_v30 = vpop.f32.mrb[82].mxu1  ;;  %v3797_v55 = vsel %vm65_vm0, %v3789_v10, 0.0 }
0x154f   :  { %3798 = vadd.xlane.f32.xlu1 %v3797_v55  ;;  %v4226_v56 = vpop.f32.mrb[83].mxu1 }
0x1550   :  { %v3782_v8 = vadd.f32 %v4224_v29, %v4077_v28  ;;  %v4227_v59 = vadd.f32 %v4226_v56, %v4225_v30 }
0x1552   :  { %v3785_v6 = vadd.f32 %v4227_v59, %v4077_v28  ;;  %v3790_v32 = vadd.f32 %v3782_v8, %v6111_v3 }
0x1554   :  { %v3800_v13 = vsel %vm65_vm0, %v3790_v32, 0.0  ;;  %v3791_v40 = vadd.f32 %v3785_v6, %v6121_v16 }
0x1555   :  { %3801 = vadd.xlane.f32.xlu0 %v3800_v13 }
0x1556   :  { %v3803_v48 = vsel %vm65_vm0, %v3791_v40, 0.0 }
0x1557   :  { %3804 = vadd.xlane.f32.xlu1 %v3803_v48 }
0x15da   :  { %v3796_v38 = vpop.xlane.xlu0 %3795 }
0x15db   :  { %v3806_v17 = vmul.f32 0.015625, %v3796_v38 }
0x15dc   :  { %v3799_v42 = vpop.xlane.xlu1 %3798 }
0x15dd   :  { %v3810_v45 = vsub.f32 %v3788_v4, %v3806_v17  ;;  %v3807_v58 = vmul.f32 0.015625, %v3799_v42 }
0x15df   :  { %v3811_v63 = vsub.f32 %v3789_v10, %v3807_v58  ;;  %v3814_v47 = vmul.f32 %v3810_v45, %v3810_v45 }
0x15e1   :  { %v3818_v41 = vsel %vm65_vm0, %v3814_v47, 0.0  ;;  %v3815_v0 = vmul.f32 %v3811_v63, %v3811_v63 }
0x15e2   :  { %3819 = vadd.xlane.f32.xlu0 %v3818_v41  ;;  %v3802_v3 = vpop.xlane.xlu0 %3801 }
0x15e3   :  { %v3808_v19 = vmul.f32 0.015625, %v3802_v3  ;;  %v3821_v36 = vsel %vm65_vm0, %v3815_v0, 0.0 }
0x15e4   :  { %3822 = vadd.xlane.f32.xlu1 %v3821_v36  ;;  %v3805_v16 = vpop.xlane.xlu1 %3804 }
0x15e5   :  { %v3812_v44 = vsub.f32 %v3790_v32, %v3808_v19  ;;  %v3809_v35 = vmul.f32 0.015625, %v3805_v16 }
0x15e7   :  { %v3813_v33 = vsub.f32 %v3791_v40, %v3809_v35  ;;  %v3816_v15 = vmul.f32 %v3812_v44, %v3812_v44 }
0x15e9   :  { %v3824_v27 = vsel %vm65_vm0, %v3816_v15, 0.0  ;;  %v3817_v53 = vmul.f32 %v3813_v33, %v3813_v33 }
0x15ea   :  { %3825 = vadd.xlane.f32.xlu0 %v3824_v27 }
0x15eb   :  { %v3827_v21 = vsel %vm65_vm0, %v3817_v53, 0.0 }
0x15ec   :  { %3828 = vadd.xlane.f32.xlu1 %v3827_v21 }
0x166f   :  { %v3820_v31 = vpop.xlane.xlu0 %3819 }
0x1670   :  { %v3830_v62 = vmul.f32 0.015625, %v3820_v31 }
0x1671   :  { %v3823_v60 = vpop.xlane.xlu1 %3822 }
0x1672   :  { %v3834_v20 = vadd.f32 1e-05, %v3830_v62  ;;  %v3831_v5 = vmul.f32 0.015625, %v3823_v60 }
0x1674   :  { %4949 = vrsqrt.f32 %v3834_v20  ;;  %v3835_v46 = vadd.f32 1e-05, %v3831_v5 }
0x1676   :  { %4951 = vrsqrt.f32 %v3835_v46 }
0x1677   :  { %v3826_v39 = vpop.xlane.xlu0 %3825 }
0x1678   :  { %v3832_v57 = vmul.f32 0.015625, %v3826_v39 }
0x1679   :  { %v3829_v50 = vpop.xlane.xlu1 %3828 }
0x167a   :  { %v3836_v2 = vadd.f32 1e-05, %v3832_v57  ;;  %v3833_v61 = vmul.f32 0.015625, %v3829_v50 }
0x167c   :  { %4953 = vrsqrt.f32 %v3836_v2  ;;  %v3837_v11 = vadd.f32 1e-05, %v3833_v61 }
0x167e   :  { %v4950_v52 = vpop.eup %4949  ;;  %4955 = vrsqrt.f32 %v3837_v11 }
0x167f   :  { %v3842_v37 = vmul.f32 %v4950_v52, %v3810_v45 }
0x1680   :  { %v4952_v54 = vpop.eup %4951 }
0x1681   :  { %v3852_v43 = vmul.f32 %v4094_v24, %v3842_v37  ;;  %v3843_v7 = vmul.f32 %v4952_v54, %v3811_v63 }
0x1683   :  { %v3862_v12 = vadd.f32 %v4095_v22, %v3852_v43  ;;  %v3853_v28 = vmul.f32 %v4094_v24, %v3843_v7 }
0x1685   :  { %3866 = vst.msk [vmem:[#allocation2] sm:$0xff] %vm65_vm0, %v3862_v12  ;;  %v3863_v26 = vadd.f32 %v4095_v22, %v3853_v28 }
0x1686   :  { %v4954_v49 = vpop.eup %4953 }
0x1687   :  { %3867 = vst.msk [vmem:[#allocation2 + $0x8] sm:$0xff] %vm65_vm0, %v3863_v26  ;;  %v3844_v1 = vmul.f32 %v4954_v49, %v3812_v44 }
0x1688   :  { %v4956_v9 = vpop.eup %4955 }
0x1689   :  { %v3854_v34 = vmul.f32 %v4094_v24, %v3844_v1  ;;  %v3845_v18 = vmul.f32 %v4956_v9, %v3813_v33 }
0x168b   :  { %v3864_v14 = vadd.f32 %v4095_v22, %v3854_v34  ;;  %v3855_v4 = vmul.f32 %v4094_v24, %v3845_v18 }
0x168d   :  { %3868 = vst.msk [vmem:[#allocation2 + $0x10] sm:$0xff] %vm65_vm0, %v3864_v14  ;;  %v3865_v23 = vadd.f32 %v4095_v22, %v3855_v4 }
0x168f   :  { %3869 = vst.msk [vmem:[#allocation2 + $0x18] sm:$0xff] %vm65_vm0, %v3865_v23 }
0x1690   :  { %4972 = shalt.err (!%p4969_p4)
}
0x1691   :  { %s4973_s2 = scalar_lea.hbm %s6285_s15, 512 }
0x1692   :  { %p4974_p5 = scmp.ne.s32.totalorder %s6285_s15, %s4973_s2  ;;  %p4977_p6 = scmp.lt.u32.totalorder %s4973_s2, %s6285_s15 }
0x1694   :  { %p4979_p7 = pnand %p4977_p6, %p4974_p5 }
0x1696   :  { %4982 = shalt.err (!%p4979_p7)
}
0x1697   :  { %s4996_s21 = smov 128   ;;  %s4997_s9 = smov 8  }
0x1698   :  { %3881 = dma.vmem_to_hbm [thread:$0]  %s3876_s28, 512, %s6285_s15, [#allocation3], %s4996_s21, %s4996_s21, %s4997_s9  }
0x1699   :  { %4983 = dma.done.wait [#allocation3], 512  }
0x169a   :  { %4984 = vsyncadd [#allocation3], 4294966784 }
0x169b   :  { %3885 = vsyncpa [#allocation3], 1 }

</bundles_post_ra>
